<compile_context>
chip_gen: v7x
topology: tpu7x:2x2x1
jax: 0.10.0
libtpu: 0.0.40
codegen_flags: <defaults>
</compile_context>

<pallas_src>
import functools

import jax
import jax.numpy as jnp
from jax.experimental import pallas as pl
from jax.experimental.pallas import tpu as pltpu


# ---------------------------------------------------------------------------
# Hardware-aware tiling helpers
# ---------------------------------------------------------------------------

def _round_up(x, m):
    return ((x + m - 1) // m) * m


def _physical_vmem_bytes():
    try:
        return int(pltpu.get_tpu_info().vmem_capacity_bytes)
    except Exception:
        return 64 * 1024 * 1024          # conservative (v7x-sized) fallback


def _preferred_cout_tile():
    try:
        kind = jax.devices()[0].device_kind.lower()
    except Exception:
        kind = ""
    if any(g in kind for g in ("v2", "v3", "v4", "v5")):
        return 128                        # 128-wide MXU generations
    return 256                            # v6e / v7x


def _pick_cout_tile(cout):
    pref = _preferred_cout_tile()
    for t in (pref, 256, 128):
        if t <= cout and cout % t == 0:
            return t
    return cout                           # small / odd channel counts: one tile


def _conv_step_vmem_bytes(th, wp, cin, tn, fused):
    """Rough per-grid-step VMEM footprint of the conv kernel (bytes)."""
    rows = th * wp
    halo_rows = (th + 2) * wp + 16
    in_bytes = (rows + 2 * wp) * cin * 2            # mid + top + bot tiles (bf16)
    y_bytes = rows * tn * 2                         # raw conv output tile (bf16)
    w_bytes = 9 * cin * tn * 2                      # weight tile (bf16)
    acc_bytes = rows * tn * 4                       # f32 accumulator scratch
    xf_bytes = halo_rows * cin * 2                  # assembled halo scratch
    tmp_bytes = rows * cin * 2 + (halo_rows * cin * 4 if fused else 0)
    # inputs / outputs are double buffered by the BlockSpec pipeline
    return (2 * (in_bytes + y_bytes) + 2 * w_bytes + acc_bytes + xf_bytes
            + tmp_bytes + (1 << 20))


def _pick_row_tile(h, batch, n_ct, wp, cin, tn, fused, phys_vmem):
    """Largest divisor of H fitting the per-step VMEM budget, preferring a
    grid with enough steps to pipeline (and feed both v7x TensorCores)."""
    budget = min(max(phys_vmem // 6, 8 << 20), 24 << 20)
    divisors = [t for t in range(1, h + 1) if h % t == 0]
    fitting = [t for t in divisors
               if _conv_step_vmem_bytes(t, wp, cin, tn, fused) <= budget]
    if not fitting:
        fitting = [1]
    enough_steps = [t for t in fitting if batch * n_ct * (h // t) >= 8]
    pool = enough_steps if enough_steps else fitting
    return max(pool)


def _compiler_params():
    phys = _physical_vmem_bytes()
    # ~96 MiB scoped limit on v5e/v6e (128 MiB physical), ~48 MiB on v7x.
    return pltpu.CompilerParams(
        dimension_semantics=("parallel", "parallel", "parallel"),
        vmem_limit_bytes=int(min(phys * 3 // 4, 100 << 20)),
    )


# ---------------------------------------------------------------------------
# Pallas kernels
# ---------------------------------------------------------------------------

def _conv3x3_bn_stats_kernel(x_top_ref, x_mid_ref, x_bot_ref, w_ref,
                             scale_ref, shift_ref,
                             y_ref, psum_ref, psumsq_ref,
                             xf_ref, acc_ref,
                             *, th, wp, width, fuse_input):
    """3x3 'same' conv for one (row-tile, cout-tile) block + partial BN stats.

    Storage convention ("pad convention"): rows are wp wide, valid data in
    columns 1..width; column 0 and columns width+1..wp-1 hold zeros (layer-1
    input) or junk (intermediate activations, masked here).

    x_top / x_bot are one-row halos above/below the tile (fetched through a
    clamped index map; zeroed here at image boundaries).

    If fuse_input: the previous layer's BatchNorm affine + ReLU is applied to
    the loaded tiles (per input channel scale/shift) before the convolution.
    """
    i = pl.program_id(2)
    n_rt = pl.num_programs(2)
    cin = x_mid_ref.shape[-1]
    tn = y_ref.shape[-1]
    rows = th * wp
    f32 = jnp.float32

    col_in = jax.lax.broadcasted_iota(jnp.int32, (1, wp, 1), 1)
    in_valid = ((col_in >= 1) & (col_in <= width)).astype(f32)

    def prep(piece, row_factor):
        x = piece                                        # (..., wp, cin) bf16
        if fuse_input:
            a = jnp.maximum(
                x.astype(f32) * scale_ref[...] + shift_ref[...], 0.0)
            x = (a * in_valid).astype(jnp.bfloat16)      # padding columns -> 0
        if row_factor is not None:
            x = x * row_factor                           # zero halo rows at edges
        return x.reshape(-1, cin)

    top_factor = jnp.where(i > 0, 1.0, 0.0).astype(jnp.bfloat16)
    bot_factor = jnp.where(i < n_rt - 1, 1.0, 0.0).astype(jnp.bfloat16)
    zeros8 = jnp.zeros((8, cin), jnp.bfloat16)

    # Assemble flattened halo tile: [8 zero rows | top | mid | bot | 8 zero rows]
    xf_ref[pl.ds(0, 8), :] = zeros8
    xf_ref[pl.ds(8, wp), :] = prep(x_top_ref[0], top_factor)
    xf_ref[pl.ds(8 + wp, rows), :] = prep(x_mid_ref[0], None)
    xf_ref[pl.ds(8 + wp + rows, wp), :] = prep(x_bot_ref[0], bot_factor)
    xf_ref[pl.ds(8 + 2 * wp + rows, 8), :] = zeros8

    # 9 shifted-slice matmuls, accumulated into a f32 VMEM scratch ref so the
    # MXU result path (MRB on v7x) can carry the accumulation.
    # NOTE: for tiny Cin, folding the kw taps into the matmul K dimension
    # would raise MXU utilization further (not done: lowering risk).
    for kh in range(3):
        for kw in range(3):
            off = 7 + kh * wp + kw
            contrib = jnp.dot(xf_ref[pl.ds(off, rows), :], w_ref[kh, kw],
                              preferred_element_type=f32)
            if kh == 0 and kw == 0:
                acc_ref[...] = contrib
            else:
                acc_ref[...] += contrib

    acc = acc_ref[...]
    y_ref[...] = acc.reshape(1, th, wp, tn).astype(y_ref.dtype)

    # Per-tile partial sums over valid positions (two-phase train-mode BN).
    col_out = jax.lax.broadcasted_iota(jnp.int32, (rows, 1), 0) % wp
    valid = ((col_out >= 1) & (col_out <= width)).astype(f32)
    masked = acc * valid
    psum_ref[...] = jnp.sum(masked, axis=0,
                            keepdims=True).reshape(1, 1, 1, tn)
    psumsq_ref[...] = jnp.sum(masked * acc, axis=0,
                              keepdims=True).reshape(1, 1, 1, tn)


def _bn_relu_epilogue_kernel(y_ref, scale_ref, shift_ref, o_ref, *, width):
    """Final-layer epilogue: relu(y*scale+shift), junk columns stripped."""
    y = y_ref[...].astype(jnp.float32)                   # (1, th, wp, tn)
    a = jnp.maximum(y * scale_ref[...] + shift_ref[...], 0.0)
    o_ref[...] = a[:, :, 1:width + 1, :].astype(o_ref.dtype)


# ---------------------------------------------------------------------------
# pallas_call wrappers
# ---------------------------------------------------------------------------

def conv3x3_bn_stats(x_pad, w_hwio, in_scale, in_shift, *, width, fuse_input):
    """Raw 3x3 conv (optionally fused with the previous layer's BN+ReLU on
    its input) plus per-tile partial BatchNorm statistics.

    x_pad  : (B, H, Wp, Cin) bf16 in pad convention (valid cols 1..width).
    Returns y_raw (B, H, Wp, Cout) bf16 (pad convention, junk cols included)
    and psum/psumsq (B, n_row_tiles, 1, Cout) f32 partial sums.
    """
    batch, h, wp, cin = x_pad.shape
    cout = w_hwio.shape[-1]
    tn = _pick_cout_tile(cout)
    n_ct = cout // tn
    th = _pick_row_tile(h, batch, n_ct, wp, cin, tn, fuse_input,
                        _physical_vmem_bytes())
    n_rt = h // th
    rows = th * wp

    kernel = functools.partial(_conv3x3_bn_stats_kernel, th=th, wp=wp,
                               width=width, fuse_input=fuse_input)
    return pl.pallas_call(
        kernel,
        out_shape=(
            jax.ShapeDtypeStruct((batch, h, wp, cout), jnp.bfloat16),
            jax.ShapeDtypeStruct((batch, n_rt, 1, cout), jnp.float32),
            jax.ShapeDtypeStruct((batch, n_rt, 1, cout), jnp.float32),
        ),
        grid_spec=pltpu.PrefetchScalarGridSpec(
            num_scalar_prefetch=0,
            # cout tiles outermost -> weight block index constant across all
            # inner (batch, row) steps, so the weight is DMA'd once per tile.
            grid=(n_ct, batch, n_rt),
            in_specs=[
                pl.BlockSpec((1, 1, wp, cin),
                             lambda j, b, i: (b, jnp.maximum(i * th - 1, 0), 0, 0)),
                pl.BlockSpec((1, th, wp, cin), lambda j, b, i: (b, i, 0, 0)),
                pl.BlockSpec((1, 1, wp, cin),
                             lambda j, b, i: (b, jnp.minimum(i * th + th, h - 1), 0, 0)),
                pl.BlockSpec((3, 3, cin, tn), lambda j, b, i: (0, 0, 0, j)),
                pl.BlockSpec((1, cin), lambda j, b, i: (0, 0)),
                pl.BlockSpec((1, cin), lambda j, b, i: (0, 0)),
            ],
            out_specs=(
                pl.BlockSpec((1, th, wp, tn), lambda j, b, i: (b, i, 0, j)),
                pl.BlockSpec((1, 1, 1, tn), lambda j, b, i: (b, i, 0, j)),
                pl.BlockSpec((1, 1, 1, tn), lambda j, b, i: (b, i, 0, j)),
            ),
            scratch_shapes=[
                pltpu.VMEM(((th + 2) * wp + 16, cin), jnp.bfloat16),
                pltpu.VMEM((rows, tn), jnp.float32),
            ],
        ),
        compiler_params=_compiler_params(),
    )(x_pad, x_pad, x_pad, w_hwio, in_scale, in_shift)


def bn_relu_epilogue(y_raw, scale, shift, *, width, out_dtype=jnp.float32):
    """Final-layer relu(y*scale+shift); writes a clean (B, H, W, C) tensor."""
    batch, h, wp, cout = y_raw.shape
    tn = _pick_cout_tile(cout)
    n_ct = cout // tn
    th = _pick_row_tile(h, batch, n_ct, wp, cout, tn, False,
                        _physical_vmem_bytes())
    n_rt = h // th
    kernel = functools.partial(_bn_relu_epilogue_kernel, width=width)
    return pl.pallas_call(
        kernel,
        out_shape=jax.ShapeDtypeStruct((batch, h, width, cout), out_dtype),
        grid_spec=pltpu.PrefetchScalarGridSpec(
            num_scalar_prefetch=0,
            grid=(n_ct, batch, n_rt),
            in_specs=[
                pl.BlockSpec((1, th, wp, tn), lambda j, b, i: (b, i, 0, j)),
                pl.BlockSpec((1, tn), lambda j, b, i: (0, j)),
                pl.BlockSpec((1, tn), lambda j, b, i: (0, j)),
            ],
            out_specs=pl.BlockSpec((1, th, width, tn),
                                   lambda j, b, i: (b, i, 0, j)),
        ),
        compiler_params=_compiler_params(),
    )(y_raw, scale, shift)


# ---------------------------------------------------------------------------
# JAX glue: BN statistics finalization and the DoubleConv forward pass
# ---------------------------------------------------------------------------

def _finalize_bn(psum, psumsq, gamma, beta, count, eps):
    total = jnp.sum(psum, axis=(0, 1, 2))
    total_sq = jnp.sum(psumsq, axis=(0, 1, 2))
    mean = total / count
    var = jnp.maximum(total_sq / count - mean * mean, 0.0)   # biased batch var
    inv_std = jax.lax.rsqrt(var + eps)
    scale = (gamma * inv_std).astype(jnp.float32)
    shift = (beta - mean * scale).astype(jnp.float32)
    return scale.reshape(1, -1), shift.reshape(1, -1)


def double_conv(x_nchw, params, *, eps=1e-5):
    """Forward pass of the PyTorch DoubleConv module (BatchNorm in training
    mode, i.e. batch statistics).  NCHW in / NCHW float32 out.

    params = ((W1, gamma1, beta1), (W2, gamma2, beta2)), W in HWIO layout
    (3, 3, Cin, Cout).  Conv biases are omitted on purpose: a per-channel
    constant added before train-mode BN mean subtraction cancels exactly.
    """
    (w1, g1, b1), (w2, g2, b2) = params
    x = jnp.transpose(x_nchw, (0, 2, 3, 1)).astype(jnp.bfloat16)   # NHWC bf16
    batch, h, width, cin = x.shape
    wp = _round_up(width + 2, 8)
    # Pad convention: valid data in columns 1..width, zeros elsewhere.
    x_pad = jnp.pad(x, ((0, 0), (0, 0), (1, wp - width - 1), (0, 0)))
    count = batch * h * width

    dummy = jnp.zeros((1, cin), jnp.float32)
    y1, ps1, pss1 = conv3x3_bn_stats(x_pad, w1.astype(jnp.bfloat16),
                                     dummy, dummy,
                                     width=width, fuse_input=False)
    scale1, shift1 = _finalize_bn(ps1, pss1, g1, b1, count, eps)

    # Layer 2 consumes layer 1's *raw* conv output; its conv kernel applies
    # relu(y1 * scale1 + shift1) to each loaded tile (fused BN+ReLU).
    y2, ps2, pss2 = conv3x3_bn_stats(y1, w2.astype(jnp.bfloat16),
                                     scale1, shift1,
                                     width=width, fuse_input=True)
    scale2, shift2 = _finalize_bn(ps2, pss2, g2, b2, count, eps)

    out_nhwc = bn_relu_epilogue(y2, scale2, shift2, width=width,
                                out_dtype=jnp.float32)
    return jnp.transpose(out_nhwc, (0, 3, 1, 2))                   # -> NCHW


# ---------------------------------------------------------------------------
# Parameters and pure-JAX reference
# ---------------------------------------------------------------------------

def init_double_conv_params(key, in_channels, out_channels):
    def one_layer(k, cin, cout):
        k1, k2, k3 = jax.random.split(k, 3)
        w = jax.random.normal(k1, (3, 3, cin, cout), jnp.float32)
        w = w / jnp.sqrt(9.0 * cin)
        gamma = 1.0 + 0.1 * jax.random.normal(k2, (cout,), jnp.float32)
        beta = 0.1 * jax.random.normal(k3, (cout,), jnp.float32)
        return (w, gamma, beta)

    k1, k2 = jax.random.split(key)
    return (one_layer(k1, in_channels, out_channels),
            one_layer(k2, out_channels, out_channels))


def reference_double_conv(x_nchw, params, eps=1e-5):
    """Pure-JAX reference (f32 math, same bf16 input/weight rounding)."""
    x = jnp.transpose(x_nchw, (0, 2, 3, 1))
    x = x.astype(jnp.bfloat16).astype(jnp.float32)
    for (w_hwio, gamma, beta) in params:
        w = w_hwio.astype(jnp.bfloat16).astype(jnp.float32)
        y = jax.lax.conv_general_dilated(
            x, w, window_strides=(1, 1), padding="SAME",
            dimension_numbers=("NHWC", "HWIO", "NHWC"))
        mean = jnp.mean(y, axis=(0, 1, 2))
        var = jnp.mean((y - mean) ** 2, axis=(0, 1, 2))
        y = (y - mean) * jax.lax.rsqrt(var + eps) * gamma + beta
        x = jnp.maximum(y, 0.0)
    return jnp.transpose(x, (0, 3, 1, 2))


# ---------------------------------------------------------------------------
# Main
# ---------------------------------------------------------------------------

if __name__ == "__main__":
    key = jax.random.PRNGKey(0)
    kx, kp = jax.random.split(key)

    batch, in_channels, out_channels, hw = 2, 4, 32, 16
    x = jax.random.normal(kx, (batch, in_channels, hw, hw), jnp.float32)
    params = init_double_conv_params(kp, in_channels, out_channels)

    fwd = jax.jit(double_conv)
    out = jax.block_until_ready(fwd(x, params))

    assert out.shape == (batch, out_channels, hw, hw), out.shape
    assert bool(jnp.all(jnp.isfinite(out)))

    # Sanity check against a pure-JAX/XLA reference (bf16 MXU inputs ->
    # loose but meaningful tolerance on the O(1) normalized outputs).
    ref = reference_double_conv(x, params)
    max_err = float(jnp.max(jnp.abs(out - ref)))
    mean_err = float(jnp.mean(jnp.abs(out - ref)))
    assert max_err < 0.25 and mean_err < 0.05, (max_err, mean_err)

    print("KERNEL_OK")
</pallas_src>

<mosaic_0001>
module attributes {stable_mosaic.version = 11 : i64} {
  func.func @_conv3x3_bn_stats_kernel(%arg0: i32, %arg1: i32, %arg2: i32, %arg3: memref<1x1x24x4xbf16, #tpu.memory_space<vmem>>, %arg4: memref<1x4x24x4xbf16, #tpu.memory_space<vmem>>, %arg5: memref<1x1x24x4xbf16, #tpu.memory_space<vmem>>, %arg6: memref<3x3x4x32xbf16, #tpu.memory_space<vmem>>, %arg7: memref<1x4xf32, #tpu.memory_space<vmem>>, %arg8: memref<1x4xf32, #tpu.memory_space<vmem>>, %arg9: memref<1x4x24x32xbf16, #tpu.memory_space<vmem>>, %arg10: memref<1x1x1x32xf32, #tpu.memory_space<vmem>>, %arg11: memref<1x1x1x32xf32, #tpu.memory_space<vmem>>, %arg12: memref<160x4xbf16, #tpu.memory_space<vmem>>, %arg13: memref<96x32xf32, #tpu.memory_space<vmem>>) attributes {dimension_semantics = [#tpu.dimension_semantics<parallel>, #tpu.dimension_semantics<parallel>, #tpu.dimension_semantics<parallel>], iteration_bounds = array<i64: 1, 2, 4>, scalar_prefetch = 0 : i64, scratch_operands = 2 : i64, tpu.core_type = #tpu.core_type<tc>, window_params = [{transform_indices = @transform_0, window_bounds = array<i64: 1, 1, 24, 4>}, {transform_indices = @transform_1, window_bounds = array<i64: 1, 4, 24, 4>}, {transform_indices = @transform_2, window_bounds = array<i64: 1, 1, 24, 4>}, {transform_indices = @transform_3, window_bounds = array<i64: 3, 3, 4, 32>}, {pipeline_mode = #tpu.pipeline_mode<synchronous>, transform_indices = @transform_4, window_bounds = array<i64: 1, 4>}, {pipeline_mode = #tpu.pipeline_mode<synchronous>, transform_indices = @transform_5, window_bounds = array<i64: 1, 4>}, {transform_indices = @transform_6, window_bounds = array<i64: 1, 4, 24, 32>}, {transform_indices = @transform_7, window_bounds = array<i64: 1, 1, 1, 32>}, {transform_indices = @transform_8, window_bounds = array<i64: 1, 1, 1, 32>}]} {
    %c0_i32 = arith.constant 0 : i32
    %0 = arith.cmpi sgt, %arg2, %c0_i32 : i32
    %cst = arith.constant 1.000000e+00 : f32
    %cst_0 = arith.constant 0.000000e+00 : f32
    %1 = arith.select %0, %cst, %cst_0 : f32
    %2 = arith.truncf %1 : f32 to bf16
    %c3_i32 = arith.constant 3 : i32
    %3 = arith.cmpi slt, %arg2, %c3_i32 : i32
    %cst_1 = arith.constant 1.000000e+00 : f32
    %cst_2 = arith.constant 0.000000e+00 : f32
    %4 = arith.select %3, %cst_1, %cst_2 : f32
    %5 = arith.truncf %4 : f32 to bf16
    %cst_3 = arith.constant 0.000000e+00 : bf16
    %6 = vector.broadcast %cst_3 : bf16 to vector<8x4xbf16>
    %c0 = arith.constant 0 : index
    %c0_4 = arith.constant 0 : index
    %7 = vector.load %arg12[%c0, %c0_4] : memref<160x4xbf16, #tpu.memory_space<vmem>>, vector<8x4xbf16>
    tpu.vector_store %arg12[%c0, %c0_4], %6 {strides = array<i32>} : memref<160x4xbf16, #tpu.memory_space<vmem>>, vector<8x4xbf16>,
    %c0_5 = arith.constant 0 : index
    %c0_6 = arith.constant 0 : index
    %c0_7 = arith.constant 0 : index
    %c0_8 = arith.constant 0 : index
    %8 = vector.load %arg3[%c0_5, %c0_6, %c0_7, %c0_8] : memref<1x1x24x4xbf16, #tpu.memory_space<vmem>>, vector<1x1x24x4xbf16>
    %9 = vector.shape_cast %8 : vector<1x1x24x4xbf16> to vector<1x24x4xbf16>
    %10 = vector.broadcast %2 : bf16 to vector<1x24x4xbf16>
    %11 = arith.mulf %9, %10 : vector<1x24x4xbf16>
    %12 = vector.shape_cast %11 : vector<1x24x4xbf16> to vector<24x4xbf16>
    %c8 = arith.constant 8 : index
    %c0_9 = arith.constant 0 : index
    %13 = vector.load %arg12[%c8, %c0_9] : memref<160x4xbf16, #tpu.memory_space<vmem>>, vector<24x4xbf16>
    tpu.vector_store %arg12[%c8, %c0_9], %12 {strides = array<i32>} : memref<160x4xbf16, #tpu.memory_space<vmem>>, vector<24x4xbf16>,
    %c0_10 = arith.constant 0 : index
    %c0_11 = arith.constant 0 : index
    %c0_12 = arith.constant 0 : index
    %c0_13 = arith.constant 0 : index
    %14 = vector.load %arg4[%c0_10, %c0_11, %c0_12, %c0_13] : memref<1x4x24x4xbf16, #tpu.memory_space<vmem>>, vector<1x4x24x4xbf16>
    %15 = vector.shape_cast %14 : vector<1x4x24x4xbf16> to vector<4x24x4xbf16>
    %16 = vector.shape_cast %15 : vector<4x24x4xbf16> to vector<96x4xbf16>
    %c32 = arith.constant 32 : index
    %c0_14 = arith.constant 0 : index
    %17 = vector.load %arg12[%c32, %c0_14] : memref<160x4xbf16, #tpu.memory_space<vmem>>, vector<96x4xbf16>
    tpu.vector_store %arg12[%c32, %c0_14], %16 {strides = array<i32>} : memref<160x4xbf16, #tpu.memory_space<vmem>>, vector<96x4xbf16>,
    %c0_15 = arith.constant 0 : index
    %c0_16 = arith.constant 0 : index
    %c0_17 = arith.constant 0 : index
    %c0_18 = arith.constant 0 : index
    %18 = vector.load %arg5[%c0_15, %c0_16, %c0_17, %c0_18] : memref<1x1x24x4xbf16, #tpu.memory_space<vmem>>, vector<1x1x24x4xbf16>
    %19 = vector.shape_cast %18 : vector<1x1x24x4xbf16> to vector<1x24x4xbf16>
    %20 = vector.broadcast %5 : bf16 to vector<1x24x4xbf16>
    %21 = arith.mulf %19, %20 : vector<1x24x4xbf16>
    %22 = vector.shape_cast %21 : vector<1x24x4xbf16> to vector<24x4xbf16>
    %c128 = arith.constant 128 : index
    %c0_19 = arith.constant 0 : index
    %23 = vector.load %arg12[%c128, %c0_19] : memref<160x4xbf16, #tpu.memory_space<vmem>>, vector<24x4xbf16>
    tpu.vector_store %arg12[%c128, %c0_19], %22 {strides = array<i32>} : memref<160x4xbf16, #tpu.memory_space<vmem>>, vector<24x4xbf16>,
    %c152 = arith.constant 152 : index
    %c0_20 = arith.constant 0 : index
    %24 = vector.load %arg12[%c152, %c0_20] : memref<160x4xbf16, #tpu.memory_space<vmem>>, vector<8x4xbf16>
    tpu.vector_store %arg12[%c152, %c0_20], %6 {strides = array<i32>} : memref<160x4xbf16, #tpu.memory_space<vmem>>, vector<8x4xbf16>,
    %c7 = arith.constant 7 : index
    %c0_21 = arith.constant 0 : index
    %25 = vector.load %arg12[%c7, %c0_21] : memref<160x4xbf16, #tpu.memory_space<vmem>>, vector<96x4xbf16>
    %c0_22 = arith.constant 0 : index
    %c0_23 = arith.constant 0 : index
    %c0_24 = arith.constant 0 : index
    %c0_25 = arith.constant 0 : index
    %26 = vector.load %arg6[%c0_22, %c0_23, %c0_24, %c0_25] : memref<3x3x4x32xbf16, #tpu.memory_space<vmem>>, vector<1x1x4x32xbf16>
    %27 = vector.shape_cast %26 : vector<1x1x4x32xbf16> to vector<4x32xbf16>
    %cst_26 = arith.constant dense<0.000000e+00> : vector<96x32xf32>
    %28 = tpu.matmul %25, %27, %cst_26 {dimension_numbers = #tpu.dot_dimension_numbers<[1], [0], [0], [1], [0, 0, 1, 1], [], []>} : vector<96x4xbf16>, vector<4x32xbf16>, vector<96x32xf32> -> vector<96x32xf32>
    %c0_27 = arith.constant 0 : index
    %c0_28 = arith.constant 0 : index
    %29 = vector.load %arg13[%c0_27, %c0_28] : memref<96x32xf32, #tpu.memory_space<vmem>>, vector<96x32xf32>
    tpu.vector_store %arg13[%c0_27, %c0_28], %28 {strides = array<i32>} : memref<96x32xf32, #tpu.memory_space<vmem>>, vector<96x32xf32>,
    %c8_29 = arith.constant 8 : index
    %c0_30 = arith.constant 0 : index
    %30 = vector.load %arg12[%c8_29, %c0_30] : memref<160x4xbf16, #tpu.memory_space<vmem>>, vector<96x4xbf16>
    %c0_31 = arith.constant 0 : index
    %c1 = arith.constant 1 : index
    %c0_32 = arith.constant 0 : index
    %c0_33 = arith.constant 0 : index
    %31 = vector.load %arg6[%c0_31, %c1, %c0_32, %c0_33] : memref<3x3x4x32xbf16, #tpu.memory_space<vmem>>, vector<1x1x4x32xbf16>
    %32 = vector.shape_cast %31 : vector<1x1x4x32xbf16> to vector<4x32xbf16>
    %cst_34 = arith.constant dense<0.000000e+00> : vector<96x32xf32>
    %33 = tpu.matmul %30, %32, %cst_34 {dimension_numbers = #tpu.dot_dimension_numbers<[1], [0], [0], [1], [0, 0, 1, 1], [], []>} : vector<96x4xbf16>, vector<4x32xbf16>, vector<96x32xf32> -> vector<96x32xf32>
    %c0_35 = arith.constant 0 : index
    %c0_36 = arith.constant 0 : index
    %34 = vector.load %arg13[%c0_35, %c0_36] : memref<96x32xf32, #tpu.memory_space<vmem>>, vector<96x32xf32>
    %35 = arith.addf %34, %33 : vector<96x32xf32>
    %c0_37 = arith.constant 0 : index
    %c0_38 = arith.constant 0 : index
    %36 = vector.load %arg13[%c0_37, %c0_38] : memref<96x32xf32, #tpu.memory_space<vmem>>, vector<96x32xf32>
    tpu.vector_store %arg13[%c0_37, %c0_38], %35 {strides = array<i32>} : memref<96x32xf32, #tpu.memory_space<vmem>>, vector<96x32xf32>,
    %c9 = arith.constant 9 : index
    %c0_39 = arith.constant 0 : index
    %37 = vector.load %arg12[%c9, %c0_39] : memref<160x4xbf16, #tpu.memory_space<vmem>>, vector<96x4xbf16>
    %c0_40 = arith.constant 0 : index
    %c2 = arith.constant 2 : index
    %c0_41 = arith.constant 0 : index
    %c0_42 = arith.constant 0 : index
    %38 = vector.load %arg6[%c0_40, %c2, %c0_41, %c0_42] : memref<3x3x4x32xbf16, #tpu.memory_space<vmem>>, vector<1x1x4x32xbf16>
    %39 = vector.shape_cast %38 : vector<1x1x4x32xbf16> to vector<4x32xbf16>
    %cst_43 = arith.constant dense<0.000000e+00> : vector<96x32xf32>
    %40 = tpu.matmul %37, %39, %cst_43 {dimension_numbers = #tpu.dot_dimension_numbers<[1], [0], [0], [1], [0, 0, 1, 1], [], []>} : vector<96x4xbf16>, vector<4x32xbf16>, vector<96x32xf32> -> vector<96x32xf32>
    %c0_44 = arith.constant 0 : index
    %c0_45 = arith.constant 0 : index
    %41 = vector.load %arg13[%c0_44, %c0_45] : memref<96x32xf32, #tpu.memory_space<vmem>>, vector<96x32xf32>
    %42 = arith.addf %41, %40 : vector<96x32xf32>
    %c0_46 = arith.constant 0 : index
    %c0_47 = arith.constant 0 : index
    %43 = vector.load %arg13[%c0_46, %c0_47] : memref<96x32xf32, #tpu.memory_space<vmem>>, vector<96x32xf32>
    tpu.vector_store %arg13[%c0_46, %c0_47], %42 {strides = array<i32>} : memref<96x32xf32, #tpu.memory_space<vmem>>, vector<96x32xf32>,
    %c31 = arith.constant 31 : index
    %c0_48 = arith.constant 0 : index
    %44 = vector.load %arg12[%c31, %c0_48] : memref<160x4xbf16, #tpu.memory_space<vmem>>, vector<96x4xbf16>
    %c1_49 = arith.constant 1 : index
    %c0_50 = arith.constant 0 : index
    %c0_51 = arith.constant 0 : index
    %c0_52 = arith.constant 0 : index
    %45 = vector.load %arg6[%c1_49, %c0_50, %c0_51, %c0_52] : memref<3x3x4x32xbf16, #tpu.memory_space<vmem>>, vector<1x1x4x32xbf16>
    %46 = vector.shape_cast %45 : vector<1x1x4x32xbf16> to vector<4x32xbf16>
    %cst_53 = arith.constant dense<0.000000e+00> : vector<96x32xf32>
    %47 = tpu.matmul %44, %46, %cst_53 {dimension_numbers = #tpu.dot_dimension_numbers<[1], [0], [0], [1], [0, 0, 1, 1], [], []>} : vector<96x4xbf16>, vector<4x32xbf16>, vector<96x32xf32> -> vector<96x32xf32>
    %c0_54 = arith.constant 0 : index
    %c0_55 = arith.constant 0 : index
    %48 = vector.load %arg13[%c0_54, %c0_55] : memref<96x32xf32, #tpu.memory_space<vmem>>, vector<96x32xf32>
    %49 = arith.addf %48, %47 : vector<96x32xf32>
    %c0_56 = arith.constant 0 : index
    %c0_57 = arith.constant 0 : index
    %50 = vector.load %arg13[%c0_56, %c0_57] : memref<96x32xf32, #tpu.memory_space<vmem>>, vector<96x32xf32>
    tpu.vector_store %arg13[%c0_56, %c0_57], %49 {strides = array<i32>} : memref<96x32xf32, #tpu.memory_space<vmem>>, vector<96x32xf32>,
    %c32_58 = arith.constant 32 : index
    %c0_59 = arith.constant 0 : index
    %51 = vector.load %arg12[%c32_58, %c0_59] : memref<160x4xbf16, #tpu.memory_space<vmem>>, vector<96x4xbf16>
    %c1_60 = arith.constant 1 : index
    %c1_61 = arith.constant 1 : index
    %c0_62 = arith.constant 0 : index
    %c0_63 = arith.constant 0 : index
    %52 = vector.load %arg6[%c1_60, %c1_61, %c0_62, %c0_63] : memref<3x3x4x32xbf16, #tpu.memory_space<vmem>>, vector<1x1x4x32xbf16>
    %53 = vector.shape_cast %52 : vector<1x1x4x32xbf16> to vector<4x32xbf16>
    %cst_64 = arith.constant dense<0.000000e+00> : vector<96x32xf32>
    %54 = tpu.matmul %51, %53, %cst_64 {dimension_numbers = #tpu.dot_dimension_numbers<[1], [0], [0], [1], [0, 0, 1, 1], [], []>} : vector<96x4xbf16>, vector<4x32xbf16>, vector<96x32xf32> -> vector<96x32xf32>
    %c0_65 = arith.constant 0 : index
    %c0_66 = arith.constant 0 : index
    %55 = vector.load %arg13[%c0_65, %c0_66] : memref<96x32xf32, #tpu.memory_space<vmem>>, vector<96x32xf32>
    %56 = arith.addf %55, %54 : vector<96x32xf32>
    %c0_67 = arith.constant 0 : index
    %c0_68 = arith.constant 0 : index
    %57 = vector.load %arg13[%c0_67, %c0_68] : memref<96x32xf32, #tpu.memory_space<vmem>>, vector<96x32xf32>
    tpu.vector_store %arg13[%c0_67, %c0_68], %56 {strides = array<i32>} : memref<96x32xf32, #tpu.memory_space<vmem>>, vector<96x32xf32>,
    %c33 = arith.constant 33 : index
    %c0_69 = arith.constant 0 : index
    %58 = vector.load %arg12[%c33, %c0_69] : memref<160x4xbf16, #tpu.memory_space<vmem>>, vector<96x4xbf16>
    %c1_70 = arith.constant 1 : index
    %c2_71 = arith.constant 2 : index
    %c0_72 = arith.constant 0 : index
    %c0_73 = arith.constant 0 : index
    %59 = vector.load %arg6[%c1_70, %c2_71, %c0_72, %c0_73] : memref<3x3x4x32xbf16, #tpu.memory_space<vmem>>, vector<1x1x4x32xbf16>
    %60 = vector.shape_cast %59 : vector<1x1x4x32xbf16> to vector<4x32xbf16>
    %cst_74 = arith.constant dense<0.000000e+00> : vector<96x32xf32>
    %61 = tpu.matmul %58, %60, %cst_74 {dimension_numbers = #tpu.dot_dimension_numbers<[1], [0], [0], [1], [0, 0, 1, 1], [], []>} : vector<96x4xbf16>, vector<4x32xbf16>, vector<96x32xf32> -> vector<96x32xf32>
    %c0_75 = arith.constant 0 : index
    %c0_76 = arith.constant 0 : index
    %62 = vector.load %arg13[%c0_75, %c0_76] : memref<96x32xf32, #tpu.memory_space<vmem>>, vector<96x32xf32>
    %63 = arith.addf %62, %61 : vector<96x32xf32>
    %c0_77 = arith.constant 0 : index
    %c0_78 = arith.constant 0 : index
    %64 = vector.load %arg13[%c0_77, %c0_78] : memref<96x32xf32, #tpu.memory_space<vmem>>, vector<96x32xf32>
    tpu.vector_store %arg13[%c0_77, %c0_78], %63 {strides = array<i32>} : memref<96x32xf32, #tpu.memory_space<vmem>>, vector<96x32xf32>,
    %c55 = arith.constant 55 : index
    %c0_79 = arith.constant 0 : index
    %65 = vector.load %arg12[%c55, %c0_79] : memref<160x4xbf16, #tpu.memory_space<vmem>>, vector<96x4xbf16>
    %c2_80 = arith.constant 2 : index
    %c0_81 = arith.constant 0 : index
    %c0_82 = arith.constant 0 : index
    %c0_83 = arith.constant 0 : index
    %66 = vector.load %arg6[%c2_80, %c0_81, %c0_82, %c0_83] : memref<3x3x4x32xbf16, #tpu.memory_space<vmem>>, vector<1x1x4x32xbf16>
    %67 = vector.shape_cast %66 : vector<1x1x4x32xbf16> to vector<4x32xbf16>
    %cst_84 = arith.constant dense<0.000000e+00> : vector<96x32xf32>
    %68 = tpu.matmul %65, %67, %cst_84 {dimension_numbers = #tpu.dot_dimension_numbers<[1], [0], [0], [1], [0, 0, 1, 1], [], []>} : vector<96x4xbf16>, vector<4x32xbf16>, vector<96x32xf32> -> vector<96x32xf32>
    %c0_85 = arith.constant 0 : index
    %c0_86 = arith.constant 0 : index
    %69 = vector.load %arg13[%c0_85, %c0_86] : memref<96x32xf32, #tpu.memory_space<vmem>>, vector<96x32xf32>
    %70 = arith.addf %69, %68 : vector<96x32xf32>
    %c0_87 = arith.constant 0 : index
    %c0_88 = arith.constant 0 : index
    %71 = vector.load %arg13[%c0_87, %c0_88] : memref<96x32xf32, #tpu.memory_space<vmem>>, vector<96x32xf32>
    tpu.vector_store %arg13[%c0_87, %c0_88], %70 {strides = array<i32>} : memref<96x32xf32, #tpu.memory_space<vmem>>, vector<96x32xf32>,
    %c56 = arith.constant 56 : index
    %c0_89 = arith.constant 0 : index
    %72 = vector.load %arg12[%c56, %c0_89] : memref<160x4xbf16, #tpu.memory_space<vmem>>, vector<96x4xbf16>
    %c2_90 = arith.constant 2 : index
    %c1_91 = arith.constant 1 : index
    %c0_92 = arith.constant 0 : index
    %c0_93 = arith.constant 0 : index
    %73 = vector.load %arg6[%c2_90, %c1_91, %c0_92, %c0_93] : memref<3x3x4x32xbf16, #tpu.memory_space<vmem>>, vector<1x1x4x32xbf16>
    %74 = vector.shape_cast %73 : vector<1x1x4x32xbf16> to vector<4x32xbf16>
    %cst_94 = arith.constant dense<0.000000e+00> : vector<96x32xf32>
    %75 = tpu.matmul %72, %74, %cst_94 {dimension_numbers = #tpu.dot_dimension_numbers<[1], [0], [0], [1], [0, 0, 1, 1], [], []>} : vector<96x4xbf16>, vector<4x32xbf16>, vector<96x32xf32> -> vector<96x32xf32>
    %c0_95 = arith.constant 0 : index
    %c0_96 = arith.constant 0 : index
    %76 = vector.load %arg13[%c0_95, %c0_96] : memref<96x32xf32, #tpu.memory_space<vmem>>, vector<96x32xf32>
    %77 = arith.addf %76, %75 : vector<96x32xf32>
    %c0_97 = arith.constant 0 : index
    %c0_98 = arith.constant 0 : index
    %78 = vector.load %arg13[%c0_97, %c0_98] : memref<96x32xf32, #tpu.memory_space<vmem>>, vector<96x32xf32>
    tpu.vector_store %arg13[%c0_97, %c0_98], %77 {strides = array<i32>} : memref<96x32xf32, #tpu.memory_space<vmem>>, vector<96x32xf32>,
    %c57 = arith.constant 57 : index
    %c0_99 = arith.constant 0 : index
    %79 = vector.load %arg12[%c57, %c0_99] : memref<160x4xbf16, #tpu.memory_space<vmem>>, vector<96x4xbf16>
    %c2_100 = arith.constant 2 : index
    %c2_101 = arith.constant 2 : index
    %c0_102 = arith.constant 0 : index
    %c0_103 = arith.constant 0 : index
    %80 = vector.load %arg6[%c2_100, %c2_101, %c0_102, %c0_103] : memref<3x3x4x32xbf16, #tpu.memory_space<vmem>>, vector<1x1x4x32xbf16>
    %81 = vector.shape_cast %80 : vector<1x1x4x32xbf16> to vector<4x32xbf16>
    %cst_104 = arith.constant dense<0.000000e+00> : vector<96x32xf32>
    %82 = tpu.matmul %79, %81, %cst_104 {dimension_numbers = #tpu.dot_dimension_numbers<[1], [0], [0], [1], [0, 0, 1, 1], [], []>} : vector<96x4xbf16>, vector<4x32xbf16>, vector<96x32xf32> -> vector<96x32xf32>
    %c0_105 = arith.constant 0 : index
    %c0_106 = arith.constant 0 : index
    %83 = vector.load %arg13[%c0_105, %c0_106] : memref<96x32xf32, #tpu.memory_space<vmem>>, vector<96x32xf32>
    %84 = arith.addf %83, %82 : vector<96x32xf32>
    %c0_107 = arith.constant 0 : index
    %c0_108 = arith.constant 0 : index
    %85 = vector.load %arg13[%c0_107, %c0_108] : memref<96x32xf32, #tpu.memory_space<vmem>>, vector<96x32xf32>
    tpu.vector_store %arg13[%c0_107, %c0_108], %84 {strides = array<i32>} : memref<96x32xf32, #tpu.memory_space<vmem>>, vector<96x32xf32>,
    %c0_109 = arith.constant 0 : index
    %c0_110 = arith.constant 0 : index
    %86 = vector.load %arg13[%c0_109, %c0_110] : memref<96x32xf32, #tpu.memory_space<vmem>>, vector<96x32xf32>
    %87 = vector.shape_cast %86 : vector<96x32xf32> to vector<1x4x24x32xf32>
    %88 = arith.truncf %87 : vector<1x4x24x32xf32> to vector<1x4x24x32xbf16>
    %c0_111 = arith.constant 0 : index
    %c0_112 = arith.constant 0 : index
    %c0_113 = arith.constant 0 : index
    %c0_114 = arith.constant 0 : index
    %89 = vector.load %arg9[%c0_111, %c0_112, %c0_113, %c0_114] : memref<1x4x24x32xbf16, #tpu.memory_space<vmem>>, vector<1x4x24x32xbf16>
    tpu.vector_store %arg9[%c0_111, %c0_112, %c0_113, %c0_114], %88 {strides = array<i32>} : memref<1x4x24x32xbf16, #tpu.memory_space<vmem>>, vector<1x4x24x32xbf16>,
    %90 = tpu.iota {dimensions = array<i32: 0>} : vector<96x1xi32>
    %c24_i32 = arith.constant 24 : i32
    %c0_i32_115 = arith.constant 0 : i32
    %91 = arith.cmpi eq, %c24_i32, %c0_i32_115 : i32
    %c1_i32 = arith.constant 1 : i32
    %92 = arith.select %91, %c1_i32, %c24_i32 : i32
    %93 = vector.broadcast %92 : i32 to vector<96x1xi32>
    %94 = arith.remsi %90, %93 : vector<96x1xi32>
    %c0_i32_116 = arith.constant 0 : i32
    %95 = vector.broadcast %c0_i32_116 : i32 to vector<96x1xi32>
    %96 = arith.cmpi ne, %94, %95 : vector<96x1xi32>
    %c0_i32_117 = arith.constant 0 : i32
    %97 = vector.broadcast %c0_i32_117 : i32 to vector<96x1xi32>
    %98 = arith.cmpi slt, %94, %97 : vector<96x1xi32>
    %c0_i32_118 = arith.constant 0 : i32
    %99 = arith.cmpi slt, %92, %c0_i32_118 : i32
    %100 = vector.broadcast %99 : i1 to vector<96x1xi1>
    %101 = vector.broadcast %100 : vector<96x1xi1> to vector<96x1xi1>
    %102 = arith.xori %98, %101 : vector<96x1xi1>
    %103 = arith.andi %102, %96 : vector<96x1xi1>
    %104 = vector.broadcast %92 : i32 to vector<96x1xi32>
    %105 = arith.addi %94, %104 : vector<96x1xi32>
    %106 = arith.select %103, %105, %94 : vector<96x1xi1>, vector<96x1xi32>
    %c1_i32_119 = arith.constant 1 : i32
    %107 = vector.broadcast %c1_i32_119 : i32 to vector<96x1xi32>
    %108 = arith.cmpi sge, %106, %107 : vector<96x1xi32>
    %c16_i32 = arith.constant 16 : i32
    %109 = vector.broadcast %c16_i32 : i32 to vector<96x1xi32>
    %110 = arith.cmpi sle, %106, %109 : vector<96x1xi32>
    %111 = arith.andi %108, %110 : vector<96x1xi1>
    %112 = arith.extui %111 : vector<96x1xi1> to vector<96x1xi32>
    %113 = arith.sitofp %112 : vector<96x1xi32> to vector<96x1xf32>
    %114 = vector.broadcast %113 : vector<96x1xf32> to vector<96x32xf32>
    %115 = arith.mulf %86, %114 : vector<96x32xf32>
    %cst_120 = arith.constant dense<0.000000e+00> : vector<32xf32>
    %116 = vector.multi_reduction <add>, %115, %cst_120 [0] : vector<96x32xf32> to vector<32xf32>
    %117 = vector.shape_cast %116 : vector<32xf32> to vector<1x32xf32>
    %118 = vector.shape_cast %117 : vector<1x32xf32> to vector<1x1x1x32xf32>
    %c0_121 = arith.constant 0 : index
    %c0_122 = arith.constant 0 : index
    %c0_123 = arith.constant 0 : index
    %c0_124 = arith.constant 0 : index
    %119 = vector.load %arg10[%c0_121, %c0_122, %c0_123, %c0_124] : memref<1x1x1x32xf32, #tpu.memory_space<vmem>>, vector<1x1x1x32xf32>
    tpu.vector_store %arg10[%c0_121, %c0_122, %c0_123, %c0_124], %118 {strides = array<i32>} : memref<1x1x1x32xf32, #tpu.memory_space<vmem>>, vector<1x1x1x32xf32>,
    %120 = arith.mulf %115, %86 : vector<96x32xf32>
    %cst_125 = arith.constant dense<0.000000e+00> : vector<32xf32>
    %121 = vector.multi_reduction <add>, %120, %cst_125 [0] : vector<96x32xf32> to vector<32xf32>
    %122 = vector.shape_cast %121 : vector<32xf32> to vector<1x32xf32>
    %123 = vector.shape_cast %122 : vector<1x32xf32> to vector<1x1x1x32xf32>
    %c0_126 = arith.constant 0 : index
    %c0_127 = arith.constant 0 : index
    %c0_128 = arith.constant 0 : index
    %c0_129 = arith.constant 0 : index
    %124 = vector.load %arg11[%c0_126, %c0_127, %c0_128, %c0_129] : memref<1x1x1x32xf32, #tpu.memory_space<vmem>>, vector<1x1x1x32xf32>
    tpu.vector_store %arg11[%c0_126, %c0_127, %c0_128, %c0_129], %123 {strides = array<i32>} : memref<1x1x1x32xf32, #tpu.memory_space<vmem>>, vector<1x1x1x32xf32>,
    return
  }
  func.func @transform_0(%arg0: i32, %arg1: i32, %arg2: i32) -> (i32, i32, i32, i32) {
    %c4_i32 = arith.constant 4 : i32
    %0 = arith.muli %arg2, %c4_i32 : i32
    %c1_i32 = arith.constant 1 : i32
    %1 = arith.subi %0, %c1_i32 : i32
    %c0_i32 = arith.constant 0 : i32
    %2 = arith.maxsi %1, %c0_i32 : i32
    %c0_i32_0 = arith.constant 0 : i32
    %c0_i32_1 = arith.constant 0 : i32
    %c0_i32_2 = arith.constant 0 : i32
    return %arg1, %2, %c0_i32_0, %c0_i32_1 : i32, i32, i32, i32
  }
  func.func @transform_1(%arg0: i32, %arg1: i32, %arg2: i32) -> (i32, i32, i32, i32) {
    %c0_i32 = arith.constant 0 : i32
    %c0_i32_0 = arith.constant 0 : i32
    %c0_i32_1 = arith.constant 0 : i32
    return %arg1, %arg2, %c0_i32, %c0_i32_0 : i32, i32, i32, i32
  }
  func.func @transform_2(%arg0: i32, %arg1: i32, %arg2: i32) -> (i32, i32, i32, i32) {
    %c4_i32 = arith.constant 4 : i32
    %0 = arith.muli %arg2, %c4_i32 : i32
    %c4_i32_0 = arith.constant 4 : i32
    %1 = arith.addi %0, %c4_i32_0 : i32
    %c15_i32 = arith.constant 15 : i32
    %2 = arith.minsi %1, %c15_i32 : i32
    %c0_i32 = arith.constant 0 : i32
    %c0_i32_1 = arith.constant 0 : i32
    %c0_i32_2 = arith.constant 0 : i32
    return %arg1, %2, %c0_i32, %c0_i32_1 : i32, i32, i32, i32
  }
  func.func @transform_3(%arg0: i32, %arg1: i32, %arg2: i32) -> (i32, i32, i32, i32) {
    %c0_i32 = arith.constant 0 : i32
    %c0_i32_0 = arith.constant 0 : i32
    %c0_i32_1 = arith.constant 0 : i32
    %c0_i32_2 = arith.constant 0 : i32
    return %c0_i32, %c0_i32_0, %c0_i32_1, %arg0 : i32, i32, i32, i32
  }
  func.func @transform_4(%arg0: i32, %arg1: i32, %arg2: i32) -> (i32, i32) {
    %c0_i32 = arith.constant 0 : i32
    %c0_i32_0 = arith.constant 0 : i32
    %c0_i32_1 = arith.constant 0 : i32
    return %c0_i32, %c0_i32_0 : i32, i32
  }
  func.func @transform_5(%arg0: i32, %arg1: i32, %arg2: i32) -> (i32, i32) {
    %c0_i32 = arith.constant 0 : i32
    %c0_i32_0 = arith.constant 0 : i32
    %c0_i32_1 = arith.constant 0 : i32
    return %c0_i32, %c0_i32_0 : i32, i32
  }
  func.func @transform_6(%arg0: i32, %arg1: i32, %arg2: i32) -> (i32, i32, i32, i32) {
    %c0_i32 = arith.constant 0 : i32
    %c0_i32_0 = arith.constant 0 : i32
    return %arg1, %arg2, %c0_i32, %arg0 : i32, i32, i32, i32
  }
  func.func @transform_7(%arg0: i32, %arg1: i32, %arg2: i32) -> (i32, i32, i32, i32) {
    %c0_i32 = arith.constant 0 : i32
    %c0_i32_0 = arith.constant 0 : i32
    return %arg1, %arg2, %c0_i32, %arg0 : i32, i32, i32, i32
  }
  func.func @transform_8(%arg0: i32, %arg1: i32, %arg2: i32) -> (i32, i32, i32, i32) {
    %c0_i32 = arith.constant 0 : i32
    %c0_i32_0 = arith.constant 0 : i32
    return %arg1, %arg2, %c0_i32, %arg0 : i32, i32, i32, i32
  }
}

module attributes {stable_mosaic.version = 11 : i64} {
  func.func @_bn_relu_epilogue_kernel(%arg0: i32, %arg1: i32, %arg2: i32, %arg3: memref<1x4x24x32xbf16, #tpu.memory_space<vmem>>, %arg4: memref<1x32xf32, #tpu.memory_space<vmem>>, %arg5: memref<1x32xf32, #tpu.memory_space<vmem>>, %arg6: memref<1x4x16x32xf32, #tpu.memory_space<vmem>>) attributes {dimension_semantics = [#tpu.dimension_semantics<parallel>, #tpu.dimension_semantics<parallel>, #tpu.dimension_semantics<parallel>], iteration_bounds = array<i64: 1, 2, 4>, scalar_prefetch = 0 : i64, scratch_operands = 0 : i64, tpu.core_type = #tpu.core_type<tc>, window_params = [{transform_indices = @transform_0, window_bounds = array<i64: 1, 4, 24, 32>}, {transform_indices = @transform_1, window_bounds = array<i64: 1, 32>}, {transform_indices = @transform_2, window_bounds = array<i64: 1, 32>}, {transform_indices = @transform_3, window_bounds = array<i64: 1, 4, 16, 32>}]} {
    %c0 = arith.constant 0 : index
    %c0_0 = arith.constant 0 : index
    %c0_1 = arith.constant 0 : index
    %c0_2 = arith.constant 0 : index
    %0 = vector.load %arg3[%c0, %c0_0, %c0_1, %c0_2] : memref<1x4x24x32xbf16, #tpu.memory_space<vmem>>, vector<1x4x24x32xbf16>
    %1 = arith.extf %0 : vector<1x4x24x32xbf16> to vector<1x4x24x32xf32>
    %c0_3 = arith.constant 0 : index
    %c0_4 = arith.constant 0 : index
    %2 = vector.load %arg4[%c0_3, %c0_4] : memref<1x32xf32, #tpu.memory_space<vmem>>, vector<1x32xf32>
    %3 = vector.shape_cast %2 : vector<1x32xf32> to vector<1x1x1x32xf32>
    %4 = vector.broadcast %3 : vector<1x1x1x32xf32> to vector<1x4x24x32xf32>
    %5 = arith.mulf %1, %4 : vector<1x4x24x32xf32>
    %c0_5 = arith.constant 0 : index
    %c0_6 = arith.constant 0 : index
    %6 = vector.load %arg5[%c0_5, %c0_6] : memref<1x32xf32, #tpu.memory_space<vmem>>, vector<1x32xf32>
    %7 = vector.shape_cast %6 : vector<1x32xf32> to vector<1x1x1x32xf32>
    %8 = vector.broadcast %7 : vector<1x1x1x32xf32> to vector<1x4x24x32xf32>
    %9 = arith.addf %5, %8 : vector<1x4x24x32xf32>
    %cst = arith.constant 0.000000e+00 : f32
    %10 = vector.broadcast %cst : f32 to vector<1x4x24x32xf32>
    %11 = arith.maximumf %9, %10 : vector<1x4x24x32xf32>
    %12 = vector.extract_strided_slice %11 {offsets = [0, 0, 1, 0], sizes = [1, 4, 16, 32], strides = [1, 1, 1, 1]} : vector<1x4x24x32xf32> to vector<1x4x16x32xf32>
    %c0_7 = arith.constant 0 : index
    %c0_8 = arith.constant 0 : index
    %c0_9 = arith.constant 0 : index
    %c0_10 = arith.constant 0 : index
    %13 = vector.load %arg6[%c0_7, %c0_8, %c0_9, %c0_10] : memref<1x4x16x32xf32, #tpu.memory_space<vmem>>, vector<1x4x16x32xf32>
    tpu.vector_store %arg6[%c0_7, %c0_8, %c0_9, %c0_10], %12 {strides = array<i32>} : memref<1x4x16x32xf32, #tpu.memory_space<vmem>>, vector<1x4x16x32xf32>,
    return
  }
  func.func @transform_0(%arg0: i32, %arg1: i32, %arg2: i32) -> (i32, i32, i32, i32) {
    %c0_i32 = arith.constant 0 : i32
    %c0_i32_0 = arith.constant 0 : i32
    return %arg1, %arg2, %c0_i32, %arg0 : i32, i32, i32, i32
  }
  func.func @transform_1(%arg0: i32, %arg1: i32, %arg2: i32) -> (i32, i32) {
    %c0_i32 = arith.constant 0 : i32
    %c0_i32_0 = arith.constant 0 : i32
    return %c0_i32, %arg0 : i32, i32
  }
  func.func @transform_2(%arg0: i32, %arg1: i32, %arg2: i32) -> (i32, i32) {
    %c0_i32 = arith.constant 0 : i32
    %c0_i32_0 = arith.constant 0 : i32
    return %c0_i32, %arg0 : i32, i32
  }
  func.func @transform_3(%arg0: i32, %arg1: i32, %arg2: i32) -> (i32, i32, i32, i32) {
    %c0_i32 = arith.constant 0 : i32
    %c0_i32_0 = arith.constant 0 : i32
    return %arg1, %arg2, %c0_i32, %arg0 : i32, i32, i32, i32
  }
}

module attributes {stable_mosaic.version = 11 : i64} {
  func.func @_conv3x3_bn_stats_kernel(%arg0: i32, %arg1: i32, %arg2: i32, %arg3: memref<1x1x24x32xbf16, #tpu.memory_space<vmem>>, %arg4: memref<1x4x24x32xbf16, #tpu.memory_space<vmem>>, %arg5: memref<1x1x24x32xbf16, #tpu.memory_space<vmem>>, %arg6: memref<3x3x32x32xbf16, #tpu.memory_space<vmem>>, %arg7: memref<1x32xf32, #tpu.memory_space<vmem>>, %arg8: memref<1x32xf32, #tpu.memory_space<vmem>>, %arg9: memref<1x4x24x32xbf16, #tpu.memory_space<vmem>>, %arg10: memref<1x1x1x32xf32, #tpu.memory_space<vmem>>, %arg11: memref<1x1x1x32xf32, #tpu.memory_space<vmem>>, %arg12: memref<160x32xbf16, #tpu.memory_space<vmem>>, %arg13: memref<96x32xf32, #tpu.memory_space<vmem>>) attributes {dimension_semantics = [#tpu.dimension_semantics<parallel>, #tpu.dimension_semantics<parallel>, #tpu.dimension_semantics<parallel>], iteration_bounds = array<i64: 1, 2, 4>, scalar_prefetch = 0 : i64, scratch_operands = 2 : i64, tpu.core_type = #tpu.core_type<tc>, window_params = [{transform_indices = @transform_0, window_bounds = array<i64: 1, 1, 24, 32>}, {transform_indices = @transform_1, window_bounds = array<i64: 1, 4, 24, 32>}, {transform_indices = @transform_2, window_bounds = array<i64: 1, 1, 24, 32>}, {transform_indices = @transform_3, window_bounds = array<i64: 3, 3, 32, 32>}, {pipeline_mode = #tpu.pipeline_mode<synchronous>, transform_indices = @transform_4, window_bounds = array<i64: 1, 32>}, {pipeline_mode = #tpu.pipeline_mode<synchronous>, transform_indices = @transform_5, window_bounds = array<i64: 1, 32>}, {transform_indices = @transform_6, window_bounds = array<i64: 1, 4, 24, 32>}, {transform_indices = @transform_7, window_bounds = array<i64: 1, 1, 1, 32>}, {transform_indices = @transform_8, window_bounds = array<i64: 1, 1, 1, 32>}]} {
    %0 = tpu.iota {dimensions = array<i32: 1>} : vector<1x24x1xi32>
    %c1_i32 = arith.constant 1 : i32
    %1 = vector.broadcast %c1_i32 : i32 to vector<1x24x1xi32>
    %2 = arith.cmpi sge, %0, %1 : vector<1x24x1xi32>
    %c16_i32 = arith.constant 16 : i32
    %3 = vector.broadcast %c16_i32 : i32 to vector<1x24x1xi32>
    %4 = arith.cmpi sle, %0, %3 : vector<1x24x1xi32>
    %5 = arith.andi %2, %4 : vector<1x24x1xi1>
    %6 = arith.extui %5 : vector<1x24x1xi1> to vector<1x24x1xi32>
    %7 = arith.sitofp %6 : vector<1x24x1xi32> to vector<1x24x1xf32>
    %c0_i32 = arith.constant 0 : i32
    %8 = arith.cmpi sgt, %arg2, %c0_i32 : i32
    %cst = arith.constant 1.000000e+00 : f32
    %cst_0 = arith.constant 0.000000e+00 : f32
    %9 = arith.select %8, %cst, %cst_0 : f32
    %10 = arith.truncf %9 : f32 to bf16
    %c3_i32 = arith.constant 3 : i32
    %11 = arith.cmpi slt, %arg2, %c3_i32 : i32
    %cst_1 = arith.constant 1.000000e+00 : f32
    %cst_2 = arith.constant 0.000000e+00 : f32
    %12 = arith.select %11, %cst_1, %cst_2 : f32
    %13 = arith.truncf %12 : f32 to bf16
    %cst_3 = arith.constant 0.000000e+00 : bf16
    %14 = vector.broadcast %cst_3 : bf16 to vector<8x32xbf16>
    %c0 = arith.constant 0 : index
    %c0_4 = arith.constant 0 : index
    %15 = vector.load %arg12[%c0, %c0_4] : memref<160x32xbf16, #tpu.memory_space<vmem>>, vector<8x32xbf16>
    tpu.vector_store %arg12[%c0, %c0_4], %14 {strides = array<i32>} : memref<160x32xbf16, #tpu.memory_space<vmem>>, vector<8x32xbf16>,
    %c0_5 = arith.constant 0 : index
    %c0_6 = arith.constant 0 : index
    %c0_7 = arith.constant 0 : index
    %c0_8 = arith.constant 0 : index
    %16 = vector.load %arg3[%c0_5, %c0_6, %c0_7, %c0_8] : memref<1x1x24x32xbf16, #tpu.memory_space<vmem>>, vector<1x1x24x32xbf16>
    %17 = vector.shape_cast %16 : vector<1x1x24x32xbf16> to vector<1x24x32xbf16>
    %18 = arith.extf %17 : vector<1x24x32xbf16> to vector<1x24x32xf32>
    %c0_9 = arith.constant 0 : index
    %c0_10 = arith.constant 0 : index
    %19 = vector.load %arg7[%c0_9, %c0_10] : memref<1x32xf32, #tpu.memory_space<vmem>>, vector<1x32xf32>
    %20 = vector.shape_cast %19 : vector<1x32xf32> to vector<1x1x32xf32>
    %21 = vector.broadcast %20 : vector<1x1x32xf32> to vector<1x24x32xf32>
    %22 = arith.mulf %18, %21 : vector<1x24x32xf32>
    %c0_11 = arith.constant 0 : index
    %c0_12 = arith.constant 0 : index
    %23 = vector.load %arg8[%c0_11, %c0_12] : memref<1x32xf32, #tpu.memory_space<vmem>>, vector<1x32xf32>
    %24 = vector.shape_cast %23 : vector<1x32xf32> to vector<1x1x32xf32>
    %25 = vector.broadcast %24 : vector<1x1x32xf32> to vector<1x24x32xf32>
    %26 = arith.addf %22, %25 : vector<1x24x32xf32>
    %cst_13 = arith.constant 0.000000e+00 : f32
    %27 = vector.broadcast %cst_13 : f32 to vector<1x24x32xf32>
    %28 = arith.maximumf %26, %27 : vector<1x24x32xf32>
    %29 = vector.broadcast %7 : vector<1x24x1xf32> to vector<1x24x32xf32>
    %30 = arith.mulf %28, %29 : vector<1x24x32xf32>
    %31 = arith.truncf %30 : vector<1x24x32xf32> to vector<1x24x32xbf16>
    %32 = vector.broadcast %10 : bf16 to vector<1x24x32xbf16>
    %33 = arith.mulf %31, %32 : vector<1x24x32xbf16>
    %34 = vector.shape_cast %33 : vector<1x24x32xbf16> to vector<24x32xbf16>
    %c8 = arith.constant 8 : index
    %c0_14 = arith.constant 0 : index
    %35 = vector.load %arg12[%c8, %c0_14] : memref<160x32xbf16, #tpu.memory_space<vmem>>, vector<24x32xbf16>
    tpu.vector_store %arg12[%c8, %c0_14], %34 {strides = array<i32>} : memref<160x32xbf16, #tpu.memory_space<vmem>>, vector<24x32xbf16>,
    %c0_15 = arith.constant 0 : index
    %c0_16 = arith.constant 0 : index
    %c0_17 = arith.constant 0 : index
    %c0_18 = arith.constant 0 : index
    %36 = vector.load %arg4[%c0_15, %c0_16, %c0_17, %c0_18] : memref<1x4x24x32xbf16, #tpu.memory_space<vmem>>, vector<1x4x24x32xbf16>
    %37 = vector.shape_cast %36 : vector<1x4x24x32xbf16> to vector<4x24x32xbf16>
    %38 = arith.extf %37 : vector<4x24x32xbf16> to vector<4x24x32xf32>
    %c0_19 = arith.constant 0 : index
    %c0_20 = arith.constant 0 : index
    %39 = vector.load %arg7[%c0_19, %c0_20] : memref<1x32xf32, #tpu.memory_space<vmem>>, vector<1x32xf32>
    %40 = vector.shape_cast %39 : vector<1x32xf32> to vector<1x1x32xf32>
    %41 = vector.broadcast %40 : vector<1x1x32xf32> to vector<4x24x32xf32>
    %42 = arith.mulf %38, %41 : vector<4x24x32xf32>
    %c0_21 = arith.constant 0 : index
    %c0_22 = arith.constant 0 : index
    %43 = vector.load %arg8[%c0_21, %c0_22] : memref<1x32xf32, #tpu.memory_space<vmem>>, vector<1x32xf32>
    %44 = vector.shape_cast %43 : vector<1x32xf32> to vector<1x1x32xf32>
    %45 = vector.broadcast %44 : vector<1x1x32xf32> to vector<4x24x32xf32>
    %46 = arith.addf %42, %45 : vector<4x24x32xf32>
    %cst_23 = arith.constant 0.000000e+00 : f32
    %47 = vector.broadcast %cst_23 : f32 to vector<4x24x32xf32>
    %48 = arith.maximumf %46, %47 : vector<4x24x32xf32>
    %49 = vector.broadcast %7 : vector<1x24x1xf32> to vector<4x24x32xf32>
    %50 = arith.mulf %48, %49 : vector<4x24x32xf32>
    %51 = arith.truncf %50 : vector<4x24x32xf32> to vector<4x24x32xbf16>
    %52 = vector.shape_cast %51 : vector<4x24x32xbf16> to vector<96x32xbf16>
    %c32 = arith.constant 32 : index
    %c0_24 = arith.constant 0 : index
    %53 = vector.load %arg12[%c32, %c0_24] : memref<160x32xbf16, #tpu.memory_space<vmem>>, vector<96x32xbf16>
    tpu.vector_store %arg12[%c32, %c0_24], %52 {strides = array<i32>} : memref<160x32xbf16, #tpu.memory_space<vmem>>, vector<96x32xbf16>,
    %c0_25 = arith.constant 0 : index
    %c0_26 = arith.constant 0 : index
    %c0_27 = arith.constant 0 : index
    %c0_28 = arith.constant 0 : index
    %54 = vector.load %arg5[%c0_25, %c0_26, %c0_27, %c0_28] : memref<1x1x24x32xbf16, #tpu.memory_space<vmem>>, vector<1x1x24x32xbf16>
    %55 = vector.shape_cast %54 : vector<1x1x24x32xbf16> to vector<1x24x32xbf16>
    %56 = arith.extf %55 : vector<1x24x32xbf16> to vector<1x24x32xf32>
    %c0_29 = arith.constant 0 : index
    %c0_30 = arith.constant 0 : index
    %57 = vector.load %arg7[%c0_29, %c0_30] : memref<1x32xf32, #tpu.memory_space<vmem>>, vector<1x32xf32>
    %58 = vector.shape_cast %57 : vector<1x32xf32> to vector<1x1x32xf32>
    %59 = vector.broadcast %58 : vector<1x1x32xf32> to vector<1x24x32xf32>
    %60 = arith.mulf %56, %59 : vector<1x24x32xf32>
    %c0_31 = arith.constant 0 : index
    %c0_32 = arith.constant 0 : index
    %61 = vector.load %arg8[%c0_31, %c0_32] : memref<1x32xf32, #tpu.memory_space<vmem>>, vector<1x32xf32>
    %62 = vector.shape_cast %61 : vector<1x32xf32> to vector<1x1x32xf32>
    %63 = vector.broadcast %62 : vector<1x1x32xf32> to vector<1x24x32xf32>
    %64 = arith.addf %60, %63 : vector<1x24x32xf32>
    %cst_33 = arith.constant 0.000000e+00 : f32
    %65 = vector.broadcast %cst_33 : f32 to vector<1x24x32xf32>
    %66 = arith.maximumf %64, %65 : vector<1x24x32xf32>
    %67 = vector.broadcast %7 : vector<1x24x1xf32> to vector<1x24x32xf32>
    %68 = arith.mulf %66, %67 : vector<1x24x32xf32>
    %69 = arith.truncf %68 : vector<1x24x32xf32> to vector<1x24x32xbf16>
    %70 = vector.broadcast %13 : bf16 to vector<1x24x32xbf16>
    %71 = arith.mulf %69, %70 : vector<1x24x32xbf16>
    %72 = vector.shape_cast %71 : vector<1x24x32xbf16> to vector<24x32xbf16>
    %c128 = arith.constant 128 : index
    %c0_34 = arith.constant 0 : index
    %73 = vector.load %arg12[%c128, %c0_34] : memref<160x32xbf16, #tpu.memory_space<vmem>>, vector<24x32xbf16>
    tpu.vector_store %arg12[%c128, %c0_34], %72 {strides = array<i32>} : memref<160x32xbf16, #tpu.memory_space<vmem>>, vector<24x32xbf16>,
    %c152 = arith.constant 152 : index
    %c0_35 = arith.constant 0 : index
    %74 = vector.load %arg12[%c152, %c0_35] : memref<160x32xbf16, #tpu.memory_space<vmem>>, vector<8x32xbf16>
    tpu.vector_store %arg12[%c152, %c0_35], %14 {strides = array<i32>} : memref<160x32xbf16, #tpu.memory_space<vmem>>, vector<8x32xbf16>,
    %c7 = arith.constant 7 : index
    %c0_36 = arith.constant 0 : index
    %75 = vector.load %arg12[%c7, %c0_36] : memref<160x32xbf16, #tpu.memory_space<vmem>>, vector<96x32xbf16>
    %c0_37 = arith.constant 0 : index
    %c0_38 = arith.constant 0 : index
    %c0_39 = arith.constant 0 : index
    %c0_40 = arith.constant 0 : index
    %76 = vector.load %arg6[%c0_37, %c0_38, %c0_39, %c0_40] : memref<3x3x32x32xbf16, #tpu.memory_space<vmem>>, vector<1x1x32x32xbf16>
    %77 = vector.shape_cast %76 : vector<1x1x32x32xbf16> to vector<32x32xbf16>
    %cst_41 = arith.constant dense<0.000000e+00> : vector<96x32xf32>
    %78 = tpu.matmul %75, %77, %cst_41 {dimension_numbers = #tpu.dot_dimension_numbers<[1], [0], [0], [1], [0, 0, 1, 1], [], []>} : vector<96x32xbf16>, vector<32x32xbf16>, vector<96x32xf32> -> vector<96x32xf32>
    %c0_42 = arith.constant 0 : index
    %c0_43 = arith.constant 0 : index
    %79 = vector.load %arg13[%c0_42, %c0_43] : memref<96x32xf32, #tpu.memory_space<vmem>>, vector<96x32xf32>
    tpu.vector_store %arg13[%c0_42, %c0_43], %78 {strides = array<i32>} : memref<96x32xf32, #tpu.memory_space<vmem>>, vector<96x32xf32>,
    %c8_44 = arith.constant 8 : index
    %c0_45 = arith.constant 0 : index
    %80 = vector.load %arg12[%c8_44, %c0_45] : memref<160x32xbf16, #tpu.memory_space<vmem>>, vector<96x32xbf16>
    %c0_46 = arith.constant 0 : index
    %c1 = arith.constant 1 : index
    %c0_47 = arith.constant 0 : index
    %c0_48 = arith.constant 0 : index
    %81 = vector.load %arg6[%c0_46, %c1, %c0_47, %c0_48] : memref<3x3x32x32xbf16, #tpu.memory_space<vmem>>, vector<1x1x32x32xbf16>
    %82 = vector.shape_cast %81 : vector<1x1x32x32xbf16> to vector<32x32xbf16>
    %cst_49 = arith.constant dense<0.000000e+00> : vector<96x32xf32>
    %83 = tpu.matmul %80, %82, %cst_49 {dimension_numbers = #tpu.dot_dimension_numbers<[1], [0], [0], [1], [0, 0, 1, 1], [], []>} : vector<96x32xbf16>, vector<32x32xbf16>, vector<96x32xf32> -> vector<96x32xf32>
    %c0_50 = arith.constant 0 : index
    %c0_51 = arith.constant 0 : index
    %84 = vector.load %arg13[%c0_50, %c0_51] : memref<96x32xf32, #tpu.memory_space<vmem>>, vector<96x32xf32>
    %85 = arith.addf %84, %83 : vector<96x32xf32>
    %c0_52 = arith.constant 0 : index
    %c0_53 = arith.constant 0 : index
    %86 = vector.load %arg13[%c0_52, %c0_53] : memref<96x32xf32, #tpu.memory_space<vmem>>, vector<96x32xf32>
    tpu.vector_store %arg13[%c0_52, %c0_53], %85 {strides = array<i32>} : memref<96x32xf32, #tpu.memory_space<vmem>>, vector<96x32xf32>,
    %c9 = arith.constant 9 : index
    %c0_54 = arith.constant 0 : index
    %87 = vector.load %arg12[%c9, %c0_54] : memref<160x32xbf16, #tpu.memory_space<vmem>>, vector<96x32xbf16>
    %c0_55 = arith.constant 0 : index
    %c2 = arith.constant 2 : index
    %c0_56 = arith.constant 0 : index
    %c0_57 = arith.constant 0 : index
    %88 = vector.load %arg6[%c0_55, %c2, %c0_56, %c0_57] : memref<3x3x32x32xbf16, #tpu.memory_space<vmem>>, vector<1x1x32x32xbf16>
    %89 = vector.shape_cast %88 : vector<1x1x32x32xbf16> to vector<32x32xbf16>
    %cst_58 = arith.constant dense<0.000000e+00> : vector<96x32xf32>
    %90 = tpu.matmul %87, %89, %cst_58 {dimension_numbers = #tpu.dot_dimension_numbers<[1], [0], [0], [1], [0, 0, 1, 1], [], []>} : vector<96x32xbf16>, vector<32x32xbf16>, vector<96x32xf32> -> vector<96x32xf32>
    %c0_59 = arith.constant 0 : index
    %c0_60 = arith.constant 0 : index
    %91 = vector.load %arg13[%c0_59, %c0_60] : memref<96x32xf32, #tpu.memory_space<vmem>>, vector<96x32xf32>
    %92 = arith.addf %91, %90 : vector<96x32xf32>
    %c0_61 = arith.constant 0 : index
    %c0_62 = arith.constant 0 : index
    %93 = vector.load %arg13[%c0_61, %c0_62] : memref<96x32xf32, #tpu.memory_space<vmem>>, vector<96x32xf32>
    tpu.vector_store %arg13[%c0_61, %c0_62], %92 {strides = array<i32>} : memref<96x32xf32, #tpu.memory_space<vmem>>, vector<96x32xf32>,
    %c31 = arith.constant 31 : index
    %c0_63 = arith.constant 0 : index
    %94 = vector.load %arg12[%c31, %c0_63] : memref<160x32xbf16, #tpu.memory_space<vmem>>, vector<96x32xbf16>
    %c1_64 = arith.constant 1 : index
    %c0_65 = arith.constant 0 : index
    %c0_66 = arith.constant 0 : index
    %c0_67 = arith.constant 0 : index
    %95 = vector.load %arg6[%c1_64, %c0_65, %c0_66, %c0_67] : memref<3x3x32x32xbf16, #tpu.memory_space<vmem>>, vector<1x1x32x32xbf16>
    %96 = vector.shape_cast %95 : vector<1x1x32x32xbf16> to vector<32x32xbf16>
    %cst_68 = arith.constant dense<0.000000e+00> : vector<96x32xf32>
    %97 = tpu.matmul %94, %96, %cst_68 {dimension_numbers = #tpu.dot_dimension_numbers<[1], [0], [0], [1], [0, 0, 1, 1], [], []>} : vector<96x32xbf16>, vector<32x32xbf16>, vector<96x32xf32> -> vector<96x32xf32>
    %c0_69 = arith.constant 0 : index
    %c0_70 = arith.constant 0 : index
    %98 = vector.load %arg13[%c0_69, %c0_70] : memref<96x32xf32, #tpu.memory_space<vmem>>, vector<96x32xf32>
    %99 = arith.addf %98, %97 : vector<96x32xf32>
    %c0_71 = arith.constant 0 : index
    %c0_72 = arith.constant 0 : index
    %100 = vector.load %arg13[%c0_71, %c0_72] : memref<96x32xf32, #tpu.memory_space<vmem>>, vector<96x32xf32>
    tpu.vector_store %arg13[%c0_71, %c0_72], %99 {strides = array<i32>} : memref<96x32xf32, #tpu.memory_space<vmem>>, vector<96x32xf32>,
    %c32_73 = arith.constant 32 : index
    %c0_74 = arith.constant 0 : index
    %101 = vector.load %arg12[%c32_73, %c0_74] : memref<160x32xbf16, #tpu.memory_space<vmem>>, vector<96x32xbf16>
    %c1_75 = arith.constant 1 : index
    %c1_76 = arith.constant 1 : index
    %c0_77 = arith.constant 0 : index
    %c0_78 = arith.constant 0 : index
    %102 = vector.load %arg6[%c1_75, %c1_76, %c0_77, %c0_78] : memref<3x3x32x32xbf16, #tpu.memory_space<vmem>>, vector<1x1x32x32xbf16>
    %103 = vector.shape_cast %102 : vector<1x1x32x32xbf16> to vector<32x32xbf16>
    %cst_79 = arith.constant dense<0.000000e+00> : vector<96x32xf32>
    %104 = tpu.matmul %101, %103, %cst_79 {dimension_numbers = #tpu.dot_dimension_numbers<[1], [0], [0], [1], [0, 0, 1, 1], [], []>} : vector<96x32xbf16>, vector<32x32xbf16>, vector<96x32xf32> -> vector<96x32xf32>
    %c0_80 = arith.constant 0 : index
    %c0_81 = arith.constant 0 : index
    %105 = vector.load %arg13[%c0_80, %c0_81] : memref<96x32xf32, #tpu.memory_space<vmem>>, vector<96x32xf32>
    %106 = arith.addf %105, %104 : vector<96x32xf32>
    %c0_82 = arith.constant 0 : index
    %c0_83 = arith.constant 0 : index
    %107 = vector.load %arg13[%c0_82, %c0_83] : memref<96x32xf32, #tpu.memory_space<vmem>>, vector<96x32xf32>
    tpu.vector_store %arg13[%c0_82, %c0_83], %106 {strides = array<i32>} : memref<96x32xf32, #tpu.memory_space<vmem>>, vector<96x32xf32>,
    %c33 = arith.constant 33 : index
    %c0_84 = arith.constant 0 : index
    %108 = vector.load %arg12[%c33, %c0_84] : memref<160x32xbf16, #tpu.memory_space<vmem>>, vector<96x32xbf16>
    %c1_85 = arith.constant 1 : index
    %c2_86 = arith.constant 2 : index
    %c0_87 = arith.constant 0 : index
    %c0_88 = arith.constant 0 : index
    %109 = vector.load %arg6[%c1_85, %c2_86, %c0_87, %c0_88] : memref<3x3x32x32xbf16, #tpu.memory_space<vmem>>, vector<1x1x32x32xbf16>
    %110 = vector.shape_cast %109 : vector<1x1x32x32xbf16> to vector<32x32xbf16>
    %cst_89 = arith.constant dense<0.000000e+00> : vector<96x32xf32>
    %111 = tpu.matmul %108, %110, %cst_89 {dimension_numbers = #tpu.dot_dimension_numbers<[1], [0], [0], [1], [0, 0, 1, 1], [], []>} : vector<96x32xbf16>, vector<32x32xbf16>, vector<96x32xf32> -> vector<96x32xf32>
    %c0_90 = arith.constant 0 : index
    %c0_91 = arith.constant 0 : index
    %112 = vector.load %arg13[%c0_90, %c0_91] : memref<96x32xf32, #tpu.memory_space<vmem>>, vector<96x32xf32>
    %113 = arith.addf %112, %111 : vector<96x32xf32>
    %c0_92 = arith.constant 0 : index
    %c0_93 = arith.constant 0 : index
    %114 = vector.load %arg13[%c0_92, %c0_93] : memref<96x32xf32, #tpu.memory_space<vmem>>, vector<96x32xf32>
    tpu.vector_store %arg13[%c0_92, %c0_93], %113 {strides = array<i32>} : memref<96x32xf32, #tpu.memory_space<vmem>>, vector<96x32xf32>,
    %c55 = arith.constant 55 : index
    %c0_94 = arith.constant 0 : index
    %115 = vector.load %arg12[%c55, %c0_94] : memref<160x32xbf16, #tpu.memory_space<vmem>>, vector<96x32xbf16>
    %c2_95 = arith.constant 2 : index
    %c0_96 = arith.constant 0 : index
    %c0_97 = arith.constant 0 : index
    %c0_98 = arith.constant 0 : index
    %116 = vector.load %arg6[%c2_95, %c0_96, %c0_97, %c0_98] : memref<3x3x32x32xbf16, #tpu.memory_space<vmem>>, vector<1x1x32x32xbf16>
    %117 = vector.shape_cast %116 : vector<1x1x32x32xbf16> to vector<32x32xbf16>
    %cst_99 = arith.constant dense<0.000000e+00> : vector<96x32xf32>
    %118 = tpu.matmul %115, %117, %cst_99 {dimension_numbers = #tpu.dot_dimension_numbers<[1], [0], [0], [1], [0, 0, 1, 1], [], []>} : vector<96x32xbf16>, vector<32x32xbf16>, vector<96x32xf32> -> vector<96x32xf32>
    %c0_100 = arith.constant 0 : index
    %c0_101 = arith.constant 0 : index
    %119 = vector.load %arg13[%c0_100, %c0_101] : memref<96x32xf32, #tpu.memory_space<vmem>>, vector<96x32xf32>
    %120 = arith.addf %119, %118 : vector<96x32xf32>
    %c0_102 = arith.constant 0 : index
    %c0_103 = arith.constant 0 : index
    %121 = vector.load %arg13[%c0_102, %c0_103] : memref<96x32xf32, #tpu.memory_space<vmem>>, vector<96x32xf32>
    tpu.vector_store %arg13[%c0_102, %c0_103], %120 {strides = array<i32>} : memref<96x32xf32, #tpu.memory_space<vmem>>, vector<96x32xf32>,
    %c56 = arith.constant 56 : index
    %c0_104 = arith.constant 0 : index
    %122 = vector.load %arg12[%c56, %c0_104] : memref<160x32xbf16, #tpu.memory_space<vmem>>, vector<96x32xbf16>
    %c2_105 = arith.constant 2 : index
    %c1_106 = arith.constant 1 : index
    %c0_107 = arith.constant 0 : index
    %c0_108 = arith.constant 0 : index
    %123 = vector.load %arg6[%c2_105, %c1_106, %c0_107, %c0_108] : memref<3x3x32x32xbf16, #tpu.memory_space<vmem>>, vector<1x1x32x32xbf16>
    %124 = vector.shape_cast %123 : vector<1x1x32x32xbf16> to vector<32x32xbf16>
    %cst_109 = arith.constant dense<0.000000e+00> : vector<96x32xf32>
    %125 = tpu.matmul %122, %124, %cst_109 {dimension_numbers = #tpu.dot_dimension_numbers<[1], [0], [0], [1], [0, 0, 1, 1], [], []>} : vector<96x32xbf16>, vector<32x32xbf16>, vector<96x32xf32> -> vector<96x32xf32>
    %c0_110 = arith.constant 0 : index
    %c0_111 = arith.constant 0 : index
    %126 = vector.load %arg13[%c0_110, %c0_111] : memref<96x32xf32, #tpu.memory_space<vmem>>, vector<96x32xf32>
    %127 = arith.addf %126, %125 : vector<96x32xf32>
    %c0_112 = arith.constant 0 : index
    %c0_113 = arith.constant 0 : index
    %128 = vector.load %arg13[%c0_112, %c0_113] : memref<96x32xf32, #tpu.memory_space<vmem>>, vector<96x32xf32>
    tpu.vector_store %arg13[%c0_112, %c0_113], %127 {strides = array<i32>} : memref<96x32xf32, #tpu.memory_space<vmem>>, vector<96x32xf32>,
    %c57 = arith.constant 57 : index
    %c0_114 = arith.constant 0 : index
    %129 = vector.load %arg12[%c57, %c0_114] : memref<160x32xbf16, #tpu.memory_space<vmem>>, vector<96x32xbf16>
    %c2_115 = arith.constant 2 : index
    %c2_116 = arith.constant 2 : index
    %c0_117 = arith.constant 0 : index
    %c0_118 = arith.constant 0 : index
    %130 = vector.load %arg6[%c2_115, %c2_116, %c0_117, %c0_118] : memref<3x3x32x32xbf16, #tpu.memory_space<vmem>>, vector<1x1x32x32xbf16>
    %131 = vector.shape_cast %130 : vector<1x1x32x32xbf16> to vector<32x32xbf16>
    %cst_119 = arith.constant dense<0.000000e+00> : vector<96x32xf32>
    %132 = tpu.matmul %129, %131, %cst_119 {dimension_numbers = #tpu.dot_dimension_numbers<[1], [0], [0], [1], [0, 0, 1, 1], [], []>} : vector<96x32xbf16>, vector<32x32xbf16>, vector<96x32xf32> -> vector<96x32xf32>
    %c0_120 = arith.constant 0 : index
    %c0_121 = arith.constant 0 : index
    %133 = vector.load %arg13[%c0_120, %c0_121] : memref<96x32xf32, #tpu.memory_space<vmem>>, vector<96x32xf32>
    %134 = arith.addf %133, %132 : vector<96x32xf32>
    %c0_122 = arith.constant 0 : index
    %c0_123 = arith.constant 0 : index
    %135 = vector.load %arg13[%c0_122, %c0_123] : memref<96x32xf32, #tpu.memory_space<vmem>>, vector<96x32xf32>
    tpu.vector_store %arg13[%c0_122, %c0_123], %134 {strides = array<i32>} : memref<96x32xf32, #tpu.memory_space<vmem>>, vector<96x32xf32>,
    %c0_124 = arith.constant 0 : index
    %c0_125 = arith.constant 0 : index
    %136 = vector.load %arg13[%c0_124, %c0_125] : memref<96x32xf32, #tpu.memory_space<vmem>>, vector<96x32xf32>
    %137 = vector.shape_cast %136 : vector<96x32xf32> to vector<1x4x24x32xf32>
    %138 = arith.truncf %137 : vector<1x4x24x32xf32> to vector<1x4x24x32xbf16>
    %c0_126 = arith.constant 0 : index
    %c0_127 = arith.constant 0 : index
    %c0_128 = arith.constant 0 : index
    %c0_129 = arith.constant 0 : index
    %139 = vector.load %arg9[%c0_126, %c0_127, %c0_128, %c0_129] : memref<1x4x24x32xbf16, #tpu.memory_space<vmem>>, vector<1x4x24x32xbf16>
    tpu.vector_store %arg9[%c0_126, %c0_127, %c0_128, %c0_129], %138 {strides = array<i32>} : memref<1x4x24x32xbf16, #tpu.memory_space<vmem>>, vector<1x4x24x32xbf16>,
    %140 = tpu.iota {dimensions = array<i32: 0>} : vector<96x1xi32>
    %c24_i32 = arith.constant 24 : i32
    %c0_i32_130 = arith.constant 0 : i32
    %141 = arith.cmpi eq, %c24_i32, %c0_i32_130 : i32
    %c1_i32_131 = arith.constant 1 : i32
    %142 = arith.select %141, %c1_i32_131, %c24_i32 : i32
    %143 = vector.broadcast %142 : i32 to vector<96x1xi32>
    %144 = arith.remsi %140, %143 : vector<96x1xi32>
    %c0_i32_132 = arith.constant 0 : i32
    %145 = vector.broadcast %c0_i32_132 : i32 to vector<96x1xi32>
    %146 = arith.cmpi ne, %144, %145 : vector<96x1xi32>
    %c0_i32_133 = arith.constant 0 : i32
    %147 = vector.broadcast %c0_i32_133 : i32 to vector<96x1xi32>
    %148 = arith.cmpi slt, %144, %147 : vector<96x1xi32>
    %c0_i32_134 = arith.constant 0 : i32
    %149 = arith.cmpi slt, %142, %c0_i32_134 : i32
    %150 = vector.broadcast %149 : i1 to vector<96x1xi1>
    %151 = vector.broadcast %150 : vector<96x1xi1> to vector<96x1xi1>
    %152 = arith.xori %148, %151 : vector<96x1xi1>
    %153 = arith.andi %152, %146 : vector<96x1xi1>
    %154 = vector.broadcast %142 : i32 to vector<96x1xi32>
    %155 = arith.addi %144, %154 : vector<96x1xi32>
    %156 = arith.select %153, %155, %144 : vector<96x1xi1>, vector<96x1xi32>
    %c1_i32_135 = arith.constant 1 : i32
    %157 = vector.broadcast %c1_i32_135 : i32 to vector<96x1xi32>
    %158 = arith.cmpi sge, %156, %157 : vector<96x1xi32>
    %c16_i32_136 = arith.constant 16 : i32
    %159 = vector.broadcast %c16_i32_136 : i32 to vector<96x1xi32>
    %160 = arith.cmpi sle, %156, %159 : vector<96x1xi32>
    %161 = arith.andi %158, %160 : vector<96x1xi1>
    %162 = arith.extui %161 : vector<96x1xi1> to vector<96x1xi32>
    %163 = arith.sitofp %162 : vector<96x1xi32> to vector<96x1xf32>
    %164 = vector.broadcast %163 : vector<96x1xf32> to vector<96x32xf32>
    %165 = arith.mulf %136, %164 : vector<96x32xf32>
    %cst_137 = arith.constant dense<0.000000e+00> : vector<32xf32>
    %166 = vector.multi_reduction <add>, %165, %cst_137 [0] : vector<96x32xf32> to vector<32xf32>
    %167 = vector.shape_cast %166 : vector<32xf32> to vector<1x32xf32>
    %168 = vector.shape_cast %167 : vector<1x32xf32> to vector<1x1x1x32xf32>
    %c0_138 = arith.constant 0 : index
    %c0_139 = arith.constant 0 : index
    %c0_140 = arith.constant 0 : index
    %c0_141 = arith.constant 0 : index
    %169 = vector.load %arg10[%c0_138, %c0_139, %c0_140, %c0_141] : memref<1x1x1x32xf32, #tpu.memory_space<vmem>>, vector<1x1x1x32xf32>
    tpu.vector_store %arg10[%c0_138, %c0_139, %c0_140, %c0_141], %168 {strides = array<i32>} : memref<1x1x1x32xf32, #tpu.memory_space<vmem>>, vector<1x1x1x32xf32>,
    %170 = arith.mulf %165, %136 : vector<96x32xf32>
    %cst_142 = arith.constant dense<0.000000e+00> : vector<32xf32>
    %171 = vector.multi_reduction <add>, %170, %cst_142 [0] : vector<96x32xf32> to vector<32xf32>
    %172 = vector.shape_cast %171 : vector<32xf32> to vector<1x32xf32>
    %173 = vector.shape_cast %172 : vector<1x32xf32> to vector<1x1x1x32xf32>
    %c0_143 = arith.constant 0 : index
    %c0_144 = arith.constant 0 : index
    %c0_145 = arith.constant 0 : index
    %c0_146 = arith.constant 0 : index
    %174 = vector.load %arg11[%c0_143, %c0_144, %c0_145, %c0_146] : memref<1x1x1x32xf32, #tpu.memory_space<vmem>>, vector<1x1x1x32xf32>
    tpu.vector_store %arg11[%c0_143, %c0_144, %c0_145, %c0_146], %173 {strides = array<i32>} : memref<1x1x1x32xf32, #tpu.memory_space<vmem>>, vector<1x1x1x32xf32>,
    return
  }
  func.func @transform_0(%arg0: i32, %arg1: i32, %arg2: i32) -> (i32, i32, i32, i32) {
    %c4_i32 = arith.constant 4 : i32
    %0 = arith.muli %arg2, %c4_i32 : i32
    %c1_i32 = arith.constant 1 : i32
    %1 = arith.subi %0, %c1_i32 : i32
    %c0_i32 = arith.constant 0 : i32
    %2 = arith.maxsi %1, %c0_i32 : i32
    %c0_i32_0 = arith.constant 0 : i32
    %c0_i32_1 = arith.constant 0 : i32
    %c0_i32_2 = arith.constant 0 : i32
    return %arg1, %2, %c0_i32_0, %c0_i32_1 : i32, i32, i32, i32
  }
  func.func @transform_1(%arg0: i32, %arg1: i32, %arg2: i32) -> (i32, i32, i32, i32) {
    %c0_i32 = arith.constant 0 : i32
    %c0_i32_0 = arith.constant 0 : i32
    %c0_i32_1 = arith.constant 0 : i32
    return %arg1, %arg2, %c0_i32, %c0_i32_0 : i32, i32, i32, i32
  }
  func.func @transform_2(%arg0: i32, %arg1: i32, %arg2: i32) -> (i32, i32, i32, i32) {
    %c4_i32 = arith.constant 4 : i32
    %0 = arith.muli %arg2, %c4_i32 : i32
    %c4_i32_0 = arith.constant 4 : i32
    %1 = arith.addi %0, %c4_i32_0 : i32
    %c15_i32 = arith.constant 15 : i32
    %2 = arith.minsi %1, %c15_i32 : i32
    %c0_i32 = arith.constant 0 : i32
    %c0_i32_1 = arith.constant 0 : i32
    %c0_i32_2 = arith.constant 0 : i32
    return %arg1, %2, %c0_i32, %c0_i32_1 : i32, i32, i32, i32
  }
  func.func @transform_3(%arg0: i32, %arg1: i32, %arg2: i32) -> (i32, i32, i32, i32) {
    %c0_i32 = arith.constant 0 : i32
    %c0_i32_0 = arith.constant 0 : i32
    %c0_i32_1 = arith.constant 0 : i32
    %c0_i32_2 = arith.constant 0 : i32
    return %c0_i32, %c0_i32_0, %c0_i32_1, %arg0 : i32, i32, i32, i32
  }
  func.func @transform_4(%arg0: i32, %arg1: i32, %arg2: i32) -> (i32, i32) {
    %c0_i32 = arith.constant 0 : i32
    %c0_i32_0 = arith.constant 0 : i32
    %c0_i32_1 = arith.constant 0 : i32
    return %c0_i32, %c0_i32_0 : i32, i32
  }
  func.func @transform_5(%arg0: i32, %arg1: i32, %arg2: i32) -> (i32, i32) {
    %c0_i32 = arith.constant 0 : i32
    %c0_i32_0 = arith.constant 0 : i32
    %c0_i32_1 = arith.constant 0 : i32
    return %c0_i32, %c0_i32_0 : i32, i32
  }
  func.func @transform_6(%arg0: i32, %arg1: i32, %arg2: i32) -> (i32, i32, i32, i32) {
    %c0_i32 = arith.constant 0 : i32
    %c0_i32_0 = arith.constant 0 : i32
    return %arg1, %arg2, %c0_i32, %arg0 : i32, i32, i32, i32
  }
  func.func @transform_7(%arg0: i32, %arg1: i32, %arg2: i32) -> (i32, i32, i32, i32) {
    %c0_i32 = arith.constant 0 : i32
    %c0_i32_0 = arith.constant 0 : i32
    return %arg1, %arg2, %c0_i32, %arg0 : i32, i32, i32, i32
  }
  func.func @transform_8(%arg0: i32, %arg1: i32, %arg2: i32) -> (i32, i32, i32, i32) {
    %c0_i32 = arith.constant 0 : i32
    %c0_i32_0 = arith.constant 0 : i32
    return %arg1, %arg2, %c0_i32, %arg0 : i32, i32, i32, i32
  }
}

</mosaic_0001>

<bundles_post_ra>
// kernel: double_conv.5
= control target key start
LH: loop header
LB: loop body
LE: loop exit
PB: predicated region body
PF: predicated region fallthrough
CT: control target
= control target key end

     0   :  { %8 = vsyncpa [#allocation3], 0  ;;  %s918_s0 = inlined_call_operand.vmem [shape: bf16[2,16,24,32], index: 0, kind: input, shape index: {}]   ;;  %s919_s1 = inlined_call_operand.vmem [shape: f32[1,32], index: 1, kind: input, shape index: {}]   ;;  %s920_s2 = inlined_call_operand.vmem [shape: f32[1,32], index: 2, kind: input, shape index: {}]   ;;  %s921_s3 = inlined_call_operand.hbm [shape: f32[2,16,16,32], index: 3, kind: output, shape index: {}]  }
   0x1   :  { %10 = vsyncpa [#allocation3 + $0x1], 0  ;;  %s717_s12 = smov 0   ;;  %s719_s13 = smov 0  }
   0x2   :  { %s721_s14 = smov 0   ;;  %s723_s15 = smov 0  }
   0x3   :  { %s725_s16 = smov 0   ;;  %s727_s17 = smov 0  }
   0x4   :  { %s729_s18 = smov 0   ;;  %s731_s19 = smov 0  }
   0x5 LB: > { %s474_s20 = sadd.s32 4294967295, %s692_s19   ;;  %s475_s21 = sadd.s32 4294967294, %s692_s19   ;;  %s692_s19 = sphi %s731_s19, %s16_s19   ;;  %s688_s18 = sphi %s729_s18, %s930_s18   ;;  %s684_s17 = sphi %s727_s17, %s929_s17   ;;  %s680_s16 = sphi %s725_s16, %s928_s16   ;;  %s676_s15 = sphi %s723_s15, %s927_s15   ;;  %s672_s14 = sphi %s721_s14, %s926_s14   ;;  %s668_s13 = sphi %s719_s13, %s925_s13   ;;  %s664_s12 = sphi %s717_s12, %s924_s12  }
   0x6   : > { %s28_s22 = sadd.s32 1, %s684_s17  ;;  %s31_s23 = sadd.s32 1, %s688_s18 }
   0x7   : > { %p29_p0 = scmp.ge.s32.totalorder %s28_s22, 4  ;;  %p138_p1 = scmp.ne.s32.totalorder %s672_s14, %s668_s13 }
   0x8   : > { %p139_p2 = scmp.eq.s32.totalorder %s474_s20, 7  ;;  %p144_p5 = scmp.ne.s32.totalorder %s668_s13, %s664_s12 }
   0x9   : > { %s932_s22 = smov (%p29_p0, %s28_s22), 0  ;;  %s934_s23 = smov (!%p29_p0, %s31_s23), %s688_s18 }
   0xa   : > { %s122_s24 = ssub.s32 %s684_s17, %s932_s22  ;;  %p768_p3 = por %p139_p2, %p138_p1 }
   0xb   : > { %p33_p4 = scmp.ge.s32.totalorder %s934_s23, 2  ;;  %p145_p6 = scmp.eq.s32.totalorder %s475_s21, 7 }
   0xc   : > { %p480_p7 = scmp.ge.s32.totalorder %s692_s19, 1  ;;  %p192_p9 = scmp.lt.s32.totalorder %s692_s19, 9 }
   0xd   : > { %s936_s23 = smov (%p33_p4, %s934_s23), 0  ;;  %p777_p8 = por %p145_p6, %p144_p5 }
   0xe   : > { %s121_s27 = ssub.s32 %s688_s18, %s936_s23  ;;  %s128_s28 = sadd.s32 1, %s672_s14 }
   0xf   : > { %s123_s29 = sor.u32 %s122_s24, %s121_s27  ;;  %p193_p10 = pnand %p480_p7, %p192_p9 }
  0x10   : > { %p126_p11 = scmp.eq.s32.totalorder %s123_s29, 0  ;;  %s482_s4 = sshll.u32 (!%p193_p10), %s676_s15, 2  ;;  %v800_v0 = vld [vmem:[%s919_s1] ss:$0 sm:$0xff] (!%p193_p10)  ;;  %vm325_vm0 = vcmask (!%p193_p10), 261121   ;;  %vm327_vm1 = vcmask (!%p193_p10), 261120  }
  0x11   : > { %196 = sbr.rel (%p193_p10) target bundleno = 67 (0x43), region = 32  ;;  %p231_p12 = scmp.lt.s32.totalorder (!%p193_p10), %s680_s16, 1  ;;  %vm329_vm2 = vcmask (!%p193_p10), 253952   ;;  %v485_v9 = vld [vmem:[%s920_s2] ss:$0 sm:$0xff] (!%p193_p10) }
  0x12   : > { %s786_s30 = scalar_select %p126_p11, %s672_s14, %s128_s28  }
  0x13   : > { %p233_p13 = scmp.lt.s32.totalorder (!%p193_p10), %s482_s4, 15  ;;  %s227_s10 = sand.u32 (!%p193_p10), 1, %s668_s13  }
  0x14   : > { %s694_s27 = smov (!%p193_p10), [#allocation2]  }
  0x15   : > { %s602_s28 = sshll.u32 (!%p193_p10), %s694_s27, 4  ;;  %s603_s28 = int_to_ptr.vmem [resolvable:$false] %s602_s28 }
  0x16   : > { %s604_s29 = scalar_lea.vmem (!%p193_p10), %s603_s28, 2048 }
  0x18   : > { %s232_s5 = scalar_select %p231_p12, %s680_s16, 1 }
  0x19   : > { %s938_s4 = smov (!%p233_p13, %s482_s4), 15 }
  0x1a   : > { %s524_s6 = smul.u32 48, %s232_s5  ;;  %s493_s5 = sshll.u32 %s676_s15, 3 }
  0x1b   : > { %s523_s7 = smul.u32 3, %s938_s4  ;;  %s811_s4 = sshll.u32 %s227_s10, 6 }
  0x1d   : > { %s240_s8 = sadd.s32 %s524_s6, %s523_s7  ;;  %s489_s6 = sshll.u32 %s680_s16, 5 }
  0x1e   : > { %s483_s9 = sshll.u32 %s240_s8, 2  ;;  %s355_s7 = sadd.s32 %s493_s5, %s489_s6 }
  0x1f   : > { %s795_s21 = scalar_lea.vmem %s918_s0, %s483_s9  ;;  %s826_s8 = scalar_lea.vmem [#allocation2], %s811_s4 }
  0x20   : > { %v495_v1 = vld [vmem:[%s795_s21] sm:$0xff]   ;;  %v518_v2 = vld [vmem:[%s795_s21 + $0x8] sm:$0xff]   ;;  %v519_v3 = vld [vmem:[%s795_s21 + $0x10] sm:$0xff]   ;;  %s490_s15 = sshll.u32 %s355_s7, 7  ;;  %s358_s16 = sshll.u32 %s826_s8, 4  ;;  %s854_s16 = int_to_ptr.vmem [resolvable:$true] %s358_s16 }
  0x21   : > { %v496_v4 = vunpack.c.l.bf16 %v495_v1  ;;  %v497_v5 = vunpack.c.h.bf16 %v495_v1  ;;  %v500_v6 = vunpack.c.l.bf16 %v518_v2  ;;  %v501_v7 = vunpack.c.h.bf16 %v518_v2  ;;  %v520_v8 = vld [vmem:[%s795_s21 + $0x18] sm:$0xff]   ;;  %v521_v30 = vld [vmem:[%s795_s21 + $0x20] sm:$0xff]   ;;  %v522_v31 = vld [vmem:[%s795_s21 + $0x28] sm:$0xff]   ;;  %s852_s20 = scalar_lea.hbm %s921_s3, %s490_s15  ;;  %s866_s21 = scalar_lea.sflag [#allocation3], %s227_s10 }
  0x22   : > { %v504_v10 = vunpack.c.l.bf16 %v519_v3  ;;  %v505_v11 = vunpack.c.h.bf16 %v519_v3  ;;  %v508_v12 = vunpack.c.l.bf16 %v520_v8  ;;  %v509_v13 = vunpack.c.h.bf16 %v520_v8  ;;  %s598_s24 = scalar_lea.vmem %s854_s16, 1024  ;;  %p605_p4 = scmp.lt.s32.totalorder %s854_s16, %s603_s28 }
  0x23   : > { %v282_v14 = vmul.f32 %v496_v4, %v800_v0  ;;  %v283_v15 = vmul.f32 %v497_v5, %v800_v0  ;;  %v284_v16 = vmul.f32 %v500_v6, %v800_v0  ;;  %v285_v17 = vmul.f32 %v501_v7, %v800_v0  ;;  %p599_p0 = scmp.ne.s32.totalorder %s854_s16, %s598_s24  ;;  %p606_p5 = scmp.lt.s32.totalorder %s604_s29, %s598_s24 }
  0x24   : > { %v286_v18 = vmul.f32 %v504_v10, %v800_v0  ;;  %v287_v19 = vmul.f32 %v505_v11, %v800_v0  ;;  %v288_v20 = vmul.f32 %v508_v12, %v800_v0  ;;  %v289_v21 = vmul.f32 %v509_v13, %v800_v0 }
  0x25   : > { %v301_v22 = vadd.f32 %v485_v9, %v282_v14  ;;  %v302_v23 = vadd.f32 %v485_v9, %v283_v15  ;;  %v303_v24 = vadd.f32 %v485_v9, %v284_v16  ;;  %v304_v25 = vadd.f32 %v485_v9, %v285_v17  ;;  %p600_p1 = pnand %p599_p0, %p768_p3  ;;  %p607_p6 = por %p606_p5, %p605_p4 }
  0x26   : > { %v305_v26 = vadd.f32 %v485_v9, %v286_v18  ;;  %v306_v27 = vadd.f32 %v485_v9, %v287_v19  ;;  %v307_v28 = vadd.f32 %v485_v9, %v288_v20  ;;  %v308_v29 = vadd.f32 %v485_v9, %v289_v21 }
  0x27   : > { %v313_v32 = vmax.f32 %v301_v22, 0.0  ;;  %v314_v33 = vmax.f32 %v302_v23, 0.0  ;;  %v315_v34 = vmax.f32 %v303_v24, 0.0  ;;  %v316_v35 = vmax.f32 %v304_v25, 0.0  ;;  %p601_p2 = pneg %p600_p1 }
  0x28   : > { %v317_v36 = vmax.f32 %v305_v26, 0.0  ;;  %v318_v37 = vmax.f32 %v306_v27, 0.0  ;;  %v319_v38 = vmax.f32 %v307_v28, 0.0  ;;  %v320_v39 = vmax.f32 %v308_v29, 0.0 }
  0x29   : > { %326 = vst.msk [vmem:[%s826_s8 - $0x1] sm:$0xfe] %vm325_vm0, %v313_v32  ;;  %331 = vst.msk [vmem:[%s826_s8 + $0xf] sm:$0xfe] %vm325_vm0, %v316_v35  ;;  %v512_v40 = vunpack.c.l.bf16 %v521_v30  ;;  %v513_v41 = vunpack.c.h.bf16 %v521_v30  ;;  %v516_v42 = vunpack.c.l.bf16 %v522_v31  ;;  %v517_v43 = vunpack.c.h.bf16 %v522_v31  ;;  %p608_p7 = pnand %p607_p6, %p601_p2 }
  0x2a   : > { %328 = vst.msk [vmem:[%s826_s8 + $0x7] sm:$0xff] %vm327_vm1, %v314_v33  ;;  %332 = vst.msk [vmem:[%s826_s8 + $0x17] sm:$0xff] %vm327_vm1, %v317_v36 }
  0x2b   : > { %330 = vst.msk [vmem:[%s826_s8 + $0xf] sm:$0x1] %vm329_vm2, %v315_v34  ;;  %333 = vst.msk [vmem:[%s826_s8 + $0x1f] sm:$0x1] %vm329_vm2, %v318_v37  ;;  %v290_v44 = vmul.f32 %v512_v40, %v800_v0  ;;  %v291_v45 = vmul.f32 %v513_v41, %v800_v0  ;;  %v292_v46 = vmul.f32 %v516_v42, %v800_v0 }
  0x2c   : > { %334 = vst.msk [vmem:[%s826_s8 + $0x1f] sm:$0xfe] %vm325_vm0, %v319_v38  ;;  %v293_v47 = vmul.f32 %v517_v43, %v800_v0 }
  0x2d   : > { %335 = vst.msk [vmem:[%s826_s8 + $0x27] sm:$0xff] %vm327_vm1, %v320_v39  ;;  %v309_v48 = vadd.f32 %v485_v9, %v290_v44  ;;  %v310_v49 = vadd.f32 %v485_v9, %v291_v45  ;;  %v311_v50 = vadd.f32 %v485_v9, %v292_v46 }
  0x2e   : > { %v312_v51 = vadd.f32 %v485_v9, %v293_v47 }
  0x2f   : > { %v321_v52 = vmax.f32 %v309_v48, 0.0  ;;  %v322_v53 = vmax.f32 %v310_v49, 0.0  ;;  %v323_v54 = vmax.f32 %v311_v50, 0.0 }
  0x30   : > { %v324_v55 = vmax.f32 %v312_v51, 0.0 }
  0x31   : > { %336 = vst.msk [vmem:[%s826_s8 + $0x2f] sm:$0x1] %vm329_vm2, %v321_v52 }
  0x32   : > { %337 = vst.msk [vmem:[%s826_s8 + $0x2f] sm:$0xfe] %vm325_vm0, %v322_v53 }
  0x33   : > { %338 = vst.msk [vmem:[%s826_s8 + $0x37] sm:$0xff] %vm327_vm1, %v323_v54 }
  0x34   : > { %339 = vst.msk [vmem:[%s826_s8 + $0x3f] sm:$0x1] %vm329_vm2, %v324_v55 }
  0x35   : > { %611 = shalt.err (!%p608_p7)
}
  0x36   : > { %s612_s10 = scalar_lea.hbm %s852_s20, 1024  ;;  %s616_s6 = scalar_lea.hbm %s921_s3, 8192 }
  0x37   : > { %p613_p9 = scmp.ne.s32.totalorder %s852_s20, %s612_s10  ;;  %p617_p12 = scmp.lt.u32.totalorder %s852_s20, %s921_s3 }
  0x38   : > { %p618_p13 = scmp.lt.u32.totalorder %s616_s6, %s612_s10  ;;  %p620_p1 = scmp.lt.u32.totalorder %s612_s10, %s852_s20 }
  0x39   : > { %p614_p10 = pnand %p613_p9, %p768_p3 }
  0x3a   : > { %p619_p0 = por %p618_p13, %p617_p12 }
  0x3b   : > { %p615_p11 = pneg %p614_p10 }
  0x3c   : > { %p621_p2 = por %p620_p1, %p619_p0 }
  0x3e   : > { %p622_p4 = pnand %p621_p2, %p615_p11 }
  0x40   : > { %625 = shalt.err (!%p622_p4)
}
  0x41   : > { %s695_s15 = smov 128   ;;  %s696_s9 = smov 8  }
  0x42   : > { %525 = dma.vmem_to_hbm [thread:$0]  (%p768_p3), %s854_s16, 1024, %s852_s20, %s866_s21, %s695_s15, %s695_s15, %s696_s9  }
  0x43 PF: > { %p531_p5 = scmp.ge.s32.totalorder %s692_s19, 2  ;;  %s373_s11 = sand.u32 1, %s664_s12  }
  0x44   : > { %s374_s24 = scalar_lea.sflag [#allocation3], %s373_s11 }
  0x45   : > { %p528_p6 = pnand %p531_p5, %p777_p8 }
  0x47   : > { %659 = dma.done.wait (!%p528_p6), %s374_s24, 1024  }
  0x48   : > { %661 = vsyncadd (!%p528_p6), %s374_s24, 4294966272  ;;  %s16_s19 = sadd.s32 1, %s692_s19   ;;  %s924_s12 = smov %s668_s13 }
  0x49   : > { %p13_p7 = scmp.ge.s32.totalorder %s16_s19, 10   ;;  %s925_s13 = smov %s672_s14 }
  0x4a   : > { %s926_s14 = smov %s786_s30  ;;  %s927_s15 = smov %s684_s17 }
  0x4b   : > { %s928_s16 = smov %s688_s18  ;;  %s929_s17 = smov %s932_s22 }
  0x4c   : > { %s930_s18 = smov %s936_s23  ;;  %15 = sbr.rel (!%p13_p7) target bundleno = 5 (0x5), region = 73 }
  0x53   :  { %379 = vsyncpa [#allocation3], 1 }
  0x54   :  { %381 = vsyncpa [#allocation3 + $0x1], 1 }

// kernel: double_conv.3
= control target key start
LH: loop header
LB: loop body
LE: loop exit
PB: predicated region body
PF: predicated region fallthrough
CT: control target
= control target key end

     0   :  { %s3588_s27 = smov 0   ;;  %s3590_s28 = smov 0   ;;  %s4734_s0 = inlined_call_operand.vmem [shape: bf16[2,16,24,4], index: 0, kind: input, shape index: {}, may-alias: {0,1,2}]   ;;  %s4735_s1 = inlined_call_operand.vmem [shape: bf16[2,16,24,4], index: 1, kind: input, shape index: {}, may-alias: {0,1,2}]   ;;  %s4736_s2 = inlined_call_operand.vmem [shape: bf16[2,16,24,4], index: 2, kind: input, shape index: {}, may-alias: {0,1,2}]   ;;  %s4737_s3 = inlined_call_operand.vmem [shape: bf16[3,3,4,32], index: 3, kind: input, shape index: {}]   ;;  %s4738_s4 = inlined_call_operand.vmem [shape: f32[1,4], index: 4, kind: input, shape index: {}, may-alias: {4,5}]   ;;  %s4739_s5 = inlined_call_operand.vmem [shape: f32[1,4], index: 5, kind: input, shape index: {}, may-alias: {4,5}]   ;;  %s4740_s6 = inlined_call_operand.vmem [shape: bf16[2,16,24,32], index: 6, kind: output, shape index: {0}]   ;;  %s4741_s7 = inlined_call_operand.vmem [shape: f32[2,4,1,32], index: 7, kind: output, shape index: {1}]   ;;  %s4742_s8 = inlined_call_operand.vmem [shape: f32[2,4,1,32], index: 8, kind: output, shape index: {2}]  }
   0x1   :  { %s3592_s29 = smov 0   ;;  %s3594_s30 = smov 0  }
   0x2   :  { %s3596_s4 = smov 0  }
   0x3 LB: > { %s31_s5 = sadd.s32 1, %s3531_s29  ;;  %s34_s9 = sadd.s32 1, %s3535_s30  ;;  %s3539_s4 = sphi %s3596_s4, %s19_s4   ;;  %s3535_s30 = sphi %s3594_s30, %s4789_s30   ;;  %s3531_s29 = sphi %s3592_s29, %s4788_s29   ;;  %s3527_s28 = sphi %s3590_s28, %s4787_s28   ;;  %s3523_s27 = sphi %s3588_s27, %s4786_s27  }
   0x4   : > { %p32_p0 = scmp.ge.s32.totalorder %s31_s5, 4  ;;  %p3092_p1 = scmp.ge.s32.totalorder %s3539_s4, 1 }
   0x5   : > { %p379_p2 = scmp.lt.s32.totalorder %s3539_s4, 9 }
   0x6   : > { %s4791_s5 = smov (%p32_p0, %s31_s5), 0  ;;  %s4793_s9 = smov (!%p32_p0, %s34_s9), %s3535_s30 }
   0x7   : > { %p380_p3 = pnand %p3092_p1, %p379_p2  ;;  %p36_p4 = scmp.ge.s32.totalorder %s4793_s9, 2 }
   0x8   : > { %v694_v0 = vld [vmem:[%s4737_s3] sm:$0x3] (!%p380_p3)  ;;  %vm776_vm0 = vcmask (!%p380_p3), 1041408   ;;  %s3624_s12 = sshll.u32 (!%p380_p3), %s3523_s27, 2  ;;  %p480_p5 = scmp.lt.s32.totalorder (!%p380_p3), %s3527_s28, 1  ;;  %vm584_vm1 = vcmask (!%p380_p3), 27648  }
   0x9   : > { %s4795_s9 = smov (%p36_p4, %s4793_s9), 0  ;;  %383 = sbr.rel (%p380_p3) target bundleno = 407 (0x197), region = 44 }
   0xa   : > { %3416 = vmatprep.subr.msk.bf16.mxu1 (!%p380_p3), %vm776_vm0, %v694_v0  ;;  %v778_v1 = vsel (!%p380_p3), %vm776_vm0, %v694_v0, 0  ;;  %p496_p6 = scmp.lt.s32.totalorder (!%p380_p3), %s3624_s12, 15  ;;  %v3632_v2 = vld [vmem:[%s4737_s3 + $0x2] sm:$0x3] (!%p380_p3)  ;;  %3415 = vmatprep.subr.msk.bf16.mxu0 (!%p380_p3), %vm776_vm0, %v694_v0  ;;  %vm606_vm2 = vcmask (!%p380_p3), 31748   ;;  %v3541_v3 = vmov (!%p380_p3), 0  }
   0xb   : > { %3414 = vmatpush3.bf16.msra.mxu1 (!%p380_p3), %v778_v1  ;;  %3288 = vmatpush3.bf16.msra.mxu0 (!%p380_p3), %v778_v1  ;;  %585 = vst.msk [vmem:[#allocation2] sm:$0xf] (!%p380_p3), %vm584_vm1, %v3541_v3  ;;  %v3645_v4 = vld [vmem:[%s4737_s3 + $0x4] sm:$0x3] (!%p380_p3)  ;;  %s3094_s19 = sadd.s32 (!%p380_p3), 4294967295, %s3624_s12  ;;  %s505_s21 = sadd.s32 (!%p380_p3), 4, %s3624_s12 }
   0xc   : > { %3417 = vmatprep.subr.msk.bf16.mxu1 (!%p380_p3), %vm776_vm0, %v3632_v2  ;;  %686 = vst.msk [vmem:[#allocation2 + $0x48] sm:$0xf0] (!%p380_p3), %vm606_vm2, %v3541_v3  ;;  %3418 = vmatprep.subr.msk.bf16.mxu0 (!%p380_p3), %vm776_vm0, %v3645_v4  ;;  %p478_p7 = scmp.gt.s32.totalorder (!%p380_p3), %s3094_s19, 0  ;;  %p3658_p8 = scmp.lt.s32.totalorder (!%p380_p3), %s505_s21, 15  ;;  %vm608_vm3 = vcmask (!%p380_p3), 31744   ;;  %v923_v32 = vsel (!%p380_p3), %vm776_vm0, %v3632_v2, 0 }
   0xd   : > { %p3095_p9 = scmp.lt.s32.totalorder (!%p380_p3), %s3094_s19, 15  ;;  %p560_p10 = scmp.gt.s32.totalorder (!%p380_p3), %s3523_s27, 0  ;;  %vm695_vm4 = vsmask.f32 (!%p380_p3), 4352  ;;  %v3142_v40 = vld [vmem:[%s4737_s3 + $0x6] sm:$0x3] (!%p380_p3) }
   0xe   : > { %p541_p11 = scmp.lt.s32.totalorder (!%p380_p3), %s3523_s27, 3  ;;  %vm890_vm5 = vcmask (!%p380_p3), 1043456   ;;  %v3795_v60 = vsel (!%p380_p3), %vm776_vm0, %v3142_v40, 0  ;;  %v3799_v61 = vsel (!%p380_p3), %vm776_vm0, %v3645_v4, 0  ;;  %vm1607_vm6 = vsmask.f32 (!%p380_p3), 7424 }
   0xf   : > { %vm1051_vm7 = vsmask.f32 (!%p380_p3), 3328  ;;  %vm1261_vm8 = vsmask.f32 (!%p380_p3), 256  ;;  %vm861_vm9 = vcmask (!%p380_p3), 261120  }
  0x10   : > { %s4797_s28 = smov (!%p480_p5, %s3527_s28), 1  ;;  %s4799_s19 = smov (!%p478_p7, %s3094_s19), 0 }
  0x11   : > { %s497_s15 = scalar_select %p496_p6, %s3624_s12, 15 }
  0x12   : > { %s3648_s18 = smul.u32 48, %s4797_s28  ;;  %s4801_s21 = smov (!%p3658_p8, %s505_s21), 15 }
  0x13   : > { %s3427_s20 = smul.u32 3, %s497_s15  ;;  %s4803_s19 = smov (!%p3095_p9, %s4799_s19), 15 }
  0x14   : > { %s4805_s21 = smov (!%p3658_p8, %s4801_s21), 15  ;;  %s3425_s11 = smul.u32 3, %s4803_s19 }
  0x15   : > { %s3655_s22 = sadd.s32 %s3427_s20, %s3648_s18  ;;  %s3677_s13 = smul.u32 3, %s4805_s21 }
  0x16   : > { %s3102_s23 = sshll.u32 %s3655_s22, 2  ;;  %s486_s12 = sadd.s32 %s3648_s18, %s3425_s11 }
  0x17   : > { %s502_s10 = scalar_lea.vmem %s4735_s1, %s3102_s23  ;;  %s3100_s14 = sshll.u32 %s486_s12, 2 }
  0x18   : > { %v3495_v5 = vld [vmem:[%s502_s10] sm:$0xff]   ;;  %v3496_v6 = vld [vmem:[%s502_s10 + $0x8] sm:$0xff]   ;;  %v3497_v7 = vld [vmem:[%s502_s10 + $0x10] sm:$0xff]   ;;  %s3703_s17 = scalar_lea.vmem %s4734_s0, %s3100_s14  ;;  %s514_s19 = sadd.s32 %s3677_s13, %s3648_s18 }
  0x19   : > { %658 = vst.msk [vmem:[#allocation2 + $0x10] sm:$0xff] %vm608_vm3, %v3495_v5  ;;  %659 = vst.msk [vmem:[#allocation2 + $0x18] sm:$0xff] %vm608_vm3, %v3496_v6  ;;  %v3498_v8 = vld [vmem:[%s502_s10 + $0x18] sm:$0xff]   ;;  %v3499_v9 = vld [vmem:[%s502_s10 + $0x20] sm:$0xff]   ;;  %s3713_s20 = scalar_select %p560_p10, 1.0, 0.0 }
  0x1a   : > { %660 = vst.msk [vmem:[#allocation2 + $0x20] sm:$0xff] %vm608_vm3, %v3497_v7  ;;  %661 = vst.msk [vmem:[#allocation2 + $0x28] sm:$0xff] %vm608_vm3, %v3498_v8  ;;  %v3500_v10 = vld [vmem:[%s502_s10 + $0x28] sm:$0xff]   ;;  %s3721_s21 = scalar_select %p541_p11, 1.0, 0.0 }
  0x1b   : > { %662 = vst.msk [vmem:[#allocation2 + $0x30] sm:$0xff] %vm608_vm3, %v3499_v9  ;;  %663 = vst.msk [vmem:[#allocation2 + $0x38] sm:$0xff] %vm608_vm3, %v3500_v10  ;;  %p563_p12 = scmp.ne.f32.partialorder %s3713_s20, %s3713_s20  ;;  %s564_s24 = sshrl.u32 %s3713_s20, 16  ;;  %v586_v45 = vld [vmem:[%s3703_s17] sm:$0xf] }
  0x1c   : > { %s565_s25 = sand.u32 1, %s564_s24  ;;  %p575_p13 = scmp.ne.f32.partialorder %s3721_s21, %s3721_s21  ;;  %v587_v47 = vld [vmem:[%s3703_s17 + $0x4] sm:$0xf]  ;;  %v588_v48 = vld [vmem:[%s3703_s17 + $0x8] sm:$0xf] }
  0x1d   : > { %s566_s26 = sadd.s32 32767, %s565_s25  ;;  %s576_s10 = sshrl.u32 %s3721_s21, 16 }
  0x1e   : > { %s567_s11 = sadd.s32 %s566_s26, %s3713_s20  ;;  %s577_s12 = sand.u32 1, %s576_s10 }
  0x1f   : > { %s568_s14 = sand.u32 4294901760, %s567_s11  ;;  %s578_s15 = sadd.s32 32767, %s577_s12 }
  0x20   : > { %v3682_v11 = vld [vmem:[#allocation2 + $0x10] sm:$0xff]  ;;  %v3684_v12 = vld [vmem:[#allocation2 + $0x18] sm:$0xff]  ;;  %s4807_s14 = smov (%p563_p12, %s568_s14), 2143289344  ;;  %s3107_s25 = sshll.u32 %s514_s19, 2 }
  0x21   : > { %v3687_v13 = vshrl.u32 %v3682_v11, 16  ;;  %v3690_v14 = vshll.u32 %v3682_v11, 16  ;;  %v3693_v15 = vshrl.u32 %v3684_v12, 16  ;;  %v3696_v16 = vshll.u32 %v3684_v12, 16  ;;  %v3698_v17 = vld [vmem:[#allocation2 + $0x20] sm:$0xff]  ;;  %v3728_v26 = vld [vmem:[#allocation2 + $0x28] sm:$0xff]  ;;  %s579_s26 = sadd.s32 %s578_s15, %s3721_s21  ;;  %s3781_s19 = scalar_lea.vmem %s4736_s2, %s3107_s25 }
  0x22   : > { %v3708_v18 = vshrl.u32 %v3698_v17, 16  ;;  %v3711_v19 = vshll.u32 %v3698_v17, 16  ;;  %v3735_v29 = vshrl.u32 %v3728_v26, 16  ;;  %v3738_v30 = vshll.u32 %v3728_v26, 16  ;;  %v693_v33 = vld [vmem:[#allocation2 + $0x30] sm:$0xf] }
  0x23   : > { %v716_v20 = vrot.slane %v3687_v13, 3  ;;  %v719_v21 = vrot.slane %v3690_v14, 4  ;;  %v725_v22 = vrot.slane %v3693_v15, 3  ;;  %v728_v23 = vrot.slane %v3696_v16, 4  ;;  %s571_s10 = sshrl.u32 %s4807_s14, 16  ;;  %s580_s11 = sand.u32 4294901760, %s579_s26 }
  0x24   : > { %v734_v24 = vrot.slane %v3708_v18, 3  ;;  %v737_v25 = vrot.slane %v3711_v19, 4  ;;  %v743_v35 = vrot.slane %v3735_v29, 3  ;;  %v746_v36 = vrot.slane %v3738_v30, 4  ;;  %s4809_s11 = smov (%p575_p13, %s580_s11), 2143289344  ;;  %s589_s20 = sshll.u32 %s571_s10, 16 }
  0x25   : > { %v3730_v27 = vor.u32 %v719_v21, %v716_v20  ;;  %v729_v28 = vor.u32 %v728_v23, %v725_v22  ;;  %v750_v37 = vshrl.u32 %v693_v33, 16  ;;  %v753_v39 = vshll.u32 %v693_v33, 16  ;;  %s583_s12 = sshrl.u32 %s4809_s11, 16  ;;  %s590_s14 = sor.u32 %s589_s20, %s571_s10  ;;  %v666_v51 = vld [vmem:[%s3781_s19 + $0x8] sm:$0xf]  ;;  %v3810_v6 = vld [vmem:[#allocation2 + $0x30] sm:$0xff] }
  0x26   : > { %v3740_v31 = vor.u32 %v737_v25, %v734_v24  ;;  %v3760_v41 = vor.u32 %v746_v36, %v743_v35  ;;  %v591_v50 = vstv %s590_s14  ;;  %s667_s21 = sshll.u32 %s583_s12, 16  ;;  %v1798_v62 = vld [vmem:[#allocation2 + $0x18] sm:$0xf8]  ;;  %v894_v63 = vrot.slane %v3682_v11, 4  ;;  %s4574_s14 = scalar_lea.vmem %s4740_s6, %s3102_s23 }
  0x27   : > { %v730_v34 = vsel %vm695_vm4, %v3730_v27, %v729_v28  ;;  %v752_v42 = vrot.slane %v750_v37, 3  ;;  %v755_v43 = vrot.slane %v753_v39, 4  ;;  %v593_v52 = vmul.bf16 %v591_v50, %v586_v45  ;;  %s668_s15 = sor.u32 %s667_s21, %s583_s12  ;;  %s4811_s27 = smov (!%p541_p11, %s3523_s27), 3 }
  0x28   : > { %3293 = vmatprep.mubr.msk.bf16.mxu1 %vm608_vm3, %v730_v34  ;;  %v739_v38 = vsel %vm695_vm4, %v729_v28, %v3740_v31  ;;  %v3769_v44 = vsel %vm695_vm4, %v3740_v31, %v3760_v41  ;;  %v594_v53 = vmul.bf16 %v591_v50, %v587_v47  ;;  %v595_v54 = vmul.bf16 %v591_v50, %v588_v48  ;;  %s3110_s22 = sshll.u32 %s4797_s28, 2 }
  0x29   : > { %3294 = vmatmul.mubr.msk.bf16.vlgmr.msra.gmra.mrb[0].mxu1 %vm608_vm3, %v739_v38  ;;  %v756_v46 = vor.u32 %v755_v43, %v752_v42  ;;  %v3788_v55 = vstv %s668_s15  ;;  %v3112_v56 = vcombine.low %v593_v52, %v593_v52  ;;  %v896_v0 = vrot.slane %v3684_v12, 4  ;;  %s547_s23 = sadd.s32 %s3110_s22, %s4811_s27 }
  0x2a   : > { %3302 = vmatpush3.bf16.msra.mxu1 %v923_v32  ;;  %3297 = vmatprep.mubr.msk.bf16.mxu1 %vm608_vm3, %v3769_v44  ;;  %v3113_v57 = vcombine.low %v594_v53, %v595_v54  ;;  %v673_v58 = vmul.bf16 %v3788_v55, %v666_v51  ;;  %v1613_v1 = vrot.slane %v3690_v14, 1  ;;  %v1072_v2 = vrot.slane %v3687_v13, 4  ;;  %s548_s17 = scalar_lea.vmem %s4741_s7, %s547_s23  ;;  %s558_s25 = scalar_lea.vmem %s4742_s8, %s547_s23 }
  0x2b   : > { %3419 = vmatprep.subr.msk.bf16.mxu1 %vm776_vm0, %v3142_v40  ;;  %v757_v49 = vsel %vm695_vm4, %v3760_v41, %v756_v46  ;;  %607 = vst.msk [vmem:[#allocation2] sm:$0xf0] %vm606_vm2, %v3112_v56  ;;  %v1075_v3 = vrot.slane %v3690_v14, 5  ;;  %v3808_v5 = vrot.slane %v3698_v17, 4  ;;  %v1618_v4 = vrot.slane %v3696_v16, 1 }
  0x2c   : > { %609 = vst.msk [vmem:[#allocation2 + $0x8] sm:$0xff] %vm608_vm3, %v3113_v57  ;;  %v3121_v59 = vcombine.low %v673_v58, %v673_v58  ;;  %v1081_v7 = vrot.slane %v3693_v15, 4  ;;  %v1614_v8 = vor.u32 %v1613_v1, %v3687_v13  ;;  %v1626_v9 = vrot.slane %v3711_v19, 1 }
  0x2d   : > { %v1808_v10 = vshrl.u32 %v1798_v62, 16  ;;  %v1084_v20 = vrot.slane %v3696_v16, 5  ;;  %v1622_v21 = vor.u32 %v1618_v4, %v3693_v15  ;;  %v1811_v22 = vshll.u32 %v1798_v62, 16 }
  0x2e   : > { %685 = vst.msk [vmem:[#allocation2 + $0x48] sm:$0xf] %vm584_vm1, %v3121_v59  ;;  %v1634_v23 = vrot.slane %v3738_v30, 1  ;;  %v3820_v24 = vshrl.u32 %v3810_v6, 16  ;;  %v3823_v25 = vsel %vm1607_vm6, %v1614_v8, %v1618_v4  ;;  %v1630_v32 = vor.u32 %v1626_v9, %v3708_v18 }
  0x2f   : > { %v1810_v28 = vrot.slane %v1808_v10, 3  ;;  %v897_v36 = vsel %vm890_vm5, %v894_v63, %v896_v0  ;;  %v3830_v37 = vsel %vm1607_vm6, %v1622_v21, %v1626_v9  ;;  %v1813_v38 = vrot.slane %v1811_v22, 4  ;;  %v3841_v9 = vld [vmem:[%s4737_s3 + $0xa] sm:$0x3] }
  0x30   : > { %v3833_v39 = vor.u32 %v1634_v23, %v3735_v29  ;;  %v3848_v21 = vshll.u32 %v3810_v6, 16 }
  0x31   : > { %3298 = vmatmul.mubr.msk.bf16.gmra.mrb[4].mxu1 %vm608_vm3, %v757_v49  ;;  %v1814_v22 = vor.u32 %v1813_v38, %v1810_v28  ;;  %v1836_v28 = vrot.slane %v3820_v24, 3  ;;  %v1076_v38 = vor.u32 %v1075_v3, %v1072_v2  ;;  %v1090_v2 = vrot.slane %v3708_v18, 4  ;;  %v1048_v3 = vld [vmem:[#allocation2 + $0x30] sm:$0x1f] }
  0x32   : > { %v687_v33 = vld [vmem:[#allocation2] sm:$0xf8] }
  0x33   : > { %v688_v34 = vld [vmem:[#allocation2 + $0x8] sm:$0xff]  ;;  %v874_v35 = vld [vmem:[#allocation2] sm:$0xf0]  ;;  %v697_v40 = vshrl.u32 %v687_v33, 16  ;;  %v700_v42 = vshll.u32 %v687_v33, 16  ;;  %v3851_v33 = vsel %vm1607_vm6, %v1630_v32, %v1634_v23  ;;  %v3864_v23 = vsel %vm695_vm4, %v1814_v22, %v3740_v31 }
  0x34   : > { %v705_v43 = vshrl.u32 %v688_v34, 16  ;;  %v708_v45 = vshll.u32 %v688_v34, 16  ;;  %v1042_v46 = vld [vmem:[#allocation2] sm:$0xf0]  ;;  %v891_v47 = vrot.slane %v874_v35, 4  ;;  %v892_v48 = vrot.slane %v688_v34, 4 }
  0x35   : > { %v1053_v49 = vshrl.u32 %v1042_v46, 16  ;;  %v1056_v50 = vshll.u32 %v1042_v46, 16  ;;  %v699_v51 = vrot.slane %v697_v40, 3  ;;  %v702_v52 = vrot.slane %v700_v42, 4  ;;  %v664_v32 = vld [vmem:[%s3781_s19] sm:$0xf] }
  0x36   : > { %v707_v53 = vrot.slane %v705_v43, 3  ;;  %v710_v54 = vrot.slane %v708_v45, 4  ;;  %v893_v56 = vsel %vm890_vm5, %v891_v47, %v892_v48  ;;  %v895_v57 = vsel %vm890_vm5, %v892_v48, %v894_v63  ;;  %v3149_v63 = vld [vmem:[%s4737_s3 + $0x8] sm:$0x3]  ;;  %v1252_v31 = vld [vmem:[#allocation2 + $0x8] sm:$0x80] }
  0x37   : > { %v1055_v58 = vrot.slane %v1053_v49, 4  ;;  %v1058_v59 = vrot.slane %v1056_v50, 5  ;;  %v703_v62 = vor.u32 %v702_v52, %v699_v51  ;;  %3303 = vmatprep.mubr.msk.bf16.mxu1 %vm608_vm3, %v893_v56  ;;  %v1063_v4 = vrot.slane %v705_v43, 4  ;;  %v2174_v51 = vld [vmem:[#allocation2 + $0x18] sm:$0xf0] }
  0x38   : > { %v711_v1 = vor.u32 %v710_v54, %v707_v53  ;;  %v1066_v8 = vrot.slane %v708_v45, 5  ;;  %v900_v42 = vrot.slane %v3728_v26, 4  ;;  %v1479_v43 = vsel %vm776_vm0, %v3149_v63, 0  ;;  %v880_v45 = vld [vmem:[#allocation2 + $0x30] sm:$0xf] }
  0x39   : > { %3304 = vmatmul.mubr.msk.bf16.vlgmr.msra.gmra.mrb[8].mxu1 %vm608_vm3, %v895_v57  ;;  %v1059_v10 = vor.u32 %v1058_v59, %v1055_v58  ;;  %v899_v46 = vsel %vm890_vm5, %v896_v0, %v3808_v5  ;;  %v1085_v47 = vor.u32 %v1084_v20, %v1081_v7  ;;  %v1269_v49 = vrot.slane %v3687_v13, 7 }
  0x3a   : > { %v712_v34 = vsel %vm695_vm4, %v703_v62, %v711_v1  ;;  %v721_v35 = vsel %vm695_vm4, %v711_v1, %v3730_v27  ;;  %3330 = vmatpush3.bf16.msra.mxu1 %v3795_v60  ;;  %v1067_v40 = vor.u32 %v1066_v8, %v1063_v4  ;;  %3307 = vmatprep.mubr.msk.bf16.mxu1 %vm608_vm3, %v897_v36  ;;  %v1839_v27 = vrot.slane %v3848_v21, 4  ;;  %v665_v60 = vld [vmem:[%s3781_s19 + $0x4] sm:$0xf]  ;;  %v3163_v8 = vld [vmem:[%s4737_s3 + $0xc] sm:$0x3] }
  0x3b   : > { %3289 = vmatprep.mubr.msk.bf16.mxu0 %vm608_vm3, %v712_v34  ;;  %3421 = vmatprep.subr.msk.bf16.mxu1 %vm776_vm0, %v3841_v9  ;;  %v671_v0 = vmul.bf16 %v3788_v55, %v664_v32  ;;  %v672_v50 = vmul.bf16 %v3788_v55, %v665_v60  ;;  %v1093_v7 = vrot.slane %v3711_v19, 5  ;;  %v902_v20 = vrot.slane %v880_v45, 4 }
  0x3c   : > { %3290 = vmatmul.mubr.msk.bf16.vlgmr.msra.gmra.mrb[0].mxu0 %vm608_vm3, %v721_v35  ;;  %v1068_v36 = vsel %vm1051_vm7, %v1059_v10, %v1067_v40  ;;  %v3888_v48 = vor.u32 %v1839_v27, %v1836_v28  ;;  %v1263_v52 = vshrl.u32 %v1252_v31, 16  ;;  %v1099_v54 = vrot.slane %v3735_v29, 4 }
  0x3d   : > { %3316 = vmatpush3.bf16.msra.mxu0 %v3799_v61  ;;  %3317 = vmatprep.mubr.msk.bf16.mxu0 %vm608_vm3, %v1068_v36  ;;  %v3893_v61 = vsel %vm890_vm5, %v3808_v5, %v900_v42  ;;  %v1102_v56 = vrot.slane %v3738_v30, 5  ;;  %v1106_v57 = vshrl.u32 %v1048_v3, 16  ;;  %v3120_v13 = vcombine.low %v671_v0, %v672_v50 }
  0x3e   : > { %3420 = vmatprep.subr.msk.bf16.mxu0 %vm776_vm0, %v3149_v63  ;;  %v3902_v53 = vsel %vm695_vm4, %v3760_v41, %v3888_v48  ;;  %v1077_v58 = vsel %vm1051_vm7, %v1067_v40, %v1076_v38  ;;  %v2184_v55 = vshrl.u32 %v2174_v51, 16  ;;  %v2187_v59 = vshll.u32 %v2174_v51, 16 }
  0x3f   : > { %v1086_v62 = vsel %vm1051_vm7, %v1076_v38, %v1085_v47  ;;  %v1272_v41 = vor.u32 %v1269_v49, %v3690_v14  ;;  %684 = vst.msk [vmem:[#allocation2 + $0x40] sm:$0xff] %vm608_vm3, %v3120_v13  ;;  %v2028_v1 = vrot.slane %v3810_v6, 4  ;;  %v1265_v4 = vrot.slane %v1263_v52, 7 }
  0x40   : > { %v2186_v10 = vrot.slane %v2184_v55, 4  ;;  %v2189_v63 = vrot.slane %v2187_v59, 5  ;;  %v1094_v22 = vor.u32 %v1093_v7, %v1090_v2  ;;  %v1109_v14 = vshll.u32 %v1048_v3, 16 }
  0x41   : > { %3308 = vmatmul.mubr.msk.bf16.gmra.mrb[12].mxu1 %vm608_vm3, %v899_v46  ;;  %v3921_v34 = vsel %vm890_vm5, %v900_v42, %v2028_v1  ;;  %v2212_v40 = vrot.slane %v3820_v24, 4  ;;  %v2215_v28 = vrot.slane %v3848_v21, 5  ;;  %v903_v27 = vsel %vm890_vm5, %v900_v42, %v902_v20 }
  0x42   : > { %3311 = vmatprep.mubr.msk.bf16.mxu1 %vm608_vm3, %v3893_v61  ;;  %v2190_v35 = vor.u32 %v2189_v63, %v2186_v10  ;;  %v1103_v32 = vor.u32 %v1102_v56, %v1099_v54  ;;  %v1277_v60 = vrot.slane %v3693_v15, 7  ;;  %v1273_v36 = vsel %vm1261_vm8, %v1265_v4, %v1272_v41  ;;  %v2007_v4 = vld [vmem:[#allocation2 + $0x18] sm:$0xf0] }
  0x43   : > { %v1285_v38 = vrot.slane %v3708_v18, 7  ;;  %v3934_v45 = vor.u32 %v2215_v28, %v2212_v40  ;;  %v1095_v46 = vsel %vm1051_vm7, %v1085_v47, %v1094_v22  ;;  %v1108_v42 = vrot.slane %v1106_v57, 4 }
  0x44   : > { %3318 = vmatmul.mubr.msk.bf16.vlgmr.msra.gmra.mrb[4].mxu0 %vm608_vm3, %v1077_v58  ;;  %v3937_v31 = vsel %vm1051_vm7, %v1094_v22, %v1103_v32  ;;  %v1111_v15 = vrot.slane %v1109_v14, 5  ;;  %v1280_v18 = vor.u32 %v1277_v60, %v3696_v16  ;;  %v1293_v50 = vrot.slane %v3735_v29, 7  ;;  %v3957_v16 = vld [vmem:[#allocation2 + $0x38] sm:$0xff] }
  0x45   : > { %3344 = vmatpush3.bf16.msra.mxu0 %v1479_v43  ;;  %3321 = vmatprep.mubr.msk.bf16.mxu0 %vm608_vm3, %v1086_v62  ;;  %v3932_v43 = vsel %vm1051_vm7, %v2190_v35, %v1094_v22  ;;  %v3943_v2 = vsel %vm1051_vm7, %v1103_v32, %v3934_v45  ;;  %v1288_v3 = vor.u32 %v1285_v38, %v3711_v19  ;;  %v1679_v51 = vsel %vm776_vm0, %v3841_v9, 0  ;;  %v3170_v19 = vld [vmem:[%s4737_s3 + $0xe] sm:$0x3]  ;;  %v1804_v35 = vld [vmem:[#allocation2 + $0x48] sm:$0xf] }
  0x46   : > { %3422 = vmatprep.subr.msk.bf16.mxu0 %vm776_vm0, %v3163_v8  ;;  %v1112_v47 = vor.u32 %v1111_v15, %v1108_v42  ;;  %v1281_v0 = vsel %vm1261_vm8, %v1269_v49, %v1280_v18  ;;  %v1301_v20 = vrot.slane %v3820_v24, 7  ;;  %v1296_v29 = vor.u32 %v1293_v50, %v3738_v30  ;;  %v1604_v62 = vld [vmem:[#allocation2 + $0x40] sm:$0x1] }
  0x47   : > { %v1289_v7 = vsel %vm1261_vm8, %v1277_v60, %v1288_v3  ;;  %v3967_v9 = vshrl.u32 %v3957_v16, 16  ;;  %v3977_v57 = vshll.u32 %v3957_v16, 16  ;;  %v1888_v13 = vsel %vm776_vm0, %v3163_v8, 0 }
  0x48   : > { %v1113_v52 = vsel %vm1051_vm7, %v1103_v32, %v1112_v47  ;;  %v1304_v49 = vor.u32 %v3848_v21, %v1301_v20  ;;  %v1297_v54 = vsel %vm1261_vm8, %v1285_v38, %v1296_v29  ;;  %v2023_v40 = vrot.slane %v2007_v4, 4 }
  0x49   : > { %3312 = vmatmul.mubr.msk.bf16.gmra.mrb[16].mxu1 %vm608_vm3, %v903_v27  ;;  %v1309_v56 = vrot.slane %v3967_v9, 7  ;;  %v1845_v10 = vrot.slane %v3967_v9, 3  ;;  %v1848_v63 = vrot.slane %v3977_v57, 4  ;;  %v1861_v27 = vshrl.u32 %v1804_v35, 16 }
  0x4a   : > { %3331 = vmatprep.mubr.msk.bf16.mxu1 %vm608_vm3, %v1273_v36  ;;  %v1305_v30 = vsel %vm1261_vm8, %v1293_v50, %v1304_v49  ;;  %v1864_v32 = vshll.u32 %v1804_v35, 16  ;;  %v2025_v38 = vsel %vm890_vm5, %v2023_v40, %v3808_v5  ;;  %v2030_v5 = vrot.slane %v3957_v16, 4 }
  0x4b   : > { %v1312_v58 = vor.u32 %v3977_v57, %v1309_v56  ;;  %v1849_v28 = vor.u32 %v1848_v63, %v1845_v10  ;;  %v1863_v42 = vrot.slane %v1861_v27, 3 }
  0x4c   : > { %3322 = vmatmul.mubr.msk.bf16.gmra.mrb[8].mxu0 %vm608_vm3, %v1095_v46  ;;  %v2031_v3 = vsel %vm890_vm5, %v2028_v1, %v2030_v5 }
  0x4d   : > { %3325 = vmatprep.mubr.msk.bf16.mxu0 %vm608_vm3, %v3937_v31  ;;  %v1313_v55 = vsel %vm1261_vm8, %v1301_v20, %v1312_v58  ;;  %v1850_v46 = vsel %vm695_vm4, %v3888_v48, %v1849_v28  ;;  %v2180_v20 = vld [vmem:[#allocation2 + $0x48] sm:$0x1f] }
  0x4e   : > { %v2237_v1 = vshrl.u32 %v2180_v20, 16 }
  0x50   : > { %v2239_v29 = vrot.slane %v2237_v1, 4 }
  0x51   : > { %3332 = vmatmul.mubr.msk.bf16.vlgmr.msra.gmra.mrb[20].mxu1 %vm608_vm3, %v1281_v0  ;;  %v2013_v0 = vld [vmem:[#allocation2 + $0x48] sm:$0xf] }
  0x52   : > { %3358 = vmatpush3.bf16.msra.mxu1 %v1679_v51  ;;  %3335 = vmatprep.mubr.msk.bf16.mxu1 %vm608_vm3, %v1289_v7  ;;  %v2034_v50 = vrot.slane %v2013_v0, 4 }
  0x53   : > { %3423 = vmatprep.subr.msk.bf16.mxu1 %vm776_vm0, %v3170_v19 }
  0x54   : > { %3326 = vmatmul.mubr.msk.bf16.gmra.mrb[12].mxu0 %vm608_vm3, %v1113_v52 }
  0x55   : > { %3345 = vmatprep.mubr.msk.bf16.mxu0 %vm608_vm3, %v3682_v11  ;;  %v3177_v11 = vld [vmem:[%s4737_s3 + $0x10] sm:$0x3] }
  0x56   : > { %v2264_v8 = vsel %vm776_vm0, %v3177_v11, 0 }
  0x59   : > { %3336 = vmatmul.mubr.msk.bf16.gmra.mrb[24].mxu1 %vm608_vm3, %v1297_v54 }
  0x5a   : > { %3339 = vmatprep.mubr.msk.bf16.mxu1 %vm608_vm3, %v1305_v30 }
  0x5c   : > { %3346 = vmatmul.mubr.msk.bf16.vlgmr.msra.gmra.mrb[16].mxu0 %vm608_vm3, %v3684_v12  ;;  %v2055_v12 = vsel %vm776_vm0, %v3170_v19, 0 }
  0x5d   : > { %3372 = vmatpush3.bf16.msra.mxu0 %v1888_v13  ;;  %3349 = vmatprep.mubr.msk.bf16.mxu0 %vm608_vm3, %v3698_v17  ;;  %v1642_v17 = vrot.slane %v3848_v21, 1  ;;  %v1656_v21 = vshll.u32 %v1604_v62, 16 }
  0x5e   : > { %3424 = vmatprep.subr.msk.bf16.mxu0 %vm776_vm0, %v3177_v11 }
  0x5f   : > { %v1646_v59 = vor.u32 %v1642_v17, %v3820_v24 }
  0x61   : > { %3340 = vmatmul.mubr.msk.bf16.gmra.mrb[28].mxu1 %vm608_vm3, %v1313_v55 }
  0x62   : > { %3359 = vmatprep.mubr.msk.bf16.mxu1 %vm608_vm3, %v3823_v25  ;;  %v1650_v25 = vrot.slane %v3977_v57, 1 }
  0x64   : > { %3350 = vmatmul.mubr.msk.bf16.gmra.mrb[20].mxu0 %vm608_vm3, %v3728_v26  ;;  %v4008_v26 = vld [vmem:[#allocation2 + $0x40] sm:$0xff]  ;;  %v1651_v24 = vsel %vm1607_vm6, %v1646_v59, %v1650_v25 }
  0x65   : > { %3353 = vmatprep.mubr.msk.bf16.mxu0 %vm608_vm3, %v3810_v6  ;;  %v1852_v41 = vshrl.u32 %v4008_v26, 16  ;;  %v2032_v48 = vrot.slane %v4008_v26, 4 }
  0x67   : > { %v1854_v22 = vrot.slane %v1852_v41, 3  ;;  %v2033_v47 = vsel %vm890_vm5, %v2030_v5, %v2032_v48  ;;  %v2230_v51 = vrot.slane %v1852_v41, 4 }
  0x69   : > { %3360 = vmatmul.mubr.msk.bf16.vlgmr.msra.gmra.mrb[32].mxu1 %vm608_vm3, %v3830_v37  ;;  %v1643_v37 = vsel %vm1607_vm6, %v3833_v39, %v1642_v17  ;;  %v1654_v39 = vor.u32 %v1650_v25, %v3967_v9 }
  0x6a   : > { %3386 = vmatpush3.bf16.msra.mxu1 %v2055_v12  ;;  %3363 = vmatprep.mubr.msk.bf16.mxu1 %vm608_vm3, %v3851_v33  ;;  %v1855_v33 = vshll.u32 %v4008_v26, 16 }
  0x6c   : > { %3354 = vmatmul.mubr.msk.bf16.gmra.mrb[24].mxu0 %vm608_vm3, %v3957_v16  ;;  %v1857_v14 = vrot.slane %v1855_v33, 4  ;;  %v2233_v7 = vrot.slane %v1855_v33, 5  ;;  %v2035_v16 = vsel %vm890_vm5, %v2032_v48, %v2034_v50 }
  0x6d   : > { %3373 = vmatprep.mubr.msk.bf16.mxu0 %vm608_vm3, %v3864_v23  ;;  %v1658_v23 = vrot.slane %v1656_v21, 1 }
  0x6e   : > { %v1858_v36 = vor.u32 %v1857_v14, %v1854_v22  ;;  %v2234_v19 = vor.u32 %v2233_v7, %v2230_v51 }
  0x6f   : > { %v1659_v60 = vsel %vm1607_vm6, %v1654_v39, %v1658_v23 }
  0x70   : > { %v1859_v15 = vsel %vm695_vm4, %v1849_v28, %v1858_v36 }
  0x71   : > { %3364 = vmatmul.mubr.msk.bf16.gmra.mrb[36].mxu1 %vm608_vm3, %v1643_v37 }
  0x72   : > { %3367 = vmatprep.mubr.msk.bf16.mxu1 %vm608_vm3, %v1651_v24 }
  0x74   : > { %3374 = vmatmul.mubr.msk.bf16.vlgmr.msra.gmra.mrb[28].mxu0 %vm608_vm3, %v3769_v44  ;;  %v1866_v44 = vrot.slane %v1864_v32, 4 }
  0x75   : > { %3400 = vmatpush3.bf16.msra.mxu0 %v2264_v8  ;;  %3377 = vmatprep.mubr.msk.bf16.mxu0 %vm608_vm3, %v3902_v53 }
  0x76   : > { %v1867_v53 = vor.u32 %v1866_v44, %v1863_v42 }
  0x78   : > { %v1868_v18 = vsel %vm695_vm4, %v1858_v36, %v1867_v53 }
  0x79   : > { %3368 = vmatmul.mubr.msk.bf16.gmra.mrb[40].mxu1 %vm608_vm3, %v1659_v60 }
  0x7a   : > { %3387 = vmatprep.mubr.msk.bf16.mxu1 %vm608_vm3, %v2025_v38 }
  0x7c   : > { %3378 = vmatmul.mubr.msk.bf16.gmra.mrb[32].mxu0 %vm608_vm3, %v1850_v46 }
  0x7d   : > { %3381 = vmatprep.mubr.msk.bf16.mxu0 %vm608_vm3, %v1859_v15 }
  0x81   : > { %3388 = vmatmul.mubr.msk.bf16.vlgmr.msra.gmra.mrb[44].mxu1 %vm608_vm3, %v3893_v61  ;;  %v2221_v61 = vrot.slane %v3967_v9, 4 }
  0x82   : > { %3391 = vmatprep.mubr.msk.bf16.mxu1 %vm608_vm3, %v3921_v34  ;;  %v2224_v34 = vrot.slane %v3977_v57, 5 }
  0x84   : > { %3382 = vmatmul.mubr.msk.bf16.gmra.mrb[36].mxu0 %vm608_vm3, %v1868_v18  ;;  %v2225_v6 = vor.u32 %v2224_v34, %v2221_v61 }
  0x85   : > { %3401 = vmatprep.mubr.msk.bf16.mxu0 %vm608_vm3, %v3932_v43  ;;  %v2240_v43 = vshll.u32 %v2180_v20, 16 }
  0x86   : > { %v2226_v52 = vsel %vm1051_vm7, %v3934_v45, %v2225_v6  ;;  %v2235_v49 = vsel %vm1051_vm7, %v2225_v6, %v2234_v19 }
  0x87   : > { %v2242_v9 = vrot.slane %v2240_v43, 5 }
  0x89   : > { %3392 = vmatmul.mubr.msk.bf16.gmra.mrb[48].mxu1 %vm608_vm3, %v2031_v3 }
  0x8a   : > { %3395 = vmatprep.mubr.msk.bf16.mxu1 %vm608_vm3, %v2033_v47 }
  0x8c   : > { %3402 = vmatmul.mubr.msk.bf16.vlgmr.msra.gmra.mrb[40].mxu0 %vm608_vm3, %v3937_v31  ;;  %v2243_v31 = vor.u32 %v2242_v9, %v2239_v29 }
  0x8d   : > { %3405 = vmatprep.mubr.msk.bf16.mxu0 %vm608_vm3, %v3943_v2 }
  0x8e   : > { %v2244_v2 = vsel %vm1051_vm7, %v2234_v19, %v2243_v31 }
  0x91   : > { %3396 = vmatmul.mubr.msk.bf16.gmra.mrb[52].mxu1 %vm608_vm3, %v2035_v16 }
  0x94   : > { %3406 = vmatmul.mubr.msk.bf16.gmra.mrb[44].mxu0 %vm608_vm3, %v2226_v52  ;;  %v2460_v52 = vlaneseq }
  0x95   : > { %3409 = vmatprep.mubr.msk.bf16.mxu0 %vm608_vm3, %v2235_v49 }
  0x9c   : > { %3410 = vmatmul.mubr.msk.bf16.gmra.mrb[48].mxu0 %vm608_vm3, %v2244_v2 }
  0xfc   : > { %v3295_v54 = vpop.f32.mrb[0].mxu1 }
  0xfd   : > { %868 = vst.msk [vmem:[#allocation3 + $0x30] sm:$0xff] %vm861_vm9, %v3295_v54  ;;  %v830_v45 = vpop.f32.mrb[1].mxu1 }
  0xfe   : > { %866 = vst.msk [vmem:[#allocation3 + $0x20] sm:$0xff] %vm861_vm9, %v830_v45  ;;  %v3296_v56 = vpop.f32.mrb[2].mxu1 }
  0xff   : > { %869 = vst.msk [vmem:[#allocation3 + $0x38] sm:$0xff] %vm861_vm9, %v3296_v56  ;;  %v833_v57 = vpop.f32.mrb[3].mxu1 }
 0x100   : > { %867 = vst.msk [vmem:[#allocation3 + $0x28] sm:$0xff] %vm861_vm9, %v833_v57 }
 0x104   : > { %v3299_v30 = vpop.f32.mrb[4].mxu1  ;;  %v1012_v41 = vld [vmem:[#allocation3 + $0x30] sm:$0xff] }
 0x105   : > { %872 = vst.msk [vmem:[#allocation3 + $0x50] sm:$0xff] %vm861_vm9, %v3299_v30  ;;  %v846_v13 = vpop.f32.mrb[5].mxu1  ;;  %v1010_v4 = vld [vmem:[#allocation3 + $0x20] sm:$0xff] }
 0x106   : > { %870 = vst.msk [vmem:[#allocation3 + $0x40] sm:$0xff] %vm861_vm9, %v846_v13  ;;  %v3300_v58 = vpop.f32.mrb[6].mxu1  ;;  %v1013_v63 = vld [vmem:[#allocation3 + $0x38] sm:$0xff] }
 0x107   : > { %873 = vst.msk [vmem:[#allocation3 + $0x58] sm:$0xff] %vm861_vm9, %v3300_v58  ;;  %v849_v11 = vpop.f32.mrb[7].mxu1  ;;  %v1011_v35 = vld [vmem:[#allocation3 + $0x28] sm:$0xff] }
 0x108   : > { %871 = vst.msk [vmem:[#allocation3 + $0x48] sm:$0xff] %vm861_vm9, %v849_v11 }
 0x10c   : > { %v3305_v55 = vpop.f32.mrb[8].mxu1  ;;  %v1016_v18 = vld [vmem:[#allocation3 + $0x50] sm:$0xff] }
 0x10d   : > { %v959_v12 = vpop.f32.mrb[9].mxu1  ;;  %v1014_v3 = vld [vmem:[#allocation3 + $0x40] sm:$0xff] }
 0x10e   : > { %v3306_v17 = vpop.f32.mrb[10].mxu1  ;;  %v1017_v34 = vld [vmem:[#allocation3 + $0x58] sm:$0xff] }
 0x10f   : > { %v3291_v59 = vpop.f32.mrb[0].mxu0  ;;  %v962_v25 = vpop.f32.mrb[11].mxu1  ;;  %v1015_v6 = vld [vmem:[#allocation3 + $0x48] sm:$0xff] }
 0x110   : > { %864 = vst.msk [vmem:[#allocation3 + $0x10] sm:$0xff] %vm861_vm9, %v3291_v59  ;;  %v814_v62 = vpop.f32.mrb[1].mxu0 }
 0x111   : > { %862 = vst.msk [vmem:[#allocation3] sm:$0xff] %vm861_vm9, %v814_v62  ;;  %v3292_v26 = vpop.f32.mrb[2].mxu0 }
 0x112   : > { %865 = vst.msk [vmem:[#allocation3 + $0x18] sm:$0xff] %vm861_vm9, %v3292_v26  ;;  %v817_v37 = vpop.f32.mrb[3].mxu0 }
 0x113   : > { %863 = vst.msk [vmem:[#allocation3 + $0x8] sm:$0xff] %vm861_vm9, %v817_v37 }
 0x114   : > { %v3309_v21 = vpop.f32.mrb[12].mxu1 }
 0x115   : > { %v1024_v33 = vadd.f32 %v3309_v21, %v1012_v41  ;;  %v975_v24 = vpop.f32.mrb[13].mxu1 }
 0x116   : > { %v1022_v8 = vadd.f32 %v1010_v4, %v975_v24  ;;  %v3310_v10 = vpop.f32.mrb[14].mxu1 }
 0x117   : > { %v1008_v39 = vld [vmem:[#allocation3 + $0x10] sm:$0xff]  ;;  %v3319_v23 = vpop.f32.mrb[4].mxu0  ;;  %1036 = vst.msk [vmem:[#allocation3 + $0x30] sm:$0xff] %vm861_vm9, %v1024_v33  ;;  %v1025_v22 = vadd.f32 %v3310_v10, %v1013_v63  ;;  %v978_v14 = vpop.f32.mrb[15].mxu1 }
 0x118   : > { %v1020_v40 = vadd.f32 %v3305_v55, %v1008_v39  ;;  %v1006_v28 = vld [vmem:[#allocation3] sm:$0xff]  ;;  %v1169_v27 = vpop.f32.mrb[5].mxu0  ;;  %1034 = vst.msk [vmem:[#allocation3 + $0x20] sm:$0xff] %vm861_vm9, %v1022_v8  ;;  %v1023_v32 = vadd.f32 %v1011_v35, %v978_v14 }
 0x119   : > { %v1018_v60 = vadd.f32 %v1006_v28, %v959_v12  ;;  %v1009_v36 = vld [vmem:[#allocation3 + $0x18] sm:$0xff]  ;;  %v3320_v38 = vpop.f32.mrb[6].mxu0  ;;  %1037 = vst.msk [vmem:[#allocation3 + $0x38] sm:$0xff] %vm861_vm9, %v1025_v22  ;;  %v4098_v12 = vshrl.u32 %v2460_v52, 7 }
 0x11a   : > { %1032 = vst.msk [vmem:[#allocation3 + $0x10] sm:$0xff] %vm861_vm9, %v1020_v40  ;;  %v1021_v46 = vadd.f32 %v3306_v17, %v1009_v36  ;;  %v1007_v42 = vld [vmem:[#allocation3 + $0x8] sm:$0xff]  ;;  %v1172_v44 = vpop.f32.mrb[7].mxu0  ;;  %1035 = vst.msk [vmem:[#allocation3 + $0x28] sm:$0xff] %vm861_vm9, %v1023_v32 }
 0x11b   : > { %1030 = vst.msk [vmem:[#allocation3] sm:$0xff] %vm861_vm9, %v1018_v60  ;;  %v1019_v15 = vadd.f32 %v1007_v42, %v962_v25  ;;  %v4105_v4 = vadd.s32 16, %v4098_v12 }
 0x11c   : > { %1033 = vst.msk [vmem:[#allocation3 + $0x18] sm:$0xff] %vm861_vm9, %v1021_v46  ;;  %v3313_v53 = vpop.f32.mrb[16].mxu1 }
 0x11d   : > { %1031 = vst.msk [vmem:[#allocation3 + $0x8] sm:$0xff] %vm861_vm9, %v1019_v15  ;;  %v1028_v5 = vadd.f32 %v3313_v53, %v1016_v18  ;;  %v991_v48 = vpop.f32.mrb[17].mxu1  ;;  %v4111_v32 = vmul.u32.u64.low 2863311531, %v4105_v4  ;;  %v4112_v60 = vmul.u32.u64.high 2863311531, %v4105_v4, %v4111_v32 }
 0x11e   : > { %v1222_v47 = vld [vmem:[#allocation3 + $0x30] sm:$0xff]  ;;  %v1026_v0 = vadd.f32 %v1014_v3, %v991_v48  ;;  %v3314_v61 = vpop.f32.mrb[18].mxu1 }
 0x11f   : > { %v3323_v50 = vpop.f32.mrb[8].mxu0  ;;  %1040 = vst.msk [vmem:[#allocation3 + $0x50] sm:$0xff] %vm861_vm9, %v1028_v5  ;;  %v1220_v51 = vld [vmem:[#allocation3 + $0x20] sm:$0xff]  ;;  %v1029_v7 = vadd.f32 %v3314_v61, %v1017_v34  ;;  %v994_v20 = vpop.f32.mrb[19].mxu1 }
 0x120   : > { %v1234_v1 = vadd.f32 %v3323_v50, %v1222_v47  ;;  %v1185_v43 = vpop.f32.mrb[9].mxu0  ;;  %1038 = vst.msk [vmem:[#allocation3 + $0x40] sm:$0xff] %vm861_vm9, %v1026_v0  ;;  %v1223_v16 = vld [vmem:[#allocation3 + $0x38] sm:$0xff]  ;;  %v1027_v19 = vadd.f32 %v1015_v6, %v994_v20  ;;  %v4119_v50 = vadd.s32 24, %v4098_v12 }
 0x121   : > { %v1218_v29 = vld [vmem:[#allocation3 + $0x10] sm:$0xff]  ;;  %v1232_v9 = vadd.f32 %v1220_v51, %v1185_v43  ;;  %v3324_v49 = vpop.f32.mrb[10].mxu0  ;;  %1041 = vst.msk [vmem:[#allocation3 + $0x58] sm:$0xff] %vm861_vm9, %v1029_v7  ;;  %v1221_v31 = vld [vmem:[#allocation3 + $0x28] sm:$0xff] }
 0x122   : > { %v1230_v2 = vadd.f32 %v3319_v23, %v1218_v29  ;;  %v1216_v54 = vld [vmem:[#allocation3] sm:$0xff]  ;;  %1246 = vst.msk [vmem:[#allocation3 + $0x30] sm:$0xff] %vm861_vm9, %v1234_v1  ;;  %v1235_v45 = vadd.f32 %v3324_v49, %v1223_v16  ;;  %v1188_v56 = vpop.f32.mrb[11].mxu0  ;;  %1039 = vst.msk [vmem:[#allocation3 + $0x48] sm:$0xff] %vm861_vm9, %v1027_v19  ;;  %v4127_v1 = vmul.u32.u64.low 2863311531, %v4098_v12  ;;  %v4128_v43 = vmul.u32.u64.high 2863311531, %v4098_v12, %v4127_v1 }
 0x123   : > { %v1228_v57 = vadd.f32 %v1216_v54, %v1169_v27  ;;  %v1219_v30 = vld [vmem:[#allocation3 + $0x18] sm:$0xff]  ;;  %1244 = vst.msk [vmem:[#allocation3 + $0x20] sm:$0xff] %vm861_vm9, %v1232_v9  ;;  %v1233_v13 = vadd.f32 %v1221_v31, %v1188_v56  ;;  %v4131_v16 = vadd.s32 8, %v4098_v12  ;;  %v2501_v49 = vshrl.u32 %v4112_v60, 4 }
 0x124   : > { %1242 = vst.msk [vmem:[#allocation3 + $0x10] sm:$0xff] %vm861_vm9, %v1230_v2  ;;  %v1231_v58 = vadd.f32 %v3320_v38, %v1219_v30  ;;  %v1217_v11 = vld [vmem:[#allocation3 + $0x8] sm:$0xff]  ;;  %1247 = vst.msk [vmem:[#allocation3 + $0x38] sm:$0xff] %vm861_vm9, %v1235_v45  ;;  %v3333_v55 = vpop.f32.mrb[20].mxu1  ;;  %v4134_v19 = vmul.u32.u64.low 2863311531, %v4119_v50  ;;  %v4135_v52 = vmul.u32.u64.high 2863311531, %v4119_v50, %v4134_v19 }
 0x125   : > { %1240 = vst.msk [vmem:[#allocation3] sm:$0xff] %vm861_vm9, %v1228_v57  ;;  %v1229_v17 = vadd.f32 %v1217_v11, %v1172_v44  ;;  %1245 = vst.msk [vmem:[#allocation3 + $0x28] sm:$0xff] %vm861_vm9, %v1233_v13  ;;  %v1369_v59 = vpop.f32.mrb[21].mxu1  ;;  %v2479_v60 = vshrl.u32 %v4128_v43, 4 }
 0x126   : > { %1243 = vst.msk [vmem:[#allocation3 + $0x18] sm:$0xff] %vm861_vm9, %v1231_v58  ;;  %v1226_v25 = vld [vmem:[#allocation3 + $0x50] sm:$0xff]  ;;  %v3334_v62 = vpop.f32.mrb[22].mxu1 }
 0x127   : > { %1241 = vst.msk [vmem:[#allocation3 + $0x8] sm:$0xff] %vm861_vm9, %v1229_v17  ;;  %v3327_v26 = vpop.f32.mrb[12].mxu0  ;;  %v1224_v37 = vld [vmem:[#allocation3 + $0x40] sm:$0xff]  ;;  %v1372_v21 = vpop.f32.mrb[23].mxu1 }
 0x128   : > { %v1238_v41 = vadd.f32 %v3327_v26, %v1226_v25  ;;  %v1201_v33 = vpop.f32.mrb[13].mxu0  ;;  %v1227_v24 = vld [vmem:[#allocation3 + $0x58] sm:$0xff] }
 0x129   : > { %v1236_v8 = vadd.f32 %v1224_v37, %v1201_v33  ;;  %v3328_v10 = vpop.f32.mrb[14].mxu0  ;;  %v1225_v63 = vld [vmem:[#allocation3 + $0x48] sm:$0xff]  ;;  %v1422_v27 = vld [vmem:[#allocation3 + $0x30] sm:$0xff]  ;;  %v4144_v33 = vadd.s32 48, %v4098_v12 }
 0x12a   : > { %1250 = vst.msk [vmem:[#allocation3 + $0x50] sm:$0xff] %vm861_vm9, %v1238_v41  ;;  %v1239_v39 = vadd.f32 %v3328_v10, %v1227_v24  ;;  %v1204_v23 = vpop.f32.mrb[15].mxu0  ;;  %v1420_v44 = vld [vmem:[#allocation3 + $0x20] sm:$0xff] }
 0x12b   : > { %1248 = vst.msk [vmem:[#allocation3 + $0x40] sm:$0xff] %vm861_vm9, %v1236_v8  ;;  %v1418_v22 = vld [vmem:[#allocation3 + $0x10] sm:$0xff]  ;;  %v1237_v14 = vadd.f32 %v1225_v63, %v1204_v23  ;;  %v1423_v48 = vld [vmem:[#allocation3 + $0x38] sm:$0xff] }
 0x12c   : > { %v1430_v35 = vadd.f32 %v3333_v55, %v1418_v22  ;;  %1251 = vst.msk [vmem:[#allocation3 + $0x58] sm:$0xff] %vm861_vm9, %v1239_v39  ;;  %v1416_v40 = vld [vmem:[#allocation3] sm:$0xff]  ;;  %v3337_v28 = vpop.f32.mrb[24].mxu1  ;;  %v1421_v34 = vld [vmem:[#allocation3 + $0x28] sm:$0xff]  ;;  %v4139_v55 = vmul.u32.u64.low 2863311531, %v4131_v16  ;;  %v4140_v17 = vmul.u32.u64.high 2863311531, %v4131_v16, %v4139_v55 }
 0x12d   : > { %v1428_v36 = vadd.f32 %v1416_v40, %v1369_v59  ;;  %1249 = vst.msk [vmem:[#allocation3 + $0x48] sm:$0xff] %vm861_vm9, %v1237_v14  ;;  %v1419_v38 = vld [vmem:[#allocation3 + $0x18] sm:$0xff]  ;;  %v1434_v46 = vadd.f32 %v3337_v28, %v1422_v27  ;;  %v1385_v42 = vpop.f32.mrb[25].mxu1  ;;  %v2502_v22 = vmul.u32 24, %v2501_v49 }
 0x12e   : > { %1442 = vst.msk [vmem:[#allocation3 + $0x10] sm:$0xff] %vm861_vm9, %v1430_v35  ;;  %v1431_v15 = vadd.f32 %v3334_v62, %v1419_v38  ;;  %v1417_v53 = vld [vmem:[#allocation3 + $0x8] sm:$0xff]  ;;  %v1432_v18 = vadd.f32 %v1420_v44, %v1385_v42  ;;  %v3338_v5 = vpop.f32.mrb[26].mxu1  ;;  %v2512_v38 = vshrl.u32 %v4135_v52, 4 }
 0x12f   : > { %1440 = vst.msk [vmem:[#allocation3] sm:$0xff] %vm861_vm9, %v1428_v36  ;;  %v1429_v3 = vadd.f32 %v1417_v53, %v1372_v21  ;;  %v3347_v47 = vpop.f32.mrb[16].mxu0  ;;  %1446 = vst.msk [vmem:[#allocation3 + $0x30] sm:$0xff] %vm861_vm9, %v1434_v46  ;;  %v1435_v0 = vadd.f32 %v3338_v5, %v1423_v48  ;;  %v1388_v61 = vpop.f32.mrb[27].mxu1  ;;  %v4158_v46 = vmul.u32.u64.low 2863311531, %v4144_v33  ;;  %v4159_v42 = vmul.u32.u64.high 2863311531, %v4144_v33, %v4158_v46 }
 0x130   : > { %1443 = vst.msk [vmem:[#allocation3 + $0x18] sm:$0xff] %vm861_vm9, %v1431_v15  ;;  %v1515_v51 = vpop.f32.mrb[17].mxu0  ;;  %1444 = vst.msk [vmem:[#allocation3 + $0x20] sm:$0xff] %vm861_vm9, %v1432_v18  ;;  %v1433_v7 = vadd.f32 %v1421_v34, %v1388_v61  ;;  %v4163_v15 = vsub.s32 %v4105_v4, %v2502_v22  ;;  %v4167_v18 = vadd.s32 32, %v4098_v12 }
 0x131   : > { %1441 = vst.msk [vmem:[#allocation3 + $0x8] sm:$0xff] %vm861_vm9, %v1429_v3  ;;  %v3348_v20 = vpop.f32.mrb[18].mxu0  ;;  %1447 = vst.msk [vmem:[#allocation3 + $0x38] sm:$0xff] %vm861_vm9, %v1435_v0  ;;  %v1426_v9 = vld [vmem:[#allocation3 + $0x50] sm:$0xff]  ;;  %v2480_v3 = vmul.u32 24, %v2479_v60 }
 0x132   : > { %v1518_v6 = vpop.f32.mrb[19].mxu0  ;;  %1445 = vst.msk [vmem:[#allocation3 + $0x28] sm:$0xff] %vm861_vm9, %v1433_v7  ;;  %v1424_v45 = vld [vmem:[#allocation3 + $0x40] sm:$0xff]  ;;  %v2513_v7 = vmul.u32 24, %v2512_v38  ;;  %vm2607_vm10 = vcmp.ne.s32.totalorder %v4163_v15, 0  ;;  %vm2619_vm11 = vcmp.lt.s32.totalorder %v4163_v15, 0 }
 0x133   : > { %v1427_v11 = vld [vmem:[#allocation3 + $0x58] sm:$0xff]  ;;  %vm4197_vm12 = vmand %vm2619_vm11, %vm2607_vm10 }
 0x134   : > { %v3341_v29 = vpop.f32.mrb[28].mxu1  ;;  %v1425_v41 = vld [vmem:[#allocation3 + $0x48] sm:$0xff] }
 0x135   : > { %v1564_v31 = vld [vmem:[#allocation3 + $0x10] sm:$0xff]  ;;  %v1438_v2 = vadd.f32 %v3341_v29, %v1426_v9  ;;  %v1401_v54 = vpop.f32.mrb[29].mxu1 }
 0x136   : > { %v1576_v56 = vadd.f32 %v3347_v47, %v1564_v31  ;;  %v1562_v57 = vld [vmem:[#allocation3] sm:$0xff]  ;;  %v1568_v30 = vld [vmem:[#allocation3 + $0x30] sm:$0xff]  ;;  %v1436_v13 = vadd.f32 %v1424_v45, %v1401_v54  ;;  %v3342_v58 = vpop.f32.mrb[30].mxu1  ;;  %v2490_v47 = vshrl.u32 %v4140_v17, 4  ;;  %v2643_v17 = vadd.s32 24, %v4163_v15 }
 0x137   : > { %v1574_v59 = vadd.f32 %v1562_v57, %v1515_v51  ;;  %v1565_v25 = vld [vmem:[#allocation3 + $0x18] sm:$0xff]  ;;  %v3351_v62 = vpop.f32.mrb[20].mxu0  ;;  %1450 = vst.msk [vmem:[#allocation3 + $0x50] sm:$0xff] %vm861_vm9, %v1438_v2  ;;  %v1566_v26 = vld [vmem:[#allocation3 + $0x20] sm:$0xff]  ;;  %v1439_v37 = vadd.f32 %v3342_v58, %v1427_v11  ;;  %v1404_v21 = vpop.f32.mrb[31].mxu1  ;;  %v4185_v58 = vadd.s32 40, %v4098_v12 }
 0x138   : > { %1588 = vst.msk [vmem:[#allocation3 + $0x10] sm:$0xff] %vm861_vm9, %v1576_v56  ;;  %v1577_v24 = vadd.f32 %v3348_v20, %v1565_v25  ;;  %v1563_v8 = vld [vmem:[#allocation3 + $0x8] sm:$0xff]  ;;  %v1580_v10 = vadd.f32 %v3351_v62, %v1568_v30  ;;  %v1531_v63 = vpop.f32.mrb[21].mxu0  ;;  %1448 = vst.msk [vmem:[#allocation3 + $0x40] sm:$0xff] %vm861_vm9, %v1436_v13  ;;  %v1569_v39 = vld [vmem:[#allocation3 + $0x38] sm:$0xff]  ;;  %v1437_v23 = vadd.f32 %v1425_v41, %v1404_v21  ;;  %v4171_v20 = vadd.s32 56, %v4098_v12 }
 0x139   : > { %1586 = vst.msk [vmem:[#allocation3] sm:$0xff] %vm861_vm9, %v1574_v59  ;;  %v1575_v14 = vadd.f32 %v1563_v8, %v1518_v6  ;;  %v1578_v35 = vadd.f32 %v1566_v26, %v1531_v63  ;;  %v3352_v40 = vpop.f32.mrb[22].mxu0  ;;  %1451 = vst.msk [vmem:[#allocation3 + $0x58] sm:$0xff] %vm861_vm9, %v1439_v37  ;;  %v1567_v28 = vld [vmem:[#allocation3 + $0x28] sm:$0xff]  ;;  %v4176_v2 = vmul.u32.u64.low 2863311531, %v4167_v18  ;;  %v4177_v54 = vmul.u32.u64.high 2863311531, %v4167_v18, %v4176_v2 }
 0x13a   : > { %1589 = vst.msk [vmem:[#allocation3 + $0x18] sm:$0xff] %vm861_vm9, %v1577_v24  ;;  %1592 = vst.msk [vmem:[#allocation3 + $0x30] sm:$0xff] %vm861_vm9, %v1580_v10  ;;  %v1581_v27 = vadd.f32 %v3352_v40, %v1569_v39  ;;  %v1534_v32 = vpop.f32.mrb[23].mxu0  ;;  %v4182_v13 = vsub.s32 %v4098_v12, %v2480_v3  ;;  %v2545_v59 = vshrl.u32 %v4159_v42, 4  ;;  %v4208_v10 = vsub.s32 %v4119_v50, %v2513_v7 }
 0x13b   : > { %1449 = vst.msk [vmem:[#allocation3 + $0x48] sm:$0xff] %vm861_vm9, %v1437_v23  ;;  %1587 = vst.msk [vmem:[#allocation3 + $0x8] sm:$0xff] %vm861_vm9, %v1575_v14  ;;  %v1579_v36 = vadd.f32 %v1567_v28, %v1534_v32  ;;  %v4202_v37 = vmul.u32.u64.low 2863311531, %v4171_v20  ;;  %v4203_v21 = vmul.u32.u64.high 2863311531, %v4171_v20, %v4202_v37  ;;  %v2491_v63 = vmul.u32 24, %v2490_v47 }
 0x13c   : > { %1590 = vst.msk [vmem:[#allocation3 + $0x20] sm:$0xff] %vm861_vm9, %v1578_v35  ;;  %1593 = vst.msk [vmem:[#allocation3 + $0x38] sm:$0xff] %vm861_vm9, %v1581_v27  ;;  %v3361_v44 = vpop.f32.mrb[32].mxu1  ;;  %vm2605_vm13 = vcmp.ne.s32.totalorder %v4182_v13, 0  ;;  %v4212_v14 = vmul.u32.u64.low 2863311531, %v4185_v58  ;;  %v4213_v35 = vmul.u32.u64.high 2863311531, %v4185_v58, %v4212_v14  ;;  %v4219_v50 = vsel %vm4197_vm12, %v2643_v17, %v4163_v15 }
 0x13d   : > { %1591 = vst.msk [vmem:[#allocation3 + $0x28] sm:$0xff] %vm861_vm9, %v1579_v36  ;;  %v1715_v53 = vpop.f32.mrb[33].mxu1  ;;  %v2546_v60 = vmul.u32 24, %v2545_v59  ;;  %v4222_v36 = vadd.s32 80, %v4098_v12  ;;  %vm2617_vm14 = vcmp.lt.s32.totalorder %v4182_v13, 0  ;;  %v2641_v42 = vadd.s32 24, %v4182_v13 }
 0x13e   : > { %v1572_v5 = vld [vmem:[#allocation3 + $0x50] sm:$0xff]  ;;  %v3362_v48 = vpop.f32.mrb[34].mxu1  ;;  %vm2608_vm15 = vcmp.ne.s32.totalorder %v4208_v10, 0  ;;  %vm2620_vm0 = vcmp.lt.s32.totalorder %v4208_v10, 0  ;;  %v4234_v15 = vsub.s32 %v4131_v16, %v2491_v63  ;;  %vm2667_vm1 = vcmp.ge.s32.totalorder %v4219_v50, 1  ;;  %vm4255_vm3 = vmand %vm2617_vm14, %vm2605_vm13 }
 0x13f   : > { %v3355_v0 = vpop.f32.mrb[24].mxu0  ;;  %v1570_v61 = vld [vmem:[#allocation3 + $0x40] sm:$0xff]  ;;  %v1764_v34 = vld [vmem:[#allocation3 + $0x10] sm:$0xff]  ;;  %v1718_v51 = vpop.f32.mrb[35].mxu1  ;;  %vm2679_vm2 = vcmp.le.s32.totalorder %v4219_v50, 16  ;;  %v4244_v7 = vsub.s32 %v4144_v33, %v2546_v60  ;;  %v2556_v33 = vshrl.u32 %v4203_v21, 4  ;;  %vm4288_vm7 = vmand %vm2620_vm0, %vm2608_vm15 }
 0x140   : > { %v1584_v4 = vadd.f32 %v3355_v0, %v1572_v5  ;;  %v1547_v6 = vpop.f32.mrb[25].mxu0  ;;  %v1776_v1 = vadd.f32 %v3361_v44, %v1764_v34  ;;  %v1573_v43 = vld [vmem:[#allocation3 + $0x58] sm:$0xff]  ;;  %v1762_v19 = vld [vmem:[#allocation3] sm:$0xff]  ;;  %v4228_v44 = vadd.s32 64, %v4098_v12  ;;  %vm2606_vm4 = vcmp.ne.s32.totalorder %v4234_v15, 0  ;;  %vm4312_vm10 = vmand %vm2667_vm1, %vm2679_vm2 }
 0x141   : > { %v1582_v52 = vadd.f32 %v1570_v61, %v1547_v6  ;;  %v3356_v29 = vpop.f32.mrb[26].mxu0  ;;  %v1774_v9 = vadd.f32 %v1762_v19, %v1715_v53  ;;  %v1765_v31 = vld [vmem:[#allocation3 + $0x18] sm:$0xff]  ;;  %v1768_v62 = vld [vmem:[#allocation3 + $0x30] sm:$0xff]  ;;  %v4241_v61 = vadd.s32 24, %v4208_v10  ;;  %v2534_v17 = vshrl.u32 %v4213_v35, 4 }
 0x142   : > { %v1571_v49 = vld [vmem:[#allocation3 + $0x48] sm:$0xff]  ;;  %1596 = vst.msk [vmem:[#allocation3 + $0x50] sm:$0xff] %vm861_vm9, %v1584_v4  ;;  %1788 = vst.msk [vmem:[#allocation3 + $0x10] sm:$0xff] %vm861_vm9, %v1776_v1  ;;  %v1585_v45 = vadd.f32 %v3356_v29, %v1573_v43  ;;  %v1550_v56 = vpop.f32.mrb[27].mxu0  ;;  %v1777_v57 = vadd.f32 %v3362_v48, %v1765_v31  ;;  %v2523_v48 = vshrl.u32 %v4177_v54, 4  ;;  %v4272_v59 = vadd.s32 72, %v4098_v12 }
 0x143   : > { %v1763_v30 = vld [vmem:[#allocation3 + $0x8] sm:$0xff]  ;;  %1594 = vst.msk [vmem:[#allocation3 + $0x40] sm:$0xff] %vm861_vm9, %v1582_v52  ;;  %1786 = vst.msk [vmem:[#allocation3] sm:$0xff] %vm861_vm9, %v1774_v9  ;;  %v1583_v11 = vadd.f32 %v1571_v49, %v1550_v56  ;;  %v1766_v8 = vld [vmem:[#allocation3 + $0x20] sm:$0xff]  ;;  %v4247_v16 = vmul.u32.u64.low 2863311531, %v4222_v36  ;;  %v4248_v4 = vmul.u32.u64.high 2863311531, %v4222_v36, %v4247_v16 }
 0x144   : > { %v1775_v55 = vadd.f32 %v1763_v30, %v1718_v51  ;;  %1597 = vst.msk [vmem:[#allocation3 + $0x58] sm:$0xff] %vm861_vm9, %v1585_v45  ;;  %1789 = vst.msk [vmem:[#allocation3 + $0x18] sm:$0xff] %vm861_vm9, %v1777_v57  ;;  %v3365_v25 = vpop.f32.mrb[36].mxu1  ;;  %v1769_v22 = vld [vmem:[#allocation3 + $0x38] sm:$0xff]  ;;  %v1767_v32 = vld [vmem:[#allocation3 + $0x28] sm:$0xff]  ;;  %v2524_v45 = vmul.u32 24, %v2523_v48 }
 0x145   : > { %1595 = vst.msk [vmem:[#allocation3 + $0x48] sm:$0xff] %vm861_vm9, %v1583_v11  ;;  %v1780_v41 = vadd.f32 %v3365_v25, %v1768_v62  ;;  %v1731_v24 = vpop.f32.mrb[37].mxu1  ;;  %v4261_v29 = vmul.u32.u64.low 2863311531, %v4228_v44  ;;  %v4262_v9 = vmul.u32.u64.high 2863311531, %v4228_v44, %v4261_v29  ;;  %v4266_v56 = vadd.s32 88, %v4098_v12 }
 0x146   : > { %1787 = vst.msk [vmem:[#allocation3 + $0x8] sm:$0xff] %vm861_vm9, %v1775_v55  ;;  %v1778_v39 = vadd.f32 %v1766_v8, %v1731_v24  ;;  %v3366_v23 = vpop.f32.mrb[38].mxu1  ;;  %vm2618_vm5 = vcmp.lt.s32.totalorder %v4234_v15, 0  ;;  %vm2611_vm6 = vcmp.ne.s32.totalorder %v4244_v7, 0  ;;  %vm2623_vm8 = vcmp.lt.s32.totalorder %v4244_v7, 0 }
 0x147   : > { %v3375_v40 = vpop.f32.mrb[28].mxu0  ;;  %1792 = vst.msk [vmem:[#allocation3 + $0x30] sm:$0xff] %vm861_vm9, %v1780_v41  ;;  %v1781_v28 = vadd.f32 %v3366_v23, %v1769_v22  ;;  %v1734_v27 = vpop.f32.mrb[39].mxu1  ;;  %v4279_v41 = vsel %vm4255_vm3, %v2641_v42, %v4182_v13  ;;  %v2557_v13 = vmul.u32 24, %v2556_v33  ;;  %v4295_v35 = vsub.s32 %v4167_v18, %v2524_v45  ;;  %vm4331_vm13 = vmand %vm2618_vm5, %vm2606_vm4 }
 0x148   : > { %v1924_v38 = vpop.f32.mrb[29].mxu0  ;;  %1790 = vst.msk [vmem:[#allocation3 + $0x20] sm:$0xff] %vm861_vm9, %v1778_v39  ;;  %v1779_v46 = vadd.f32 %v1767_v32, %v1734_v27  ;;  %v2535_v60 = vmul.u32 24, %v2534_v17  ;;  %v2589_v48 = vshrl.u32 %v4248_v4, 4  ;;  %vm2665_vm11 = vcmp.ge.s32.totalorder %v4279_v41, 1  ;;  %vm4341_vm14 = vmand %vm2623_vm8, %vm2611_vm6 }
 0x149   : > { %v1973_v53 = vld [vmem:[#allocation3 + $0x10] sm:$0xff]  ;;  %v3376_v5 = vpop.f32.mrb[30].mxu0  ;;  %1793 = vst.msk [vmem:[#allocation3 + $0x38] sm:$0xff] %vm861_vm9, %v1781_v28  ;;  %vm2677_vm12 = vcmp.le.s32.totalorder %v4279_v41, 16  ;;  %vm2609_vm15 = vcmp.ne.s32.totalorder %v4295_v35, 0  ;;  %vm2621_vm0 = vcmp.lt.s32.totalorder %v4295_v35, 0  ;;  %v4348_v16 = vsub.s32 %v4171_v20, %v2557_v13 }
 0x14a   : > { %v1985_v3 = vadd.f32 %v3375_v40, %v1973_v53  ;;  %v1971_v47 = vld [vmem:[#allocation3] sm:$0xff]  ;;  %v1927_v0 = vpop.f32.mrb[31].mxu0  ;;  %1791 = vst.msk [vmem:[#allocation3 + $0x28] sm:$0xff] %vm861_vm9, %v1779_v46  ;;  %v1772_v19 = vld [vmem:[#allocation3 + $0x50] sm:$0xff]  ;;  %v4298_v40 = vmul.u32.u64.low 2863311531, %v4266_v56  ;;  %v4299_v28 = vmul.u32.u64.high 2863311531, %v4266_v56, %v4298_v40  ;;  %v4320_v53 = vsel %vm4288_vm7, %v4241_v61, %v4208_v10  ;;  %vm4376_vm2 = vmand %vm2621_vm0, %vm2609_vm15 }
 0x14b   : > { %v1983_v34 = vadd.f32 %v1971_v47, %v1924_v38  ;;  %v1974_v51 = vld [vmem:[#allocation3 + $0x18] sm:$0xff]  ;;  %v1770_v54 = vld [vmem:[#allocation3 + $0x40] sm:$0xff]  ;;  %v4304_v38 = vmul.u32.u64.low 2863311531, %v4272_v59  ;;  %v4305_v46 = vmul.u32.u64.high 2863311531, %v4272_v59, %v4304_v38  ;;  %v2647_v10 = vadd.s32 24, %v4244_v7 }
 0x14c   : > { %1997 = vst.msk [vmem:[#allocation3 + $0x10] sm:$0xff] %vm861_vm9, %v1985_v3  ;;  %v1986_v6 = vadd.f32 %v3376_v5, %v1974_v51  ;;  %v3369_v43 = vpop.f32.mrb[40].mxu1  ;;  %v1773_v55 = vld [vmem:[#allocation3 + $0x58] sm:$0xff]  ;;  %v1771_v21 = vld [vmem:[#allocation3 + $0x48] sm:$0xff]  ;;  %v2642_v5 = vadd.s32 24, %v4234_v15  ;;  %vm2668_vm1 = vcmp.ge.s32.totalorder %v4320_v53, 1  ;;  %v4357_v33 = vsub.s32 %v4185_v58, %v2535_v60 }
 0x14d   : > { %v1972_v1 = vld [vmem:[#allocation3 + $0x8] sm:$0xff]  ;;  %1995 = vst.msk [vmem:[#allocation3] sm:$0xff] %vm861_vm9, %v1983_v34  ;;  %v1784_v31 = vadd.f32 %v3369_v43, %v1772_v19  ;;  %v1747_v2 = vpop.f32.mrb[41].mxu1  ;;  %v3542_v19 = vmov 0.0   ;;  %v2645_v45 = vadd.s32 24, %v4295_v35  ;;  %v4370_v17 = vsel %vm4341_vm14, %v2647_v10, %v4244_v7 }
 0x14e   : > { %v1984_v49 = vadd.f32 %v1972_v1, %v1927_v0  ;;  %1998 = vst.msk [vmem:[#allocation3 + $0x18] sm:$0xff] %vm861_vm9, %v1986_v6  ;;  %v1977_v57 = vld [vmem:[#allocation3 + $0x30] sm:$0xff]  ;;  %v1782_v30 = vadd.f32 %v1770_v54, %v1747_v2  ;;  %v3370_v11 = vpop.f32.mrb[42].mxu1  ;;  %v4353_v52 = vsel %vm4312_vm10, 1.0, %v3542_v19  ;;  %v4363_v54 = vsel %vm4331_vm13, %v2642_v5, %v4234_v15 }
 0x14f   : > { %v3379_v25 = vpop.f32.mrb[32].mxu0  ;;  %1796 = vst.msk [vmem:[#allocation3 + $0x50] sm:$0xff] %vm861_vm9, %v1784_v31  ;;  %v1975_v62 = vld [vmem:[#allocation3 + $0x20] sm:$0xff]  ;;  %v1785_v26 = vadd.f32 %v3370_v11, %v1773_v55  ;;  %v1750_v37 = vpop.f32.mrb[43].mxu1  ;;  %vm2612_vm3 = vcmp.ne.s32.totalorder %v4348_v16, 0  ;;  %vm2624_vm4 = vcmp.lt.s32.totalorder %v4348_v16, 0 }
 0x150   : > { %1996 = vst.msk [vmem:[#allocation3 + $0x8] sm:$0xff] %vm861_vm9, %v1984_v49  ;;  %v1989_v12 = vadd.f32 %v3379_v25, %v1977_v57  ;;  %v1940_v24 = vpop.f32.mrb[33].mxu0  ;;  %1794 = vst.msk [vmem:[#allocation3 + $0x40] sm:$0xff] %vm861_vm9, %v1782_v30  ;;  %v1978_v8 = vld [vmem:[#allocation3 + $0x38] sm:$0xff]  ;;  %v1783_v63 = vadd.f32 %v1771_v21, %v1750_v37  ;;  %v2590_v57 = vmul.u32 24, %v2589_v48  ;;  %v2567_v25 = vshrl.u32 %v4262_v9, 4 }
 0x151   : > { %v1987_v23 = vadd.f32 %v1975_v62, %v1940_v24  ;;  %v3380_v22 = vpop.f32.mrb[34].mxu0  ;;  %1797 = vst.msk [vmem:[#allocation3 + $0x58] sm:$0xff] %vm861_vm9, %v1785_v26  ;;  %v1976_v14 = vld [vmem:[#allocation3 + $0x28] sm:$0xff]  ;;  %v2600_v7 = vshrl.u32 %v4299_v28, 4  ;;  %vm2610_vm5 = vcmp.ne.s32.totalorder %v4357_v33, 0  ;;  %vm2622_vm6 = vcmp.lt.s32.totalorder %v4357_v33, 0  ;;  %vm4407_vm10 = vmand %vm2624_vm4, %vm2612_vm3 }
 0x152   : > { %2001 = vst.msk [vmem:[#allocation3 + $0x30] sm:$0xff] %vm861_vm9, %v1989_v12  ;;  %v1990_v27 = vadd.f32 %v3380_v22, %v1978_v8  ;;  %v1943_v32 = vpop.f32.mrb[35].mxu0  ;;  %1795 = vst.msk [vmem:[#allocation3 + $0x48] sm:$0xff] %vm861_vm9, %v1783_v63  ;;  %v2578_v9 = vshrl.u32 %v4305_v46, 4  ;;  %v4394_v8 = vsel %vm4376_vm2, %v2645_v45, %v4295_v35  ;;  %v2648_v63 = vadd.s32 24, %v4348_v16 }
 0x153   : > { %1999 = vst.msk [vmem:[#allocation3 + $0x20] sm:$0xff] %vm861_vm9, %v1987_v23  ;;  %v1988_v42 = vadd.f32 %v1976_v14, %v1943_v32  ;;  %v2140_v47 = vld [vmem:[#allocation3 + $0x10] sm:$0xff]  ;;  %v4398_v39 = vsub.s32 %v4222_v36, %v2590_v57  ;;  %vm2680_vm7 = vcmp.le.s32.totalorder %v4320_v53, 16  ;;  %vm2666_vm8 = vcmp.ge.s32.totalorder %v4363_v54, 1  ;;  %vm4419_vm15 = vmand %vm2622_vm6, %vm2610_vm5 }
 0x154   : > { %2002 = vst.msk [vmem:[#allocation3 + $0x38] sm:$0xff] %vm861_vm9, %v1990_v27  ;;  %v3389_v3 = vpop.f32.mrb[44].mxu1  ;;  %v2138_v34 = vld [vmem:[#allocation3] sm:$0xff]  ;;  %v2646_v14 = vadd.s32 24, %v4357_v33  ;;  %v2568_v36 = vmul.u32 24, %v2567_v25  ;;  %vm2678_vm13 = vcmp.le.s32.totalorder %v4363_v54, 16  ;;  %vm4430_vm3 = vmand %vm2665_vm11, %vm2677_vm12 }
 0x155   : > { %2000 = vst.msk [vmem:[#allocation3 + $0x28] sm:$0xff] %vm861_vm9, %v1988_v42  ;;  %v2152_v0 = vadd.f32 %v3389_v3, %v2140_v47  ;;  %v2091_v61 = vpop.f32.mrb[45].mxu1  ;;  %v2141_v43 = vld [vmem:[#allocation3 + $0x18] sm:$0xff]  ;;  %vm2671_vm14 = vcmp.ge.s32.totalorder %v4370_v17, 1  ;;  %v2601_v32 = vmul.u32 24, %v2600_v7  ;;  %vm2683_vm0 = vcmp.le.s32.totalorder %v4370_v17, 16  ;;  %vm4444_vm11 = vmand %vm2668_vm1, %vm2680_vm7 }
 0x156   : > { %v1981_v4 = vld [vmem:[#allocation3 + $0x50] sm:$0xff]  ;;  %v2150_v6 = vadd.f32 %v2138_v34, %v2091_v61  ;;  %v3390_v1 = vpop.f32.mrb[46].mxu1  ;;  %vm2669_vm2 = vcmp.ge.s32.totalorder %v4394_v8, 1  ;;  %v2579_v18 = vmul.u32 24, %v2578_v9  ;;  %vm2615_vm4 = vcmp.ne.s32.totalorder %v4398_v39, 0  ;;  %vm4459_vm1 = vmand %vm2666_vm8, %vm2678_vm13 }
 0x157   : > { %v3383_v29 = vpop.f32.mrb[36].mxu0  ;;  %v1979_v49 = vld [vmem:[#allocation3 + $0x40] sm:$0xff]  ;;  %2164 = vst.msk [vmem:[#allocation3 + $0x10] sm:$0xff] %vm861_vm9, %v2152_v0  ;;  %v2153_v20 = vadd.f32 %v3390_v1, %v2141_v43  ;;  %v2094_v31 = vpop.f32.mrb[47].mxu1  ;;  %v2139_v2 = vld [vmem:[#allocation3 + $0x8] sm:$0xff]  ;;  %v2660_v0 = vsel %vm4407_vm10, %v2648_v63, %v4348_v16  ;;  %vm2627_vm5 = vcmp.lt.s32.totalorder %v4398_v39, 0  ;;  %v2658_v16 = vsel %vm4419_vm15, %v2646_v14, %v4357_v33  ;;  %vm4491_vm13 = vmand %vm2671_vm14, %vm2683_vm0 }
 0x158   : > { %v1993_v30 = vadd.f32 %v3383_v29, %v1981_v4  ;;  %v1956_v11 = vpop.f32.mrb[37].mxu0  ;;  %v1982_v55 = vld [vmem:[#allocation3 + $0x58] sm:$0xff]  ;;  %2162 = vst.msk [vmem:[#allocation3] sm:$0xff] %vm861_vm9, %v2150_v6  ;;  %v2151_v58 = vadd.f32 %v2139_v2, %v2094_v31  ;;  %v4452_v6 = vsub.s32 %v4228_v44, %v2568_v36  ;;  %vm2447_vm12 = vcmask 257024   ;;  %vm4474_vm8 = vmand %vm2627_vm5, %vm2615_vm4 }
 0x159   : > { %v1991_v62 = vadd.f32 %v1979_v49, %v1956_v11  ;;  %v3384_v26 = vpop.f32.mrb[38].mxu0  ;;  %v1980_v37 = vld [vmem:[#allocation3 + $0x48] sm:$0xff]  ;;  %2165 = vst.msk [vmem:[#allocation3 + $0x18] sm:$0xff] %vm861_vm9, %v2153_v20  ;;  %v2144_v23 = vld [vmem:[#allocation3 + $0x30] sm:$0xff]  ;;  %vm2681_vm6 = vcmp.le.s32.totalorder %v4394_v8, 16  ;;  %v2651_v33 = vadd.s32 24, %v4398_v39  ;;  %v4466_v44 = vsub.s32 %v4266_v56, %v2601_v32 }
 0x15a   : > { %2005 = vst.msk [vmem:[#allocation3 + $0x50] sm:$0xff] %vm861_vm9, %v1993_v30  ;;  %v1994_v21 = vadd.f32 %v3384_v26, %v1982_v55  ;;  %v1959_v12 = vpop.f32.mrb[39].mxu0  ;;  %2163 = vst.msk [vmem:[#allocation3 + $0x8] sm:$0xff] %vm861_vm9, %v2151_v58  ;;  %v2142_v28 = vld [vmem:[#allocation3 + $0x20] sm:$0xff]  ;;  %vm2672_vm7 = vcmp.ge.s32.totalorder %v2660_v0, 1  ;;  %vm2684_vm10 = vcmp.le.s32.totalorder %v2660_v0, 16  ;;  %v4479_v2 = vsub.s32 %v4272_v59, %v2579_v18 }
 0x15b   : > { %2003 = vst.msk [vmem:[#allocation3 + $0x40] sm:$0xff] %vm861_vm9, %v1991_v62  ;;  %v1992_v24 = vadd.f32 %v1980_v37, %v1959_v12  ;;  %v2145_v42 = vld [vmem:[#allocation3 + $0x38] sm:$0xff]  ;;  %v4485_v56 = vsel %vm4430_vm3, 1.0, %v3542_v19  ;;  %vm2670_vm15 = vcmp.ge.s32.totalorder %v2658_v16, 1  ;;  %vm2682_vm4 = vcmp.le.s32.totalorder %v2658_v16, 16  ;;  %vm4510_vm14 = vmand %vm2669_vm2, %vm2681_vm6 }
 0x15c   : > { %2006 = vst.msk [vmem:[#allocation3 + $0x58] sm:$0xff] %vm861_vm9, %v1994_v21  ;;  %v3393_v13 = vpop.f32.mrb[48].mxu1  ;;  %v2143_v10 = vld [vmem:[#allocation3 + $0x28] sm:$0xff]  ;;  %v4499_v59 = vsel %vm4444_vm11, 1.0, %v3542_v19  ;;  %v4504_v57 = vsel %vm4459_vm1, 1.0, %v3542_v19  ;;  %vm2613_vm0 = vcmp.ne.s32.totalorder %v4452_v6, 0  ;;  %vm4519_vm5 = vmand %vm2672_vm7, %vm2684_vm10  ;;  %v4526_v62 = vsel %vm4474_vm8, %v2651_v33, %v4398_v39 }
 0x15d   : > { %2004 = vst.msk [vmem:[#allocation3 + $0x48] sm:$0xff] %vm861_vm9, %v1992_v24  ;;  %v2156_v35 = vadd.f32 %v3393_v13, %v2144_v23  ;;  %v2107_v40 = vpop.f32.mrb[49].mxu1  ;;  %vm2625_vm3 = vcmp.lt.s32.totalorder %v4452_v6, 0  ;;  %vm2616_vm2 = vcmp.ne.s32.totalorder %v4466_v44, 0  ;;  %vm2628_vm11 = vcmp.lt.s32.totalorder %v4466_v44, 0  ;;  %vm4532_vm1 = vmand %vm2670_vm15, %vm2682_vm4 }
 0x15e   : > { %v2349_v60 = vld [vmem:[#allocation3 + $0x10] sm:$0xff]  ;;  %v2154_v38 = vadd.f32 %v2142_v28, %v2107_v40  ;;  %v3394_v46 = vpop.f32.mrb[50].mxu1  ;;  %v2649_v9 = vadd.s32 24, %v4452_v6  ;;  %vm2614_vm6 = vcmp.ne.s32.totalorder %v4479_v2, 0  ;;  %vm2626_vm7 = vcmp.lt.s32.totalorder %v4479_v2, 0  ;;  %vm4549_vm10 = vmand %vm2625_vm3, %vm2613_vm0 }
 0x15f   : > { %v3403_v5 = vpop.f32.mrb[40].mxu0  ;;  %2168 = vst.msk [vmem:[#allocation3 + $0x30] sm:$0xff] %vm861_vm9, %v2156_v35  ;;  %v2347_v48 = vld [vmem:[#allocation3] sm:$0xff]  ;;  %v2157_v47 = vadd.f32 %v3394_v46, %v2145_v42  ;;  %v2110_v50 = vpop.f32.mrb[51].mxu1  ;;  %v4542_v8 = vsel %vm4491_vm13, 1.0, %v3542_v19  ;;  %v2652_v14 = vadd.s32 24, %v4466_v44  ;;  %vm4564_vm8 = vmand %vm2628_vm11, %vm2616_vm2 }
 0x160   : > { %v2361_v61 = vadd.f32 %v3403_v5, %v2349_v60  ;;  %v2300_v34 = vpop.f32.mrb[41].mxu0  ;;  %2166 = vst.msk [vmem:[#allocation3 + $0x20] sm:$0xff] %vm861_vm9, %v2154_v38  ;;  %v2350_v41 = vld [vmem:[#allocation3 + $0x18] sm:$0xff]  ;;  %v2155_v4 = vadd.f32 %v2143_v10, %v2110_v50  ;;  %v4557_v40 = vsel %vm4510_vm14, 1.0, %v3542_v19  ;;  %v2650_v60 = vadd.s32 24, %v4479_v2  ;;  %vm4588_vm4 = vmand %vm2626_vm7, %vm2614_vm6 }
 0x161   : > { %v2359_v1 = vadd.f32 %v2347_v48, %v2300_v34  ;;  %v3404_v43 = vpop.f32.mrb[42].mxu0  ;;  %2169 = vst.msk [vmem:[#allocation3 + $0x38] sm:$0xff] %vm861_vm9, %v2157_v47  ;;  %v2348_v29 = vld [vmem:[#allocation3 + $0x8] sm:$0xff]  ;;  %v2148_v11 = vld [vmem:[#allocation3 + $0x50] sm:$0xff]  ;;  %v4579_v18 = vsel %vm4519_vm5, 1.0, %v3542_v19  ;;  %vm2675_vm13 = vcmp.ge.s32.totalorder %v4526_v62, 1 }
 0x162   : > { %2373 = vst.msk [vmem:[#allocation3 + $0x10] sm:$0xff] %vm861_vm9, %v2361_v61  ;;  %v2362_v49 = vadd.f32 %v3404_v43, %v2350_v41  ;;  %v2303_v20 = vpop.f32.mrb[43].mxu0  ;;  %2167 = vst.msk [vmem:[#allocation3 + $0x28] sm:$0xff] %vm861_vm9, %v2155_v4  ;;  %v2146_v15 = vld [vmem:[#allocation3 + $0x40] sm:$0xff]  ;;  %vm2687_vm15 = vcmp.le.s32.totalorder %v4526_v62, 16  ;;  %v4598_v61 = vsel %vm4549_vm10, %v2649_v9, %v4452_v6  ;;  %v4605_v4 = vsel %vm4564_vm8, %v2652_v14, %v4466_v44 }
 0x163   : > { %2371 = vst.msk [vmem:[#allocation3] sm:$0xff] %vm861_vm9, %v2359_v1  ;;  %v2360_v54 = vadd.f32 %v2348_v29, %v2303_v20  ;;  %v2149_v21 = vld [vmem:[#allocation3 + $0x58] sm:$0xff]  ;;  %v4613_v6 = vsel %vm4532_vm1, 1.0, %v3542_v19  ;;  %v4618_v29 = vsel %vm4588_vm4, %v2650_v60, %v4479_v2  ;;  %vm2673_vm14 = vcmp.ge.s32.totalorder %v4598_v61, 1  ;;  %vm4651_vm11 = vmand %vm2675_vm13, %vm2687_vm15 }
 0x164   : > { %2374 = vst.msk [vmem:[#allocation3 + $0x18] sm:$0xff] %vm861_vm9, %v2362_v49  ;;  %v3397_v30 = vpop.f32.mrb[52].mxu1  ;;  %v2147_v23 = vld [vmem:[#allocation3 + $0x48] sm:$0xff]  ;;  %vm2685_vm0 = vcmp.le.s32.totalorder %v4598_v61, 16  ;;  %vm2676_vm3 = vcmp.ge.s32.totalorder %v4605_v4, 1  ;;  %vm2688_vm5 = vcmp.le.s32.totalorder %v4605_v4, 16 }
 0x165   : > { %2372 = vst.msk [vmem:[#allocation3 + $0x8] sm:$0xff] %vm861_vm9, %v2360_v54  ;;  %v2160_v58 = vadd.f32 %v3397_v30, %v2148_v11  ;;  %v2123_v17 = vpop.f32.mrb[53].mxu1  ;;  %vm2674_vm2 = vcmp.ge.s32.totalorder %v4618_v29, 1  ;;  %vm2686_vm1 = vcmp.le.s32.totalorder %v4618_v29, 16  ;;  %vm2697_vm6 = vmand %vm2673_vm14, %vm2685_vm0 }
 0x166   : > { %v2353_v26 = vld [vmem:[#allocation3 + $0x30] sm:$0xff]  ;;  %v2158_v37 = vadd.f32 %v2146_v15, %v2123_v17  ;;  %v3398_v7 = vpop.f32.mrb[54].mxu1  ;;  %vm2700_vm7 = vmand %vm2676_vm3, %vm2688_vm5  ;;  %v3204_v61 = vsel %vm2697_vm6, 1.0, %v3542_v19 }
 0x167   : > { %v3407_v24 = vpop.f32.mrb[44].mxu0  ;;  %2172 = vst.msk [vmem:[#allocation3 + $0x50] sm:$0xff] %vm861_vm9, %v2160_v58  ;;  %v2351_v63 = vld [vmem:[#allocation3 + $0x20] sm:$0xff]  ;;  %v2161_v39 = vadd.f32 %v3398_v7, %v2149_v21  ;;  %v2126_v13 = vpop.f32.mrb[55].mxu1  ;;  %vm2698_vm10 = vmand %vm2674_vm2, %vm2686_vm1 }
 0x168   : > { %v2365_v36 = vadd.f32 %v3407_v24, %v2353_v26  ;;  %v2316_v35 = vpop.f32.mrb[45].mxu0  ;;  %2170 = vst.msk [vmem:[#allocation3 + $0x40] sm:$0xff] %vm861_vm9, %v2158_v37  ;;  %v2354_v28 = vld [vmem:[#allocation3 + $0x38] sm:$0xff]  ;;  %v2159_v27 = vadd.f32 %v2147_v23, %v2126_v13 }
 0x169   : > { %v2385_v38 = vld [vmem:[#allocation3 + $0x10] sm:$0xff]  ;;  %v2363_v46 = vadd.f32 %v2351_v63, %v2316_v35  ;;  %v3408_v42 = vpop.f32.mrb[46].mxu0  ;;  %2173 = vst.msk [vmem:[#allocation3 + $0x58] sm:$0xff] %vm861_vm9, %v2161_v39  ;;  %v2352_v5 = vld [vmem:[#allocation3 + $0x28] sm:$0xff] }
 0x16a   : > { %v3214_v3 = vpack.c.bf16 %v2385_v38, %v2385_v38  ;;  %v2727_v47 = vmul.f32 %v4353_v52, %v2385_v38  ;;  %v2383_v50 = vld [vmem:[#allocation3] sm:$0xff]  ;;  %2377 = vst.msk [vmem:[#allocation3 + $0x30] sm:$0xff] %vm861_vm9, %v2365_v36  ;;  %v2366_v10 = vadd.f32 %v3408_v42, %v2354_v28  ;;  %v2319_v0 = vpop.f32.mrb[47].mxu0  ;;  %2171 = vst.msk [vmem:[#allocation3 + $0x48] sm:$0xff] %vm861_vm9, %v2159_v27 }
 0x16b   : > { %v3212_v34 = vpack.c.bf16 %v2383_v50, %v2383_v50  ;;  %v2725_v41 = vmul.f32 %v4485_v56, %v2383_v50  ;;  %v2386_v51 = vld [vmem:[#allocation3 + $0x18] sm:$0xff]  ;;  %2375 = vst.msk [vmem:[#allocation3 + $0x20] sm:$0xff] %vm861_vm9, %v2363_v46  ;;  %v2364_v52 = vadd.f32 %v2352_v5, %v2319_v0 }
 0x16c   : > { %2450 = vst.msk [vmem:[%s4574_s14 + $0x8] sm:$0xf] %vm2447_vm12, %v3214_v3  ;;  %v2770_v16 = vmul.f32 %v2727_v47, %v2385_v38  ;;  %v3215_v1 = vpack.c.bf16 %v2386_v51, %v2386_v51  ;;  %v2384_v43 = vld [vmem:[#allocation3 + $0x8] sm:$0xff]  ;;  %v2728_v33 = vmul.f32 %v4499_v59, %v2386_v51  ;;  %v2740_v59 = vsel %vm861_vm9, %v2727_v47, 0.0 }
 0x16d   : > { %2378 = vst.msk [vmem:[#allocation3 + $0x38] sm:$0xff] %vm861_vm9, %v2366_v10  ;;  %v2768_v53 = vmul.f32 %v2725_v41, %v2383_v50  ;;  %v3213_v44 = vpack.c.bf16 %v2384_v43, %v2384_v43  ;;  %v2726_v49 = vmul.f32 %v4504_v57, %v2384_v43  ;;  %2376 = vst.msk [vmem:[#allocation3 + $0x28] sm:$0xff] %vm861_vm9, %v2364_v52  ;;  %v2737_v31 = vsel %vm861_vm9, %v2725_v41, 0.0 }
 0x16e   : > { %2448 = vst.msk [vmem:[%s4574_s14] sm:$0xf] %vm2447_vm12, %v3212_v34  ;;  %2451 = vst.msk [vmem:[%s4574_s14 + $0xc] sm:$0xf] %vm2447_vm12, %v3215_v1  ;;  %v2357_v20 = vld [vmem:[#allocation3 + $0x50] sm:$0xff]  ;;  %v2783_v57 = vsel %vm861_vm9, %v2770_v16, 0.0  ;;  %v2771_v15 = vmul.f32 %v2728_v33, %v2386_v51 }
 0x16f   : > { %2449 = vst.msk [vmem:[%s4574_s14 + $0x4] sm:$0xf] %vm2447_vm12, %v3213_v44  ;;  %v2738_v2 = vsel %vm861_vm9, %v2726_v49, 0.0  ;;  %v2769_v56 = vmul.f32 %v2726_v49, %v2384_v43  ;;  %v3411_v54 = vpop.f32.mrb[48].mxu0  ;;  %v2355_v45 = vld [vmem:[#allocation3 + $0x40] sm:$0xff]  ;;  %v2780_v17 = vsel %vm861_vm9, %v2768_v53, 0.0 }
 0x170   : > { %v2739_v30 = vadd.f32 %v2738_v2, %v2737_v31  ;;  %v2369_v11 = vadd.f32 %v3411_v54, %v2357_v20  ;;  %v2332_v55 = vpop.f32.mrb[49].mxu0  ;;  %v2358_v58 = vld [vmem:[#allocation3 + $0x58] sm:$0xff]  ;;  %v2742_v12 = vsel %vm861_vm9, %v2728_v33, 0.0  ;;  %v3207_v52 = vsel %vm2700_vm7, 1.0, %v3542_v19 }
 0x171   : > { %v2781_v25 = vsel %vm861_vm9, %v2769_v56, 0.0  ;;  %v2389_v26 = vld [vmem:[#allocation3 + $0x30] sm:$0xff]  ;;  %v2367_v37 = vadd.f32 %v2355_v45, %v2332_v55  ;;  %v3412_v7 = vpop.f32.mrb[50].mxu0  ;;  %v2356_v21 = vld [vmem:[#allocation3 + $0x48] sm:$0xff] }
 0x172   : > { %v2741_v9 = vadd.f32 %v2740_v59, %v2739_v30  ;;  %v2782_v24 = vadd.f32 %v2781_v25, %v2780_v17  ;;  %v3218_v63 = vpack.c.bf16 %v2389_v26, %v2389_v26  ;;  %v2387_v39 = vld [vmem:[#allocation3 + $0x20] sm:$0xff]  ;;  %2381 = vst.msk [vmem:[#allocation3 + $0x50] sm:$0xff] %vm861_vm9, %v2369_v11  ;;  %v2335_v13 = vpop.f32.mrb[51].mxu0  ;;  %v2370_v36 = vadd.f32 %v3412_v7, %v2358_v58 }
 0x173   : > { %v3216_v23 = vpack.c.bf16 %v2387_v39, %v2387_v39  ;;  %v2729_v22 = vmul.f32 %v4557_v40, %v2387_v39  ;;  %2379 = vst.msk [vmem:[#allocation3 + $0x40] sm:$0xff] %vm861_vm9, %v2367_v37  ;;  %v2368_v35 = vadd.f32 %v2356_v21, %v2335_v13  ;;  %v2731_v27 = vmul.f32 %v4542_v8, %v2389_v26 }
 0x174   : > { %v2390_v14 = vld [vmem:[#allocation3 + $0x38] sm:$0xff]  ;;  %v2784_v28 = vadd.f32 %v2783_v57, %v2782_v24  ;;  %2454 = vst.msk [vmem:[%s4574_s14 + $0x18] sm:$0xf] %vm2447_vm12, %v3218_v63  ;;  %v2743_v32 = vadd.f32 %v2742_v12, %v2741_v9  ;;  %v2388_v60 = vld [vmem:[#allocation3 + $0x28] sm:$0xff]  ;;  %v2785_v40 = vsel %vm861_vm9, %v2771_v15, 0.0 }
 0x175   : > { %2452 = vst.msk [vmem:[%s4574_s14 + $0x10] sm:$0xf] %vm2447_vm12, %v3216_v23  ;;  %v2744_v46 = vsel %vm861_vm9, %v2729_v22, 0.0  ;;  %v2772_v8 = vmul.f32 %v2729_v22, %v2387_v39  ;;  %v3219_v42 = vpack.c.bf16 %v2390_v14, %v2390_v14  ;;  %v3217_v48 = vpack.c.bf16 %v2388_v60, %v2388_v60 }
 0x176   : > { %2382 = vst.msk [vmem:[#allocation3 + $0x58] sm:$0xff] %vm861_vm9, %v2370_v36  ;;  %2380 = vst.msk [vmem:[#allocation3 + $0x48] sm:$0xff] %vm861_vm9, %v2368_v35  ;;  %v2745_v62 = vadd.f32 %v2744_v46, %v2743_v32  ;;  %v2786_v5 = vadd.f32 %v2785_v40, %v2784_v28  ;;  %v2732_v47 = vmul.f32 %v4579_v18, %v2390_v14  ;;  %v3206_v18 = vsel %vm4651_vm11, 1.0, %v3542_v19 }
 0x177   : > { %v2787_v3 = vsel %vm861_vm9, %v2772_v8, 0.0  ;;  %2455 = vst.msk [vmem:[%s4574_s14 + $0x1c] sm:$0xf] %vm2447_vm12, %v3219_v42  ;;  %v2730_v50 = vmul.f32 %v4613_v6, %v2388_v60  ;;  %v2774_v10 = vmul.f32 %v2731_v27, %v2389_v26  ;;  %2453 = vst.msk [vmem:[%s4574_s14 + $0x14] sm:$0xf] %vm2447_vm12, %v3217_v48  ;;  %v2748_v4 = vsel %vm861_vm9, %v2731_v27, 0.0 }
 0x178   : > { %v2788_v0 = vadd.f32 %v2787_v3, %v2786_v5  ;;  %v3205_v6 = vsel %vm2698_vm10, 1.0, %v3542_v19  ;;  %v2775_v29 = vmul.f32 %v2732_v47, %v2390_v14  ;;  %v2750_v20 = vsel %vm861_vm9, %v2732_v47, 0.0 }
 0x179   : > { %v2746_v34 = vsel %vm861_vm9, %v2730_v50, 0.0  ;;  %v2773_v41 = vmul.f32 %v2730_v50, %v2388_v60  ;;  %v2393_v51 = vld [vmem:[#allocation3 + $0x50] sm:$0xff]  ;;  %v2791_v49 = vsel %vm861_vm9, %v2774_v10, 0.0 }
 0x17a   : > { %v2747_v16 = vadd.f32 %v2746_v34, %v2745_v62  ;;  %v3222_v1 = vpack.c.bf16 %v2393_v51, %v2393_v51  ;;  %v2391_v43 = vld [vmem:[#allocation3 + $0x40] sm:$0xff]  ;;  %v2735_v45 = vmul.f32 %v3206_v18, %v2393_v51  ;;  %v2793_v58 = vsel %vm861_vm9, %v2775_v29, 0.0 }
 0x17b   : > { %v2789_v53 = vsel %vm861_vm9, %v2773_v41, 0.0  ;;  %v3220_v33 = vpack.c.bf16 %v2391_v43, %v2391_v43  ;;  %v2733_v44 = vmul.f32 %v3204_v61, %v2391_v43 }
 0x17c   : > { %v2749_v31 = vadd.f32 %v2748_v4, %v2747_v16  ;;  %v2790_v2 = vadd.f32 %v2789_v53, %v2788_v0  ;;  %2458 = vst.msk [vmem:[%s4574_s14 + $0x28] sm:$0xf] %vm2447_vm12, %v3222_v1  ;;  %v2778_v7 = vmul.f32 %v2735_v45, %v2393_v51  ;;  %v2756_v63 = vsel %vm861_vm9, %v2735_v45, 0.0 }
 0x17d   : > { %v2394_v56 = vld [vmem:[#allocation3 + $0x58] sm:$0xff]  ;;  %v2392_v54 = vld [vmem:[#allocation3 + $0x48] sm:$0xff]  ;;  %2456 = vst.msk [vmem:[%s4574_s14 + $0x20] sm:$0xf] %vm2447_vm12, %v3220_v33  ;;  %v2752_v19 = vsel %vm861_vm9, %v2733_v44, 0.0  ;;  %v2776_v59 = vmul.f32 %v2733_v44, %v2391_v43 }
 0x17e   : > { %v3223_v57 = vpack.c.bf16 %v2394_v56, %v2394_v56  ;;  %v2792_v30 = vadd.f32 %v2791_v49, %v2790_v2  ;;  %v2751_v11 = vadd.f32 %v2750_v20, %v2749_v31  ;;  %v3221_v55 = vpack.c.bf16 %v2392_v54, %v2392_v54 }
 0x17f   : > { %v2795_v17 = vsel %vm861_vm9, %v2776_v59, 0.0  ;;  %v2736_v15 = vmul.f32 %v3207_v52, %v2394_v56  ;;  %v2734_v25 = vmul.f32 %v3205_v6, %v2392_v54  ;;  %v2799_v14 = vsel %vm861_vm9, %v2778_v7, 0.0 }
 0x180   : > { %2459 = vst.msk [vmem:[%s4574_s14 + $0x2c] sm:$0xf] %vm2447_vm12, %v3223_v57  ;;  %v2753_v26 = vadd.f32 %v2752_v19, %v2751_v11  ;;  %v2794_v37 = vadd.f32 %v2793_v58, %v2792_v30  ;;  %2457 = vst.msk [vmem:[%s4574_s14 + $0x24] sm:$0xf] %vm2447_vm12, %v3221_v55  ;;  %vm2766_vm12 = vcmask 253952  }
 0x181   : > { %v2754_v21 = vsel %vm861_vm9, %v2734_v25, 0.0  ;;  %v2777_v12 = vmul.f32 %v2734_v25, %v2392_v54  ;;  %v2779_v39 = vmul.f32 %v2736_v15, %v2394_v56  ;;  %v2758_v36 = vsel %vm861_vm9, %v2736_v15, 0.0 }
 0x182   : > { %v2796_v9 = vadd.f32 %v2795_v17, %v2794_v37  ;;  %v2755_v24 = vadd.f32 %v2754_v21, %v2753_v26 }
 0x183   : > { %v2797_v13 = vsel %vm861_vm9, %v2777_v12, 0.0  ;;  %v2801_v27 = vsel %vm861_vm9, %v2779_v39, 0.0 }
 0x184   : > { %v2757_v23 = vadd.f32 %v2756_v63, %v2755_v24  ;;  %v2798_v22 = vadd.f32 %v2797_v13, %v2796_v9 }
 0x186   : > { %v2759_v35 = vadd.f32 %v2758_v36, %v2757_v23  ;;  %v2800_v28 = vadd.f32 %v2799_v14, %v2798_v22 }
 0x188   : > { %v2760_v32 = vrot.slane %v2759_v35, 4  ;;  %v2802_v60 = vadd.f32 %v2801_v27, %v2800_v28 }
 0x18a   : > { %v2761_v38 = vadd.f32 %v2760_v32, %v2759_v35  ;;  %v2803_v40 = vrot.slane %v2802_v60, 4 }
 0x18c   : > { %v2762_v46 = vrot.slane %v2761_v38, 2  ;;  %v2804_v8 = vadd.f32 %v2803_v40, %v2802_v60 }
 0x18e   : > { %v2763_v42 = vadd.f32 %v2762_v46, %v2761_v38  ;;  %v2805_v62 = vrot.slane %v2804_v8, 2 }
 0x190   : > { %v2764_v5 = vrot.slane %v2763_v42, 1  ;;  %v2806_v48 = vadd.f32 %v2805_v62, %v2804_v8 }
 0x192   : > { %v2765_v3 = vadd.f32 %v2764_v5, %v2763_v42  ;;  %v2807_v47 = vrot.slane %v2806_v48, 1 }
 0x194   : > { %2767 = vst.msk [vmem:[%s548_s17] sm:$0x1] %vm2766_vm12, %v2765_v3  ;;  %v2808_v50 = vadd.f32 %v2807_v47, %v2806_v48 }
 0x196   : > { %2809 = vst.msk [vmem:[%s558_s25] sm:$0x1] %vm2766_vm12, %v2808_v50 }
 0x197 PF: > { %s19_s4 = sadd.s32 1, %s3539_s4   ;;  %s4786_s27 = smov %s3531_s29 }
 0x198   : > { %p16_p0 = scmp.ge.s32.totalorder %s19_s4, 10   ;;  %s4787_s28 = smov %s3535_s30 }
 0x199   : > { %s4788_s29 = smov %s4791_s5  ;;  %s4789_s30 = smov %s4795_s9 }
 0x19a   :  { %18 = sbr.rel (!%p16_p0) target bundleno = 3 (0x3), region = 115 }

// kernel: double_conv.4
= control target key start
LH: loop header
LB: loop body
LE: loop exit
PB: predicated region body
PF: predicated region fallthrough
CT: control target
= control target key end

     0   :  { %s3945_s27 = smov 0   ;;  %s3947_s28 = smov 0   ;;  %s5269_s0 = inlined_call_operand.vmem [shape: bf16[2,16,24,32], index: 0, kind: input, shape index: {}, may-alias: {0,1,2}]   ;;  %s5270_s1 = inlined_call_operand.vmem [shape: bf16[2,16,24,32], index: 1, kind: input, shape index: {}, may-alias: {0,1,2}]   ;;  %s5271_s2 = inlined_call_operand.vmem [shape: bf16[2,16,24,32], index: 2, kind: input, shape index: {}, may-alias: {0,1,2}]   ;;  %s5272_s3 = inlined_call_operand.vmem [shape: bf16[3,3,32,32], index: 3, kind: input, shape index: {}]   ;;  %s5273_s4 = inlined_call_operand.vmem [shape: f32[1,32], index: 4, kind: input, shape index: {}]   ;;  %s5274_s5 = inlined_call_operand.vmem [shape: f32[1,32], index: 5, kind: input, shape index: {}]   ;;  %s5275_s6 = inlined_call_operand.vmem [shape: bf16[2,16,24,32], index: 6, kind: output, shape index: {0}]   ;;  %s5276_s7 = inlined_call_operand.vmem [shape: f32[2,4,1,32], index: 7, kind: output, shape index: {1}]   ;;  %s5277_s8 = inlined_call_operand.vmem [shape: f32[2,4,1,32], index: 8, kind: output, shape index: {2}]  }
   0x1   :  { %s3949_s29 = smov 0   ;;  %s3951_s30 = smov 0  }
   0x2   :  { %s3953_s9 = smov 0  }
   0x3 LB: > { %s31_s10 = sadd.s32 1, %s3888_s29  ;;  %s34_s11 = sadd.s32 1, %s3892_s30  ;;  %s3896_s9 = sphi %s3953_s9, %s19_s9   ;;  %s3892_s30 = sphi %s3951_s30, %s5337_s30   ;;  %s3888_s29 = sphi %s3949_s29, %s5336_s29   ;;  %s3884_s28 = sphi %s3947_s28, %s5335_s28   ;;  %s3880_s27 = sphi %s3945_s27, %s5334_s27  }
   0x4   : > { %p32_p0 = scmp.ge.s32.totalorder %s31_s10, 4  ;;  %p3337_p1 = scmp.ge.s32.totalorder %s3896_s9, 1 }
   0x5   : > { %p379_p2 = scmp.lt.s32.totalorder %s3896_s9, 9 }
   0x6   : > { %s5339_s10 = smov (%p32_p0, %s31_s10), 0  ;;  %s5341_s11 = smov (!%p32_p0, %s34_s11), %s3892_s30 }
   0x7   : > { %p380_p3 = pnand %p3337_p1, %p379_p2  ;;  %p36_p4 = scmp.ge.s32.totalorder %s5341_s11, 2 }
   0x8   : > { %v3840_v0 = vld [vmem:[%s5272_s3] sm:$0xff] (!%p380_p3)   ;;  %s3981_s14 = sshll.u32 (!%p380_p3), %s3880_s27, 2  ;;  %v560_v1 = vlaneseq (!%p380_p3)  ;;  %v3841_v2 = vld [vmem:[%s5272_s3 + $0x8] sm:$0xff] (!%p380_p3)   ;;  %p480_p5 = scmp.lt.s32.totalorder (!%p380_p3), %s3884_s28, 1  ;;  %v3998_v5 = vld [vmem:[%s5272_s3 + $0x10] sm:$0xff] (!%p380_p3)   ;;  %vm5278_vm0 = vcmask (!%p380_p3), 257024  }
   0x9   : > { %s5343_s11 = smov (%p36_p4, %s5341_s11), 0  ;;  %383 = sbr.rel (%p380_p3) target bundleno = 424 (0x1a8), region = 44 }
   0xa   : > { %3766 = vmatprep.subr.bf16.mxu1 (!%p380_p3), %v3840_v0  ;;  %p496_p6 = scmp.lt.s32.totalorder (!%p380_p3), %s3981_s14, 15  ;;  %v3987_v3 = vshrl.u32 (!%p380_p3), %v560_v1, 7  ;;  %3622 = vmatprep.subr.bf16.mxu0 (!%p380_p3), %v3840_v0  ;;  %s4004_s21 = sadd.s32 (!%p380_p3), 4294967295, %s3981_s14  ;;  %v3898_v6 = vmov (!%p380_p3), 0   ;;  %vm653_vm2 = vcmask (!%p380_p3), 261124   ;;  %v4015_v7 = vld [vmem:[%s5272_s3 + $0x20] sm:$0xff] (!%p380_p3)  }
   0xb   : > { %3768 = vmatpush3.bf16.msra.mxu1 (!%p380_p3), %v3840_v0  ;;  %3623 = vmatpush3.bf16.msra.mxu0 (!%p380_p3), %v3840_v0  ;;  %604 = vst.msk [vmem:[#allocation2] sm:$0xf] (!%p380_p3), %vm5278_vm0, %v3898_v6  ;;  %p478_p7 = scmp.gt.s32.totalorder (!%p380_p3), %s4004_s21, 0  ;;  %p579_p8 = scmp.gt.s32.totalorder (!%p380_p3), %s3880_s27, 0  ;;  %v4034_v8 = vld [vmem:[%s5273_s4] ss:$0 sm:$0xff] (!%p380_p3) }
   0xc   : > { %3767 = vmatprep.subr.bf16.mxu1 (!%p380_p3), %v3841_v2  ;;  %v3993_v4 = vadd.s32 (!%p380_p3), 16, %v3987_v3  ;;  %3624 = vmatprep.subr.bf16.mxu0 (!%p380_p3), %v3841_v2  ;;  %vm564_vm1 = vcmp.ge.s32.totalorder (!%p380_p3), %v3987_v3, 1  ;;  %831 = vst.msk [vmem:[#allocation2 + $0x48] sm:$0xf0] (!%p380_p3), %vm653_vm2, %v3898_v6  ;;  %p3340_p9 = scmp.lt.s32.totalorder (!%p380_p3), %s4004_s21, 15  ;;  %v3899_v9 = vmov (!%p380_p3), 0.0  }
   0xd   : > { %v4039_v10 = vsel (!%p380_p3), %vm564_vm1, 1.0, %v3899_v9  ;;  %v4050_v15 = vld [vmem:[%s5274_s5] ss:$0 sm:$0xff] (!%p380_p3)  ;;  %vm655_vm4 = vcmask (!%p380_p3), 261120   ;;  %p541_p11 = scmp.lt.s32.totalorder (!%p380_p3), %s3880_s27, 3  ;;  %vm647_vm6 = vcmask (!%p380_p3), 1043456  }
   0xe   : > { %vm569_vm3 = vcmp.le.s32.totalorder (!%p380_p3), %v3993_v4, 16  ;;  %vm843_vm5 = vsmask.f32 (!%p380_p3), 4352  ;;  %vm1220_vm7 = vsmask.f32 (!%p380_p3), 3328 }
   0xf   : > { %3769 = vmatpush3.bf16.msra.mxu1 (!%p380_p3), %v3841_v2  ;;  %3625 = vmatpush3.bf16.msra.mxu0 (!%p380_p3), %v3841_v2  ;;  %v4042_v11 = vsel (!%p380_p3), %vm569_vm3, 1.0, %v3899_v9  ;;  %vm1812_vm8 = vsmask.f32 (!%p380_p3), 7424  ;;  %vm1442_vm9 = vsmask.f32 (!%p380_p3), 256 }
  0x10   : > { %s5345_s28 = smov (!%p480_p5, %s3884_s28), 1  ;;  %3638 = vmatprep.subr.bf16.mxu1 %v3998_v5  ;;  %3654 = vmatprep.subr.bf16.mxu0 %v4015_v7 }
  0x11   : > { %s497_s17 = scalar_select %p496_p6, %s3981_s14, 15 }
  0x12   : > { %s4001_s20 = smul.u32 48, %s5345_s28 }
  0x13   : > { %s3772_s22 = smul.u32 3, %s497_s17 }
  0x14   : > { %s4057_s23 = scalar_select %p579_p8, 1.0, 0.0 }
  0x15   : > { %s4018_s25 = sadd.s32 %s3772_s22, %s4001_s20 }
  0x16   : > { %s3347_s26 = sshll.u32 %s4018_s25, 2  ;;  %s583_s24 = sshrl.u32 %s4057_s23, 16 }
  0x17   : > { %s4029_s15 = scalar_lea.vmem %s5270_s1, %s3347_s26  ;;  %s584_s12 = sand.u32 1, %s583_s24 }
  0x18   : > { %v3518_v12 = vld [vmem:[%s4029_s15] sm:$0xff]   ;;  %v3545_v13 = vld [vmem:[%s4029_s15 + $0x8] sm:$0xff]   ;;  %v3546_v14 = vld [vmem:[%s4029_s15 + $0x10] sm:$0xff]   ;;  %s479_s22 = scalar_select %p478_p7, %s4004_s21, 0 }
  0x19   : > { %v3519_v16 = vunpack.c.l.bf16 %v3518_v12  ;;  %v3520_v17 = vunpack.c.h.bf16 %v3518_v12  ;;  %v3523_v18 = vunpack.c.l.bf16 %v3545_v13  ;;  %v3524_v19 = vunpack.c.h.bf16 %v3545_v13  ;;  %v3547_v20 = vld [vmem:[%s4029_s15 + $0x18] sm:$0xff]   ;;  %p582_p10 = scmp.ne.f32.partialorder %s4057_s23, %s4057_s23  ;;  %s585_s13 = sadd.s32 32767, %s584_s12  ;;  %v3548_v37 = vld [vmem:[%s4029_s15 + $0x20] sm:$0xff]  }
  0x1a   : > { %v3527_v21 = vunpack.c.l.bf16 %v3546_v14  ;;  %v3528_v22 = vunpack.c.h.bf16 %v3546_v14  ;;  %s5347_s22 = smov (!%p3340_p9, %s479_s22), 15  ;;  %v3531_v23 = vunpack.c.l.bf16 %v3547_v20  ;;  %v3532_v24 = vunpack.c.h.bf16 %v3547_v20  ;;  %s586_s17 = sadd.s32 %s585_s13, %s4057_s23 }
  0x1b   : > { %v688_v25 = vmul.f32 %v3519_v16, %v4034_v8  ;;  %v689_v26 = vmul.f32 %v3520_v17, %v4034_v8  ;;  %v690_v27 = vmul.f32 %v3523_v18, %v4034_v8  ;;  %v691_v28 = vmul.f32 %v3524_v19, %v4034_v8  ;;  %s3770_s21 = smul.u32 3, %s5347_s22  ;;  %s587_s19 = sand.u32 4294901760, %s586_s17 }
  0x1c   : > { %v692_v29 = vmul.f32 %v3527_v21, %v4034_v8  ;;  %v693_v30 = vmul.f32 %v3528_v22, %v4034_v8  ;;  %v694_v31 = vmul.f32 %v3531_v23, %v4034_v8  ;;  %v695_v32 = vmul.f32 %v3532_v24, %v4034_v8  ;;  %s5349_s19 = smov (%p582_p10, %s587_s19), 2143289344  ;;  %s5108_s24 = scalar_lea.vmem %s5275_s6, %s3347_s26 }
  0x1d   : > { %v707_v33 = vadd.f32 %v4050_v15, %v688_v25  ;;  %v708_v34 = vadd.f32 %v4050_v15, %v689_v26  ;;  %v709_v35 = vadd.f32 %v4050_v15, %v690_v27  ;;  %v710_v36 = vadd.f32 %v4050_v15, %v691_v28  ;;  %s486_s16 = sadd.s32 %s4001_s20, %s3770_s21  ;;  %s590_s21 = sshrl.u32 %s5349_s19, 16 }
  0x1e   : > { %v711_v38 = vadd.f32 %v4050_v15, %v692_v29  ;;  %v712_v39 = vadd.f32 %v4050_v15, %v693_v30  ;;  %v713_v40 = vadd.f32 %v4050_v15, %v694_v31  ;;  %v714_v41 = vadd.f32 %v4050_v15, %v695_v32  ;;  %s3345_s18 = sshll.u32 %s486_s16, 2  ;;  %s639_s23 = sshll.u32 %s590_s21, 16 }
  0x1f   : > { %v719_v42 = vmax.f32 %v707_v33, 0.0  ;;  %v720_v43 = vmax.f32 %v708_v34, 0.0  ;;  %v721_v44 = vmax.f32 %v709_v35, 0.0  ;;  %v722_v45 = vmax.f32 %v710_v36, 0.0  ;;  %s488_s12 = scalar_lea.vmem %s5269_s0, %s3345_s18  ;;  %s640_s13 = sor.u32 %s639_s23, %s590_s21 }
  0x20   : > { %v723_v46 = vmax.f32 %v711_v38, 0.0  ;;  %v724_v47 = vmax.f32 %v712_v39, 0.0  ;;  %v725_v48 = vmax.f32 %v713_v40, 0.0  ;;  %v726_v49 = vmax.f32 %v714_v41, 0.0  ;;  %v3514_v53 = vld [vmem:[%s488_s12] sm:$0xff]   ;;  %s3355_s16 = sshll.u32 %s5345_s28, 2 }
  0x21   : > { %v731_v50 = vmul.f32 %v4039_v10, %v719_v42  ;;  %v733_v51 = vmul.f32 %v4042_v11, %v721_v44  ;;  %v734_v52 = vmul.f32 %v4039_v10, %v722_v45  ;;  %v607_v54 = vld [vmem:[%s488_s12 + $0x8] sm:$0xf]  ;;  %v3535_v55 = vunpack.c.l.bf16 %v3548_v37  ;;  %s542_s17 = scalar_select %p541_p11, %s3880_s27, 3 }
  0x22   : > { %v736_v56 = vmul.f32 %v4042_v11, %v724_v47  ;;  %v3515_v57 = vunpack.c.l.bf16 %v3514_v53  ;;  %v3516_v58 = vunpack.c.h.bf16 %v3514_v53  ;;  %v610_v59 = vunpack.c.l.bf16 %v607_v54  ;;  %s505_s28 = sadd.s32 4, %s3981_s14 }
  0x23   : > { %v743_v60 = vpack.c.bf16 %v720_v43, %v731_v50  ;;  %v745_v61 = vpack.c.bf16 %v723_v46, %v734_v52  ;;  %v3499_v62 = vpack.c.bf16 %v734_v52, %v733_v51  ;;  %v737_v63 = vmul.f32 %v4039_v10, %v725_v48  ;;  %s4119_s18 = sadd.s32 %s3355_s16, %s542_s17  ;;  %p4174_p12 = scmp.lt.s32.totalorder %s505_s28, 15 }
  0x24   : > { %v746_v0 = vpack.c.bf16 %v736_v56, %v736_v56  ;;  %v618_v1 = vmul.f32 %v3515_v57, %v4034_v8  ;;  %v619_v2 = vmul.f32 %v3516_v58, %v4034_v8  ;;  %v620_v6 = vmul.f32 %v4034_v8, %v610_v59 }
  0x25   : > { %v763_v12 = vunpack.c.h.b16 %v745_v61  ;;  %783 = vst.msk [vmem:[#allocation2 + $0x10] sm:$0xff] %vm655_vm4, %v743_v60  ;;  %784 = vst.msk [vmem:[#allocation2 + $0x18] sm:$0xff] %vm655_vm4, %v3499_v62  ;;  %v747_v13 = vpack.c.bf16 %v726_v49, %v737_v63  ;;  %v3536_v14 = vunpack.c.h.bf16 %v3548_v37  ;;  %v696_v16 = vmul.f32 %v3535_v55, %v4034_v8  ;;  %s5351_s28 = smov (!%p4174_p12, %s505_s28), 15 }
  0x26   : > { %v764_v17 = vunpack.c.l.b16 %v746_v0  ;;  %v628_v18 = vadd.f32 %v4050_v15, %v618_v1  ;;  %v629_v19 = vadd.f32 %v4050_v15, %v619_v2  ;;  %v630_v20 = vadd.f32 %v4050_v15, %v620_v6  ;;  %v3549_v0 = vld [vmem:[%s4029_s15 + $0x28] sm:$0xff]   ;;  %s4202_s15 = scalar_select %p541_p11, 1.0, 0.0 }
  0x27   : > { %786 = vst.msk [vmem:[#allocation2 + $0x28] sm:$0xff] %vm655_vm4, %v747_v13  ;;  %v697_v21 = vmul.f32 %v3536_v14, %v4034_v8  ;;  %v715_v22 = vadd.f32 %v4050_v15, %v696_v16  ;;  %v641_v31 = vstv %s640_s13  ;;  %v3540_v14 = vunpack.c.h.bf16 %v3549_v0  ;;  %v3843_v16 = vld [vmem:[%s5272_s3 + $0x18] sm:$0xff]   ;;  %s5353_s28 = smov (!%p4174_p12, %s5351_s28), 15 }
  0x28   : > { %v773_v23 = vpack.c.b16 %v764_v17, %v763_v12  ;;  %v631_v24 = vmax.f32 %v628_v18, 0.0  ;;  %v632_v25 = vmax.f32 %v629_v19, 0.0  ;;  %v633_v26 = vmax.f32 %v630_v20, 0.0  ;;  %s595_s12 = sshrl.u32 %s4202_s15, 16  ;;  %s4227_s21 = smul.u32 3, %s5353_s28 }
  0x29   : > { %v716_v27 = vadd.f32 %v4050_v15, %v697_v21  ;;  %v727_v28 = vmax.f32 %v715_v22, 0.0  ;;  %v3539_v12 = vunpack.c.l.bf16 %v3549_v0  ;;  %s4229_s23 = sand.u32 1, %s595_s12  ;;  %p594_p13 = scmp.ne.f32.partialorder %s4202_s15, %s4202_s15 }
  0x2a   : > { %785 = vst.msk [vmem:[#allocation2 + $0x20] sm:$0xff] %vm655_vm4, %v773_v23  ;;  %v634_v29 = vmul.f32 %v4039_v10, %v631_v24  ;;  %v636_v30 = vmul.f32 %v4042_v11, %v633_v26  ;;  %s597_s17 = sadd.s32 32767, %s4229_s23  ;;  %s514_s28 = sadd.s32 %s4227_s21, %s4001_s20 }
  0x2b   : > { %v728_v32 = vmax.f32 %v716_v27, 0.0  ;;  %v739_v37 = vmul.f32 %v4042_v11, %v727_v28  ;;  %v698_v23 = vmul.f32 %v3539_v12, %v4034_v8  ;;  %s4270_s20 = sadd.s32 %s597_s17, %s4202_s15  ;;  %s3352_s22 = sshll.u32 %s514_s28, 2 }
  0x2c   : > { %v4121_v33 = vld [vmem:[#allocation2 + $0x10] sm:$0xff]  ;;  %v4123_v34 = vld [vmem:[#allocation2 + $0x18] sm:$0xff]  ;;  %v637_v35 = vpack.c.bf16 %v632_v25, %v634_v29  ;;  %v638_v36 = vpack.c.bf16 %v636_v30, %v636_v30  ;;  %v699_v29 = vmul.f32 %v3540_v14, %v4034_v8  ;;  %s599_s12 = sand.u32 4294901760, %s4270_s20  ;;  %s4312_s13 = scalar_lea.vmem %s5271_s2, %s3352_s22 }
  0x2d   : > { %v4127_v38 = vshrl.u32 %v4121_v33, 16  ;;  %v4130_v39 = vshll.u32 %v4121_v33, 16  ;;  %v4133_v40 = vshrl.u32 %v4123_v34, 16  ;;  %v4136_v41 = vshll.u32 %v4123_v34, 16  ;;  %s5355_s12 = smov (%p594_p13, %s599_s12), 2143289344 }
  0x2e   : > { %v643_v42 = vmul.bf16 %v641_v31, %v637_v35  ;;  %v644_v43 = vmul.bf16 %v641_v31, %v638_v36  ;;  %v4138_v44 = vld [vmem:[#allocation2 + $0x28] sm:$0xff]  ;;  %v4141_v45 = vmul.f32 %v4039_v10, %v728_v32  ;;  %v1051_v19 = vrot.slane %v4121_v33, 4  ;;  %v4217_v35 = vld [vmem:[%s5272_s3 + $0x30] sm:$0xff]   ;;  %s602_s20 = sshrl.u32 %s5355_s12, 16  ;;  %s548_s12 = scalar_lea.vmem %s5276_s7, %s4119_s18 }
  0x2f   : > { %v864_v46 = vrot.slane %v4127_v38, 3  ;;  %v867_v47 = vrot.slane %v4130_v39, 4  ;;  %v873_v48 = vrot.slane %v4133_v40, 3  ;;  %v876_v49 = vrot.slane %v4136_v41, 4  ;;  %s823_s22 = sshll.u32 %s602_s20, 16 }
  0x30   : > { %v648_v50 = vrot.slane %v643_v42, 4  ;;  %v649_v51 = vrot.slane %v644_v43, 4  ;;  %v4148_v52 = vshrl.u32 %v4138_v44, 16  ;;  %v4151_v53 = vshll.u32 %v4138_v44, 16  ;;  %s824_s27 = sor.u32 %s823_s22, %s602_s20 }
  0x31   : > { %v4154_v54 = vor.u32 %v867_v47, %v864_v46  ;;  %v877_v55 = vor.u32 %v876_v49, %v873_v48  ;;  %v4156_v56 = vld [vmem:[#allocation2 + $0x20] sm:$0xff]  ;;  %v3500_v57 = vpack.c.bf16 %v4141_v45, %v739_v37  ;;  %v1244_v12 = vrot.slane %v4130_v39, 5 }
  0x32   : > { %v4160_v58 = vshrl.u32 %v4156_v56, 16  ;;  %v4163_v59 = vshll.u32 %v4156_v56, 16  ;;  %v650_v60 = vsel %vm647_vm6, %v648_v50, %v649_v51  ;;  %654 = vst.msk [vmem:[#allocation2] sm:$0xf0] %vm653_vm2, %v648_v50  ;;  %v891_v61 = vrot.slane %v4148_v52, 3 }
  0x33   : > { %v878_v62 = vsel %vm843_vm5, %v4154_v54, %v877_v55  ;;  %656 = vst.msk [vmem:[#allocation2 + $0x8] sm:$0xff] %vm655_vm4, %v650_v60  ;;  %v894_v63 = vrot.slane %v4151_v53, 4  ;;  %787 = vst.msk [vmem:[#allocation2 + $0x30] sm:$0xff] %vm655_vm4, %v3500_v57  ;;  %v1253_v57 = vrot.slane %v4136_v41, 5 }
  0x34   : > { %3630 = vmatprep.mubr.msk.bf16.mxu1 %vm655_vm4, %v878_v62  ;;  %v882_v1 = vrot.slane %v4160_v58, 3  ;;  %v885_v2 = vrot.slane %v4163_v59, 4 }
  0x35   : > { %v4181_v6 = vor.u32 %v894_v63, %v891_v61 }
  0x36   : > { %v4183_v13 = vor.u32 %v885_v2, %v882_v1  ;;  %v1241_v2 = vrot.slane %v4127_v38, 4 }
  0x38   : > { %v887_v17 = vsel %vm843_vm5, %v877_v55, %v4183_v13  ;;  %v4197_v18 = vsel %vm843_vm5, %v4183_v13, %v4181_v6  ;;  %v1250_v55 = vrot.slane %v4133_v40, 4 }
  0x39   : > { %3631 = vmatmul.mubr.msk.bf16.vlgmr.msra.gmra.mrb[0].mxu1 %vm655_vm4, %v887_v17  ;;  %v832_v20 = vld [vmem:[#allocation2] sm:$0xf8] }
  0x3a   : > { %v1029_v21 = vld [vmem:[#allocation2] sm:$0xf0]  ;;  %3639 = vmatpush3.bf16.msra.mxu1 %v3998_v5  ;;  %v4207_v24 = vld [vmem:[#allocation2 + $0x8] sm:$0xff]  ;;  %v845_v25 = vshrl.u32 %v832_v20, 16  ;;  %v848_v26 = vshll.u32 %v832_v20, 16  ;;  %3634 = vmatprep.mubr.msk.bf16.mxu1 %vm655_vm4, %v4197_v18 }
  0x3b   : > { %v1208_v22 = vld [vmem:[#allocation2] sm:$0xf0]  ;;  %v838_v27 = vld [vmem:[#allocation2 + $0x30] sm:$0xf]  ;;  %v1048_v28 = vrot.slane %v1029_v21, 4  ;;  %v853_v30 = vshrl.u32 %v4207_v24, 16  ;;  %3640 = vmatprep.subr.bf16.mxu1 %v3843_v16 }
  0x3c   : > { %v856_v31 = vshll.u32 %v4207_v24, 16  ;;  %v898_v32 = vshrl.u32 %v838_v27, 16  ;;  %v901_v5 = vshll.u32 %v838_v27, 16  ;;  %v847_v36 = vrot.slane %v845_v25, 3  ;;  %v3846_v20 = vld [vmem:[%s5272_s3 + $0x28] sm:$0xff]  }
  0x3d   : > { %v850_v37 = vrot.slane %v848_v26, 4  ;;  %v1049_v42 = vrot.slane %v4207_v24, 4  ;;  %v1222_v43 = vshrl.u32 %v1208_v22, 16  ;;  %v855_v46 = vrot.slane %v853_v30, 3 }
  0x3e   : > { %v858_v47 = vrot.slane %v856_v31, 4  ;;  %v900_v48 = vrot.slane %v898_v32, 3  ;;  %v903_v49 = vrot.slane %v901_v5, 4  ;;  %3641 = vmatpush3.bf16.msra.mxu1 %v3843_v16  ;;  %v1225_v62 = vshll.u32 %v1208_v22, 16 }
  0x3f   : > { %v851_v50 = vor.u32 %v850_v37, %v847_v36  ;;  %v1224_v51 = vrot.slane %v1222_v43, 4  ;;  %3670 = vmatprep.subr.bf16.mxu1 %v4217_v35  ;;  %v1232_v63 = vrot.slane %v853_v30, 4  ;;  %v1050_v0 = vsel %vm647_vm6, %v1048_v28, %v1049_v42 }
  0x40   : > { %v859_v60 = vor.u32 %v858_v47, %v855_v46  ;;  %v904_v61 = vor.u32 %v903_v49, %v900_v48  ;;  %v1235_v1 = vrot.slane %v856_v31, 5  ;;  %v1227_v21 = vrot.slane %v1225_v62, 5  ;;  %v4288_v48 = vld [vmem:[#allocation2 + $0x30] sm:$0xf] }
  0x41   : > { %v1053_v24 = vrot.slane %v4123_v34, 4  ;;  %v4246_v25 = vrot.slane %v4156_v56, 4  ;;  %v4254_v27 = vor.u32 %v1253_v57, %v1250_v55  ;;  %v1259_v28 = vrot.slane %v4160_v58, 4  ;;  %v1214_v49 = vld [vmem:[#allocation2 + $0x30] sm:$0x1f]  ;;  %v3848_v55 = vld [vmem:[%s5272_s3 + $0x38] sm:$0xff]  }
  0x42   : > { %v860_v14 = vsel %vm843_vm5, %v851_v50, %v859_v60  ;;  %v869_v16 = vsel %vm843_vm5, %v859_v60, %v4154_v54  ;;  %v905_v17 = vsel %vm843_vm5, %v4181_v6, %v904_v61  ;;  %v1236_v22 = vor.u32 %v1235_v1, %v1232_v63  ;;  %v4302_v60 = vld [vmem:[#allocation2 + $0x30] sm:$0xff] }
  0x43   : > { %3626 = vmatprep.mubr.msk.bf16.mxu0 %vm655_vm4, %v860_v14  ;;  %3635 = vmatmul.mubr.msk.bf16.gmra.mrb[4].mxu1 %vm655_vm4, %v905_v17  ;;  %v4249_v54 = vrot.slane %v4138_v44, 4  ;;  %v1228_v26 = vor.u32 %v1227_v21, %v1224_v51  ;;  %v717_v30 = vadd.f32 %v4050_v15, %v698_v23  ;;  %v1262_v31 = vrot.slane %v4163_v59, 5  ;;  %v3847_v23 = vld [vmem:[%s5272_s3 + $0x40] sm:$0xff]   ;;  %v1430_v14 = vld [vmem:[#allocation2 + $0x8] sm:$0x80] }
  0x44   : > { %3627 = vmatmul.mubr.msk.bf16.vlgmr.msra.gmra.mrb[0].mxu0 %vm655_vm4, %v869_v16  ;;  %3642 = vmatprep.mubr.msk.bf16.mxu1 %vm655_vm4, %v1050_v0  ;;  %v1268_v32 = vrot.slane %v4148_v52, 4  ;;  %v1271_v5 = vrot.slane %v4151_v53, 5  ;;  %v718_v36 = vadd.f32 %v4050_v15, %v699_v29  ;;  %v1245_v43 = vor.u32 %v1244_v12, %v1241_v2  ;;  %v3849_v12 = vld [vmem:[%s5272_s3 + $0x48] sm:$0xff]  }
  0x45   : > { %3655 = vmatpush3.bf16.msra.mxu0 %v4015_v7  ;;  %v1237_v37 = vsel %vm1220_vm7, %v1228_v26, %v1236_v22  ;;  %v1054_v7 = vsel %vm647_vm6, %v1051_v19, %v1053_v24  ;;  %v4278_v29 = vsel %vm647_vm6, %v1053_v24, %v4246_v25  ;;  %v1052_v46 = vsel %vm647_vm6, %v1049_v42, %v1051_v19 }
  0x46   : > { %3656 = vmatprep.subr.bf16.mxu0 %v3846_v20  ;;  %3658 = vmatprep.mubr.msk.bf16.mxu0 %vm655_vm4, %v1237_v37  ;;  %v4286_v47 = vsel %vm647_vm6, %v4246_v25, %v4249_v54  ;;  %v1450_v50 = vrot.slane %v4127_v38, 7  ;;  %v729_v51 = vmax.f32 %v717_v30, 0.0  ;;  %v1255_v19 = vsel %vm1220_vm7, %v1245_v43, %v4254_v27 }
  0x47   : > { %v4298_v42 = vor.u32 %v1262_v31, %v1259_v28  ;;  %v4300_v57 = vor.u32 %v1271_v5, %v1268_v32  ;;  %v730_v61 = vmax.f32 %v718_v36, 0.0  ;;  %v1246_v62 = vsel %vm1220_vm7, %v1236_v22, %v1245_v43  ;;  %v3542_v32 = vld [vmem:[%s4312_s13] sm:$0xff]  }
  0x48   : > { %v749_v63 = vpack.c.bf16 %v729_v51, %v4141_v45  ;;  %v1818_v0 = vrot.slane %v4130_v39, 1  ;;  %v1823_v1 = vrot.slane %v4136_v41, 1  ;;  %v1059_v2 = vrot.slane %v4288_v48, 4  ;;  %v791_v51 = vld [vmem:[%s4312_s13 + $0x8] sm:$0xf]  ;;  %s558_s13 = scalar_lea.vmem %s5277_s8, %s4119_s18 }
  0x49   : > { %3657 = vmatpush3.bf16.msra.mxu0 %v3846_v20  ;;  %v1275_v45 = vshrl.u32 %v1214_v49, 16  ;;  %v742_v16 = vmul.f32 %v4042_v11, %v730_v61  ;;  %v1831_v17 = vrot.slane %v4163_v59, 1  ;;  %v1278_v20 = vshll.u32 %v1214_v49, 16 }
  0x4a   : > { %3686 = vmatprep.subr.bf16.mxu0 %v3847_v23  ;;  %v4324_v21 = vshrl.u32 %v4302_v60, 16  ;;  %v1819_v22 = vor.u32 %v1818_v0, %v4127_v38  ;;  %v1827_v24 = vor.u32 %v1823_v1, %v4133_v40  ;;  %v4340_v26 = vshll.u32 %v4302_v60, 16  ;;  %v3853_v38 = vld [vmem:[%s5272_s3 + $0x68] sm:$0xff]  }
  0x4b   : > { %3643 = vmatmul.mubr.msk.bf16.vlgmr.msra.gmra.mrb[8].mxu1 %vm655_vm4, %v1052_v46  ;;  %v750_v28 = vpack.c.bf16 %v742_v16, %v742_v16  ;;  %v769_v30 = vunpack.c.h.b16 %v749_v63  ;;  %v1835_v31 = vor.u32 %v1831_v17, %v4160_v58  ;;  %v1444_v5 = vshrl.u32 %v1430_v14, 16  ;;  %v4355_v46 = vld [vmem:[%s5272_s3 + $0x60] sm:$0xff]  }
  0x4c   : > { %3671 = vmatpush3.bf16.msra.mxu1 %v4217_v35  ;;  %3646 = vmatprep.mubr.msk.bf16.mxu1 %vm655_vm4, %v1054_v7  ;;  %v4337_v35 = vld [vmem:[%s5272_s3 + $0x50] sm:$0xff]   ;;  %v4346_v36 = vsel %vm1812_vm8, %v1819_v22, %v1823_v1  ;;  %v4349_v37 = vsel %vm1812_vm8, %v1827_v24, %v1831_v17  ;;  %v1839_v43 = vrot.slane %v4151_v53, 1  ;;  %v1277_v7 = vrot.slane %v1275_v45, 4  ;;  %v2413_v22 = vld [vmem:[#allocation2 + $0x20] sm:$0xff] }
  0x4d   : > { %3659 = vmatmul.mubr.msk.bf16.vlgmr.msra.gmra.mrb[4].mxu0 %vm655_vm4, %v1246_v62  ;;  %3672 = vmatprep.subr.bf16.mxu1 %v3848_v55  ;;  %v2053_v48 = vrot.slane %v4324_v21, 3  ;;  %v2056_v49 = vrot.slane %v4340_v26, 4  ;;  %v3543_v63 = vunpack.c.l.bf16 %v3542_v32  ;;  %v1264_v0 = vsel %vm1220_vm7, %v4254_v27, %v4298_v42 }
  0x4e   : > { %3687 = vmatpush3.bf16.msra.mxu0 %v3847_v23  ;;  %3662 = vmatprep.mubr.msk.bf16.mxu0 %vm655_vm4, %v1255_v19  ;;  %v770_v23 = vunpack.c.l.b16 %v750_v28  ;;  %v1280_v19 = vrot.slane %v1278_v20, 5  ;;  %v4361_v61 = vsel %vm1812_vm8, %v1835_v31, %v1839_v43  ;;  %v4364_v62 = vor.u32 %v1839_v43, %v4148_v52 }
  0x4f   : > { %3688 = vmatprep.subr.bf16.mxu0 %v3849_v12  ;;  %v4371_v45 = vor.u32 %v2056_v49, %v2053_v48  ;;  %v1446_v14 = vrot.slane %v1444_v5, 7  ;;  %v1453_v16 = vor.u32 %v1450_v50, %v4130_v39  ;;  %v794_v17 = vunpack.c.l.bf16 %v791_v51 }
  0x50   : > { %3673 = vmatpush3.bf16.msra.mxu1 %v3848_v55  ;;  %v776_v1 = vpack.c.b16 %v770_v23, %v769_v30  ;;  %v3544_v55 = vunpack.c.h.bf16 %v3542_v32  ;;  %v802_v20 = vmul.f32 %v3543_v63, %v4034_v8  ;;  %v1273_v27 = vsel %vm1220_vm7, %v4298_v42, %v4300_v57 }
  0x51   : > { %3702 = vmatprep.subr.bf16.mxu1 %v4337_v35  ;;  %v4387_v39 = vsel %vm843_vm5, %v4181_v6, %v4371_v45  ;;  %v1281_v42 = vor.u32 %v1280_v19, %v1277_v7  ;;  %v804_v24 = vmul.f32 %v4034_v8, %v794_v17  ;;  %v1458_v6 = vrot.slane %v4133_v40, 7 }
  0x52   : > { %3689 = vmatpush3.bf16.msra.mxu0 %v3849_v12  ;;  %788 = vst.msk [vmem:[#allocation2 + $0x38] sm:$0xff] %vm655_vm4, %v776_v1  ;;  %v803_v12 = vmul.f32 %v3544_v55, %v4034_v8  ;;  %v812_v28 = vadd.f32 %v4050_v15, %v802_v20  ;;  %v2433_v31 = vshrl.u32 %v2413_v22, 16  ;;  %v2436_v32 = vshll.u32 %v2413_v22, 16 }
  0x53   : > { %3647 = vmatmul.mubr.msk.bf16.gmra.mrb[12].mxu1 %vm655_vm4, %v4278_v29  ;;  %3718 = vmatprep.subr.bf16.mxu0 %v4355_v46  ;;  %v1060_v29 = vsel %vm647_vm6, %v4249_v54, %v1059_v2  ;;  %v1454_v5 = vsel %vm1442_vm9, %v1446_v14, %v1453_v16  ;;  %v1466_v43 = vrot.slane %v4160_v58, 7  ;;  %v814_v2 = vadd.f32 %v4050_v15, %v804_v24 }
  0x54   : > { %3650 = vmatprep.mubr.msk.bf16.mxu1 %vm655_vm4, %v4286_v47  ;;  %v813_v30 = vadd.f32 %v4050_v15, %v803_v12  ;;  %v815_v7 = vmax.f32 %v812_v28, 0.0  ;;  %v2435_v23 = vrot.slane %v2433_v31, 4  ;;  %v2438_v48 = vrot.slane %v2436_v32, 5  ;;  %v3852_v12 = vld [vmem:[%s5272_s3 + $0x58] sm:$0xff]   ;;  %v3854_v28 = vld [vmem:[%s5272_s3 + $0x70] sm:$0xff]  }
  0x55   : > { %3663 = vmatmul.mubr.msk.bf16.gmra.mrb[8].mxu0 %vm655_vm4, %v1264_v0  ;;  %v2257_v40 = vrot.slane %v4302_v60, 4  ;;  %v1282_v49 = vsel %vm1220_vm7, %v4300_v57, %v1281_v42  ;;  %v817_v51 = vmax.f32 %v814_v2, 0.0  ;;  %v825_v63 = vstv %s824_s27 }
  0x56   : > { %3666 = vmatprep.mubr.msk.bf16.mxu0 %vm655_vm4, %v1273_v27  ;;  %v816_v8 = vmax.f32 %v813_v30, 0.0  ;;  %v818_v19 = vmul.f32 %v4039_v10, %v815_v7  ;;  %v2453_v58 = vrot.slane %v4324_v21, 4  ;;  %v4419_v55 = vor.u32 %v2438_v48, %v2435_v23  ;;  %v3856_v48 = vld [vmem:[%s5272_s3 + $0x78] sm:$0xff]  }
  0x57   : > { %v4415_v15 = vsel %vm647_vm6, %v4249_v54, %v2257_v40  ;;  %v820_v0 = vmul.f32 %v4042_v11, %v817_v51  ;;  %v2456_v14 = vrot.slane %v4340_v26, 5  ;;  %v1461_v10 = vor.u32 %v1458_v6, %v4136_v41  ;;  %v3857_v51 = vld [vmem:[%s5272_s3 + $0x88] sm:$0xff]  }
  0x58   : > { %v821_v1 = vpack.c.bf16 %v816_v8, %v818_v19  ;;  %v1469_v54 = vor.u32 %v1466_v43, %v4163_v59  ;;  %v4435_v22 = vsel %vm1220_vm7, %v4419_v55, %v4300_v57  ;;  %v1474_v27 = vrot.slane %v4148_v52, 7 }
  0x59   : > { %v822_v16 = vpack.c.bf16 %v820_v0, %v820_v0  ;;  %v4425_v20 = vor.u32 %v2456_v14, %v2453_v58  ;;  %v1462_v59 = vsel %vm1442_vm9, %v1450_v50, %v1461_v10  ;;  %v4452_v42 = vld [vmem:[#allocation2 + $0x38] sm:$0xff] }
  0x5a   : > { %v827_v17 = vmul.bf16 %v825_v63, %v821_v1  ;;  %v1477_v52 = vor.u32 %v1474_v27, %v4151_v53  ;;  %v4462_v50 = vshrl.u32 %v4452_v42, 16  ;;  %v4479_v31 = vshll.u32 %v4452_v42, 16  ;;  %v2412_v0 = vld [vmem:[#allocation2 + $0x18] sm:$0xf0] }
  0x5b   : > { %3651 = vmatmul.mubr.msk.bf16.gmra.mrb[16].mxu1 %vm655_vm4, %v1060_v29  ;;  %v828_v11 = vmul.bf16 %v825_v63, %v822_v16  ;;  %v4440_v41 = vsel %vm1220_vm7, %v4300_v57, %v4425_v20  ;;  %v1482_v29 = vrot.slane %v4324_v21, 7  ;;  %v2012_v57 = vld [vmem:[#allocation2 + $0x18] sm:$0xf8] }
  0x5c   : > { %3674 = vmatprep.mubr.msk.bf16.mxu1 %vm655_vm4, %v1454_v5  ;;  %829 = vst.msk [vmem:[#allocation2 + $0x40] sm:$0xff] %vm655_vm4, %v827_v17  ;;  %v2025_v53 = vshrl.u32 %v2012_v57, 16  ;;  %v1490_v30 = vrot.slane %v4462_v50, 7 }
  0x5d   : > { %3667 = vmatmul.mubr.msk.bf16.gmra.mrb[12].mxu0 %vm655_vm4, %v1282_v49  ;;  %830 = vst.msk [vmem:[#allocation2 + $0x48] sm:$0xf] %vm5278_vm0, %v828_v11  ;;  %v1485_v24 = vor.u32 %v4340_v26, %v1482_v29  ;;  %v2065_v49 = vrot.slane %v4479_v31, 4 }
  0x5e   : > { %3690 = vmatprep.mubr.msk.bf16.mxu0 %vm655_vm4, %v4121_v33  ;;  %v1470_v33 = vsel %vm1442_vm9, %v1458_v6, %v1469_v54  ;;  %v3855_v6 = vld [vmem:[%s5272_s3 + $0x80] sm:$0xff]   ;;  %v1493_v5 = vor.u32 %v4479_v31, %v1490_v30  ;;  %v2428_v54 = vshll.u32 %v2412_v0, 16  ;;  %v2465_v30 = vrot.slane %v4479_v31, 5 }
  0x60   : > { %v1494_v2 = vsel %vm1442_vm9, %v1482_v29, %v1493_v5 }
  0x63   : > { %3675 = vmatmul.mubr.msk.bf16.vlgmr.msra.gmra.mrb[20].mxu1 %vm655_vm4, %v1462_v59  ;;  %v4495_v8 = vld [vmem:[#allocation2 + $0x40] sm:$0xff] }
  0x64   : > { %3703 = vmatpush3.bf16.msra.mxu1 %v4337_v35  ;;  %3678 = vmatprep.mubr.msk.bf16.mxu1 %vm655_vm4, %v1470_v33  ;;  %v2028_v35 = vshll.u32 %v2012_v57, 16  ;;  %v2072_v23 = vshll.u32 %v4495_v8, 16  ;;  %v2018_v58 = vld [vmem:[#allocation2 + $0x48] sm:$0xf]  ;;  %v1806_v1 = vld [vmem:[#allocation2 + $0x40] sm:$0x1] }
  0x65   : > { %3691 = vmatmul.mubr.msk.bf16.vlgmr.msra.gmra.mrb[16].mxu0 %vm655_vm4, %v4123_v34  ;;  %3704 = vmatprep.subr.bf16.mxu1 %v3852_v12  ;;  %v1478_v34 = vsel %vm1442_vm9, %v1466_v43, %v1477_v52  ;;  %v2078_v10 = vshrl.u32 %v2018_v58, 16  ;;  %v2081_v16 = vshll.u32 %v2018_v58, 16  ;;  %v1861_v11 = vshll.u32 %v1806_v1, 16  ;;  %v2233_v33 = vld [vmem:[#allocation2 + $0x18] sm:$0xf0] }
  0x66   : > { %3719 = vmatpush3.bf16.msra.mxu0 %v4355_v46  ;;  %3694 = vmatprep.mubr.msk.bf16.mxu0 %vm655_vm4, %v4156_v56  ;;  %v1486_v46 = vsel %vm1442_vm9, %v1474_v27, %v1485_v24  ;;  %v2027_v56 = vrot.slane %v2025_v53, 3  ;;  %v2030_v32 = vrot.slane %v2028_v35, 4  ;;  %v2074_v63 = vrot.slane %v2072_v23, 4 }
  0x67   : > { %3720 = vmatprep.subr.bf16.mxu0 %v3853_v38  ;;  %v2080_v27 = vrot.slane %v2078_v10, 3  ;;  %v1863_v52 = vrot.slane %v1861_v11, 1  ;;  %v2252_v57 = vrot.slane %v2233_v33, 4 }
  0x68   : > { %3705 = vmatpush3.bf16.msra.mxu1 %v3852_v12  ;;  %v2031_v43 = vor.u32 %v2030_v32, %v2027_v56  ;;  %v2418_v56 = vld [vmem:[#allocation2 + $0x48] sm:$0x1f]  ;;  %v2261_v32 = vrot.slane %v4495_v8, 4 }
  0x69   : > { %3734 = vmatprep.subr.bf16.mxu1 %v3854_v28  ;;  %v2254_v53 = vsel %vm647_vm6, %v2252_v57, %v4246_v25  ;;  %v2481_v5 = vshll.u32 %v2418_v56, 16 }
  0x6a   : > { %3721 = vmatpush3.bf16.msra.mxu0 %v3853_v38  ;;  %v2040_v7 = vsel %vm843_vm5, %v2031_v43, %v4183_v13  ;;  %v2062_v13 = vrot.slane %v4462_v50, 3  ;;  %v2430_v38 = vrot.slane %v2428_v54, 5 }
  0x6b   : > { %3679 = vmatmul.mubr.msk.bf16.gmra.mrb[24].mxu1 %vm655_vm4, %v1478_v34  ;;  %3750 = vmatprep.subr.bf16.mxu0 %v3855_v6  ;;  %v2462_v34 = vrot.slane %v4462_v50, 4 }
  0x6c   : > { %3682 = vmatprep.mubr.msk.bf16.mxu1 %vm655_vm4, %v1486_v46  ;;  %v2066_v14 = vor.u32 %v2065_v49, %v2062_v13  ;;  %v2474_v46 = vrot.slane %v2072_v23, 5 }
  0x6d   : > { %3695 = vmatmul.mubr.msk.bf16.gmra.mrb[20].mxu0 %vm655_vm4, %v4138_v44  ;;  %v2069_v44 = vshrl.u32 %v4495_v8, 16 }
  0x6e   : > { %3698 = vmatprep.mubr.msk.bf16.mxu0 %vm655_vm4, %v4302_v60  ;;  %v2067_v59 = vsel %vm843_vm5, %v4371_v45, %v2066_v14 }
  0x6f   : > { %v2071_v19 = vrot.slane %v2069_v44, 3  ;;  %v2471_v25 = vrot.slane %v2069_v44, 4 }
  0x71   : > { %v2075_v17 = vor.u32 %v2074_v63, %v2071_v19 }
  0x73   : > { %3683 = vmatmul.mubr.msk.bf16.gmra.mrb[28].mxu1 %vm655_vm4, %v1494_v2  ;;  %v2076_v12 = vsel %vm843_vm5, %v2066_v14, %v2075_v17  ;;  %v2239_v2 = vld [vmem:[#allocation2 + $0x48] sm:$0xf] }
  0x74   : > { %3706 = vmatprep.mubr.msk.bf16.mxu1 %vm655_vm4, %v4346_v36  ;;  %v1847_v36 = vrot.slane %v4340_v26, 1  ;;  %v1855_v26 = vrot.slane %v4479_v31, 1  ;;  %v2478_v31 = vshrl.u32 %v2418_v56, 16  ;;  %v2263_v8 = vrot.slane %v2239_v2, 4 }
  0x75   : > { %3699 = vmatmul.mubr.msk.bf16.gmra.mrb[24].mxu0 %vm655_vm4, %v4452_v42 }
  0x76   : > { %3722 = vmatprep.mubr.msk.bf16.mxu0 %vm655_vm4, %v2040_v7  ;;  %v2483_v7 = vrot.slane %v2481_v5, 5 }
  0x7b   : > { %3707 = vmatmul.mubr.msk.bf16.vlgmr.msra.gmra.mrb[32].mxu1 %vm655_vm4, %v4349_v37  ;;  %v1851_v37 = vor.u32 %v1847_v36, %v4324_v21 }
  0x7c   : > { %3735 = vmatpush3.bf16.msra.mxu1 %v3854_v28  ;;  %3710 = vmatprep.mubr.msk.bf16.mxu1 %vm655_vm4, %v4361_v61  ;;  %v2425_v61 = vshrl.u32 %v2412_v0, 16 }
  0x7d   : > { %3723 = vmatmul.mubr.msk.bf16.vlgmr.msra.gmra.mrb[28].mxu0 %vm655_vm4, %v4197_v18  ;;  %3736 = vmatprep.subr.bf16.mxu1 %v3856_v48  ;;  %v1848_v18 = vsel %vm1812_vm8, %v4364_v62, %v1847_v36  ;;  %v1856_v21 = vsel %vm1812_vm8, %v1851_v37, %v1855_v26  ;;  %v1859_v62 = vor.u32 %v1855_v26, %v4462_v50 }
  0x7e   : > { %3751 = vmatpush3.bf16.msra.mxu0 %v3855_v6  ;;  %3726 = vmatprep.mubr.msk.bf16.mxu0 %vm655_vm4, %v4387_v39  ;;  %v2083_v39 = vrot.slane %v2081_v16, 4  ;;  %v2427_v29 = vrot.slane %v2425_v61, 4  ;;  %v2466_v50 = vor.u32 %v2465_v30, %v2462_v34 }
  0x7f   : > { %3752 = vmatprep.subr.bf16.mxu0 %v3857_v51  ;;  %v1864_v28 = vsel %vm1812_vm8, %v1859_v62, %v1863_v52 }
  0x80   : > { %3737 = vmatpush3.bf16.msra.mxu1 %v3856_v48  ;;  %v2084_v45 = vor.u32 %v2083_v39, %v2080_v27  ;;  %v2431_v24 = vor.u32 %v2430_v38, %v2427_v29 }
  0x82   : > { %3753 = vmatpush3.bf16.msra.mxu0 %v3857_v51  ;;  %v2085_v35 = vsel %vm843_vm5, %v2075_v17, %v2084_v45  ;;  %v2440_v6 = vsel %vm1220_vm7, %v2431_v24, %v4419_v55  ;;  %v2259_v55 = vrot.slane %v4452_v42, 4  ;;  %v2467_v42 = vsel %vm1220_vm7, %v4425_v20, %v2466_v50 }
  0x83   : > { %3711 = vmatmul.mubr.msk.bf16.gmra.mrb[36].mxu1 %vm655_vm4, %v1848_v18 }
  0x84   : > { %3714 = vmatprep.mubr.msk.bf16.mxu1 %vm655_vm4, %v1856_v21  ;;  %v2260_v43 = vsel %vm647_vm6, %v2257_v40, %v2259_v55  ;;  %v2264_v40 = vsel %vm647_vm6, %v2261_v32, %v2263_v8 }
  0x85   : > { %3727 = vmatmul.mubr.msk.bf16.gmra.mrb[32].mxu0 %vm655_vm4, %v2067_v59 }
  0x86   : > { %3730 = vmatprep.mubr.msk.bf16.mxu0 %vm655_vm4, %v2076_v12 }
  0x8b   : > { %3715 = vmatmul.mubr.msk.bf16.gmra.mrb[40].mxu1 %vm655_vm4, %v1864_v28 }
  0x8c   : > { %3738 = vmatprep.mubr.msk.bf16.mxu1 %vm655_vm4, %v2254_v53 }
  0x8d   : > { %3731 = vmatmul.mubr.msk.bf16.gmra.mrb[36].mxu0 %vm655_vm4, %v2085_v35 }
  0x8e   : > { %3754 = vmatprep.mubr.msk.bf16.mxu0 %vm655_vm4, %v2440_v6 }
  0x93   : > { %3739 = vmatmul.mubr.msk.bf16.vlgmr.msra.gmra.mrb[44].mxu1 %vm655_vm4, %v4286_v47  ;;  %v2475_v47 = vor.u32 %v2474_v46, %v2471_v25 }
  0x94   : > { %3742 = vmatprep.mubr.msk.bf16.mxu1 %vm655_vm4, %v4415_v15  ;;  %v2262_v15 = vsel %vm647_vm6, %v2259_v55, %v2261_v32 }
  0x95   : > { %3755 = vmatmul.mubr.msk.bf16.vlgmr.msra.gmra.mrb[40].mxu0 %vm655_vm4, %v4435_v22  ;;  %v2480_v22 = vrot.slane %v2478_v31, 4 }
  0x96   : > { %3758 = vmatprep.mubr.msk.bf16.mxu0 %vm655_vm4, %v4440_v41  ;;  %v2476_v41 = vsel %vm1220_vm7, %v2466_v50, %v2475_v47 }
  0x97   : > { %v2484_v60 = vor.u32 %v2483_v7, %v2480_v22 }
  0x99   : > { %v2485_v44 = vsel %vm1220_vm7, %v2475_v47, %v2484_v60 }
  0x9b   : > { %3743 = vmatmul.mubr.msk.bf16.gmra.mrb[48].mxu1 %vm655_vm4, %v2260_v43 }
  0x9c   : > { %3746 = vmatprep.mubr.msk.bf16.mxu1 %vm655_vm4, %v2262_v15 }
  0x9d   : > { %3759 = vmatmul.mubr.msk.bf16.gmra.mrb[44].mxu0 %vm655_vm4, %v2467_v42 }
  0x9e   : > { %3762 = vmatprep.mubr.msk.bf16.mxu0 %vm655_vm4, %v2476_v41 }
  0xa3   : > { %3747 = vmatmul.mubr.msk.bf16.gmra.mrb[52].mxu1 %vm655_vm4, %v2264_v40 }
  0xa5   : > { %3763 = vmatmul.mubr.msk.bf16.gmra.mrb[48].mxu0 %vm655_vm4, %v2485_v44 }
 0x10c   : > { %v3632_v20 = vpop.f32.mrb[0].mxu1 }
 0x10d   : > { %1023 = vst.msk [vmem:[#allocation3 + $0x30] sm:$0xff] %vm655_vm4, %v3632_v20  ;;  %v986_v23 = vpop.f32.mrb[1].mxu1 }
 0x10e   : > { %1021 = vst.msk [vmem:[#allocation3 + $0x20] sm:$0xff] %vm655_vm4, %v986_v23  ;;  %v3633_v48 = vpop.f32.mrb[2].mxu1 }
 0x10f   : > { %1024 = vst.msk [vmem:[#allocation3 + $0x38] sm:$0xff] %vm655_vm4, %v3633_v48  ;;  %v989_v13 = vpop.f32.mrb[3].mxu1 }
 0x110   : > { %1022 = vst.msk [vmem:[#allocation3 + $0x28] sm:$0xff] %vm655_vm4, %v989_v13 }
 0x114   : > { %v1178_v38 = vld [vmem:[#allocation3 + $0x30] sm:$0xff] }
 0x115   : > { %v1176_v57 = vld [vmem:[#allocation3 + $0x20] sm:$0xff] }
 0x116   : > { %v3636_v49 = vpop.f32.mrb[4].mxu1  ;;  %v1179_v28 = vld [vmem:[#allocation3 + $0x38] sm:$0xff] }
 0x117   : > { %v3628_v36 = vpop.f32.mrb[0].mxu0  ;;  %1027 = vst.msk [vmem:[#allocation3 + $0x50] sm:$0xff] %vm655_vm4, %v3636_v49  ;;  %v1002_v51 = vpop.f32.mrb[5].mxu1  ;;  %v1177_v30 = vld [vmem:[#allocation3 + $0x28] sm:$0xff] }
 0x118   : > { %1019 = vst.msk [vmem:[#allocation3 + $0x10] sm:$0xff] %vm655_vm4, %v3628_v36  ;;  %v970_v19 = vpop.f32.mrb[1].mxu0  ;;  %1025 = vst.msk [vmem:[#allocation3 + $0x40] sm:$0xff] %vm655_vm4, %v1002_v51  ;;  %v3637_v63 = vpop.f32.mrb[6].mxu1 }
 0x119   : > { %1017 = vst.msk [vmem:[#allocation3] sm:$0xff] %vm655_vm4, %v970_v19  ;;  %v3629_v58 = vpop.f32.mrb[2].mxu0  ;;  %1028 = vst.msk [vmem:[#allocation3 + $0x58] sm:$0xff] %vm655_vm4, %v3637_v63  ;;  %v1005_v0 = vpop.f32.mrb[7].mxu1 }
 0x11a   : > { %1020 = vst.msk [vmem:[#allocation3 + $0x18] sm:$0xff] %vm655_vm4, %v3629_v58  ;;  %v973_v37 = vpop.f32.mrb[3].mxu0  ;;  %1026 = vst.msk [vmem:[#allocation3 + $0x48] sm:$0xff] %vm655_vm4, %v1005_v0 }
 0x11b   : > { %1018 = vst.msk [vmem:[#allocation3 + $0x8] sm:$0xff] %vm655_vm4, %v973_v37 }
 0x11e   : > { %v3644_v26 = vpop.f32.mrb[8].mxu1  ;;  %v1182_v42 = vld [vmem:[#allocation3 + $0x50] sm:$0xff] }
 0x11f   : > { %v1174_v1 = vld [vmem:[#allocation3 + $0x10] sm:$0xff]  ;;  %v1125_v14 = vpop.f32.mrb[9].mxu1  ;;  %v1180_v41 = vld [vmem:[#allocation3 + $0x40] sm:$0xff] }
 0x120   : > { %v1186_v10 = vadd.f32 %v3644_v26, %v1174_v1  ;;  %v1172_v16 = vld [vmem:[#allocation3] sm:$0xff]  ;;  %v3645_v17 = vpop.f32.mrb[10].mxu1  ;;  %v3660_v61 = vpop.f32.mrb[4].mxu0  ;;  %v1183_v44 = vld [vmem:[#allocation3 + $0x58] sm:$0xff] }
 0x121   : > { %v1184_v54 = vadd.f32 %v1172_v16, %v1125_v14  ;;  %v1175_v18 = vld [vmem:[#allocation3 + $0x18] sm:$0xff]  ;;  %v1128_v11 = vpop.f32.mrb[11].mxu1  ;;  %v1347_v21 = vpop.f32.mrb[5].mxu0  ;;  %v1181_v36 = vld [vmem:[#allocation3 + $0x48] sm:$0xff] }
 0x122   : > { %1198 = vst.msk [vmem:[#allocation3 + $0x10] sm:$0xff] %vm655_vm4, %v1186_v10  ;;  %v1187_v59 = vadd.f32 %v3645_v17, %v1175_v18  ;;  %v1173_v27 = vld [vmem:[#allocation3 + $0x8] sm:$0xff]  ;;  %v3661_v39 = vpop.f32.mrb[6].mxu0 }
 0x123   : > { %1196 = vst.msk [vmem:[#allocation3] sm:$0xff] %vm655_vm4, %v1184_v54  ;;  %v1185_v33 = vadd.f32 %v1173_v27, %v1128_v11  ;;  %v1350_v12 = vpop.f32.mrb[7].mxu0 }
 0x124   : > { %1199 = vst.msk [vmem:[#allocation3 + $0x18] sm:$0xff] %vm655_vm4, %v1187_v59 }
 0x125   : > { %1197 = vst.msk [vmem:[#allocation3 + $0x8] sm:$0xff] %vm655_vm4, %v1185_v33 }
 0x126   : > { %v3648_v29 = vpop.f32.mrb[12].mxu1 }
 0x127   : > { %v1190_v62 = vadd.f32 %v3648_v29, %v1178_v38  ;;  %v1141_v52 = vpop.f32.mrb[13].mxu1 }
 0x128   : > { %v1188_v45 = vadd.f32 %v1176_v57, %v1141_v52  ;;  %v3649_v24 = vpop.f32.mrb[14].mxu1  ;;  %v3664_v53 = vpop.f32.mrb[8].mxu0 }
 0x129   : > { %v1396_v35 = vld [vmem:[#allocation3 + $0x10] sm:$0xff]  ;;  %1202 = vst.msk [vmem:[#allocation3 + $0x30] sm:$0xff] %vm655_vm4, %v1190_v62  ;;  %v1191_v6 = vadd.f32 %v3649_v24, %v1179_v28  ;;  %v1144_v34 = vpop.f32.mrb[15].mxu1  ;;  %v1363_v25 = vpop.f32.mrb[9].mxu0 }
 0x12a   : > { %v1408_v46 = vadd.f32 %v3660_v61, %v1396_v35  ;;  %v1394_v56 = vld [vmem:[#allocation3] sm:$0xff]  ;;  %1200 = vst.msk [vmem:[#allocation3 + $0x20] sm:$0xff] %vm655_vm4, %v1188_v45  ;;  %v1189_v55 = vadd.f32 %v1177_v30, %v1144_v34  ;;  %v3665_v32 = vpop.f32.mrb[10].mxu0 }
 0x12b   : > { %v1406_v50 = vadd.f32 %v1394_v56, %v1347_v21  ;;  %v1397_v31 = vld [vmem:[#allocation3 + $0x18] sm:$0xff]  ;;  %1203 = vst.msk [vmem:[#allocation3 + $0x38] sm:$0xff] %vm655_vm4, %v1191_v6  ;;  %v1366_v5 = vpop.f32.mrb[11].mxu0 }
 0x12c   : > { %1420 = vst.msk [vmem:[#allocation3 + $0x10] sm:$0xff] %vm655_vm4, %v1408_v46  ;;  %v1409_v47 = vadd.f32 %v3661_v39, %v1397_v31  ;;  %v1395_v43 = vld [vmem:[#allocation3 + $0x8] sm:$0xff]  ;;  %1201 = vst.msk [vmem:[#allocation3 + $0x28] sm:$0xff] %vm655_vm4, %v1189_v55 }
 0x12d   : > { %1418 = vst.msk [vmem:[#allocation3] sm:$0xff] %vm655_vm4, %v1406_v50  ;;  %v1407_v15 = vadd.f32 %v1395_v43, %v1350_v12 }
 0x12e   : > { %1421 = vst.msk [vmem:[#allocation3 + $0x18] sm:$0xff] %vm655_vm4, %v1409_v47  ;;  %v3652_v2 = vpop.f32.mrb[16].mxu1 }
 0x12f   : > { %1419 = vst.msk [vmem:[#allocation3 + $0x8] sm:$0xff] %vm655_vm4, %v1407_v15  ;;  %v1194_v22 = vadd.f32 %v3652_v2, %v1182_v42  ;;  %v1157_v7 = vpop.f32.mrb[17].mxu1 }
 0x130   : > { %v1400_v8 = vld [vmem:[#allocation3 + $0x30] sm:$0xff]  ;;  %v1192_v60 = vadd.f32 %v1180_v41, %v1157_v7  ;;  %v3653_v40 = vpop.f32.mrb[18].mxu1  ;;  %v3668_v20 = vpop.f32.mrb[12].mxu0 }
 0x131   : > { %v1412_v23 = vadd.f32 %v3664_v53, %v1400_v8  ;;  %1206 = vst.msk [vmem:[#allocation3 + $0x50] sm:$0xff] %vm655_vm4, %v1194_v22  ;;  %v1398_v48 = vld [vmem:[#allocation3 + $0x20] sm:$0xff]  ;;  %v1195_v13 = vadd.f32 %v3653_v40, %v1183_v44  ;;  %v1160_v49 = vpop.f32.mrb[19].mxu1  ;;  %v1379_v51 = vpop.f32.mrb[13].mxu0  ;;  %v4615_v8 = vadd.s32 24, %v3987_v3 }
 0x132   : > { %v1410_v19 = vadd.f32 %v1398_v48, %v1363_v25  ;;  %1204 = vst.msk [vmem:[#allocation3 + $0x40] sm:$0xff] %vm655_vm4, %v1192_v60  ;;  %v1401_v63 = vld [vmem:[#allocation3 + $0x38] sm:$0xff]  ;;  %v1193_v58 = vadd.f32 %v1181_v36, %v1160_v49  ;;  %v3669_v0 = vpop.f32.mrb[14].mxu0  ;;  %v4610_v25 = vmul.u32.u64.low 2863311531, %v3993_v4  ;;  %v4611_v46 = vmul.u32.u64.high 2863311531, %v3993_v4, %v4610_v25 }
 0x133   : > { %1424 = vst.msk [vmem:[#allocation3 + $0x30] sm:$0xff] %vm655_vm4, %v1412_v23  ;;  %v1413_v37 = vadd.f32 %v3665_v32, %v1401_v63  ;;  %1207 = vst.msk [vmem:[#allocation3 + $0x58] sm:$0xff] %vm655_vm4, %v1195_v13  ;;  %v1399_v26 = vld [vmem:[#allocation3 + $0x28] sm:$0xff]  ;;  %v1382_v1 = vpop.f32.mrb[15].mxu0  ;;  %v1608_v16 = vld [vmem:[#allocation3 + $0x10] sm:$0xff] }
 0x134   : > { %1422 = vst.msk [vmem:[#allocation3 + $0x20] sm:$0xff] %vm655_vm4, %v1410_v19  ;;  %v1411_v14 = vadd.f32 %v1399_v26, %v1366_v5  ;;  %1205 = vst.msk [vmem:[#allocation3 + $0x48] sm:$0xff] %vm655_vm4, %v1193_v58  ;;  %v1606_v54 = vld [vmem:[#allocation3] sm:$0xff]  ;;  %v4619_v23 = vmul.u32.u64.low 2863311531, %v3987_v3  ;;  %v4620_v48 = vmul.u32.u64.high 2863311531, %v3987_v3, %v4619_v23  ;;  %v2746_v26 = vshrl.u32 %v4611_v46, 4 }
 0x135   : > { %1425 = vst.msk [vmem:[#allocation3 + $0x38] sm:$0xff] %vm655_vm4, %v1413_v37  ;;  %v1609_v59 = vld [vmem:[#allocation3 + $0x18] sm:$0xff]  ;;  %v4631_v63 = vmul.u32.u64.low 2863311531, %v4615_v8  ;;  %v4632_v58 = vmul.u32.u64.high 2863311531, %v4615_v8, %v4631_v63  ;;  %v4655_v46 = vadd.s32 32, %v3987_v3 }
 0x136   : > { %1423 = vst.msk [vmem:[#allocation3 + $0x28] sm:$0xff] %vm655_vm4, %v1411_v14  ;;  %v3676_v10 = vpop.f32.mrb[20].mxu1  ;;  %v1607_v38 = vld [vmem:[#allocation3 + $0x8] sm:$0xff] }
 0x137   : > { %v1620_v17 = vadd.f32 %v3676_v10, %v1608_v16  ;;  %v1559_v61 = vpop.f32.mrb[21].mxu1 }
 0x138   : > { %v1404_v18 = vld [vmem:[#allocation3 + $0x50] sm:$0xff]  ;;  %v1618_v11 = vadd.f32 %v1606_v54, %v1559_v61  ;;  %v3677_v21 = vpop.f32.mrb[22].mxu1  ;;  %v3692_v27 = vpop.f32.mrb[16].mxu0  ;;  %v4641_v61 = vadd.s32 48, %v3987_v3 }
 0x139   : > { %v1416_v39 = vadd.f32 %v3668_v20, %v1404_v18  ;;  %v1402_v33 = vld [vmem:[#allocation3 + $0x40] sm:$0xff]  ;;  %1632 = vst.msk [vmem:[#allocation3 + $0x10] sm:$0xff] %vm655_vm4, %v1620_v17  ;;  %v1621_v12 = vadd.f32 %v3677_v21, %v1609_v59  ;;  %v1562_v29 = vpop.f32.mrb[23].mxu1  ;;  %v1717_v62 = vpop.f32.mrb[17].mxu0 }
 0x13a   : > { %v1414_v52 = vadd.f32 %v1402_v33, %v1379_v51  ;;  %v1405_v57 = vld [vmem:[#allocation3 + $0x58] sm:$0xff]  ;;  %1630 = vst.msk [vmem:[#allocation3] sm:$0xff] %vm655_vm4, %v1618_v11  ;;  %v1619_v45 = vadd.f32 %v1607_v38, %v1562_v29  ;;  %v3693_v24 = vpop.f32.mrb[18].mxu0  ;;  %v1612_v30 = vld [vmem:[#allocation3 + $0x30] sm:$0xff]  ;;  %v4625_v51 = vadd.s32 8, %v3987_v3 }
 0x13b   : > { %1428 = vst.msk [vmem:[#allocation3 + $0x50] sm:$0xff] %vm655_vm4, %v1416_v39  ;;  %v1417_v28 = vadd.f32 %v3669_v0, %v1405_v57  ;;  %v1403_v53 = vld [vmem:[#allocation3 + $0x48] sm:$0xff]  ;;  %1633 = vst.msk [vmem:[#allocation3 + $0x18] sm:$0xff] %vm655_vm4, %v1621_v12  ;;  %v1720_v35 = vpop.f32.mrb[19].mxu0  ;;  %v1610_v32 = vld [vmem:[#allocation3 + $0x20] sm:$0xff] }
 0x13c   : > { %1426 = vst.msk [vmem:[#allocation3 + $0x40] sm:$0xff] %vm655_vm4, %v1414_v52  ;;  %v1415_v6 = vadd.f32 %v1403_v53, %v1382_v1  ;;  %1631 = vst.msk [vmem:[#allocation3 + $0x8] sm:$0xff] %vm655_vm4, %v1619_v45  ;;  %v1613_v47 = vld [vmem:[#allocation3 + $0x38] sm:$0xff]  ;;  %v4637_v16 = vmul.u32.u64.low 2863311531, %v4625_v51  ;;  %v4638_v17 = vmul.u32.u64.high 2863311531, %v4625_v51, %v4637_v16 }
 0x13d   : > { %1429 = vst.msk [vmem:[#allocation3 + $0x58] sm:$0xff] %vm655_vm4, %v1417_v28  ;;  %v1611_v7 = vld [vmem:[#allocation3 + $0x28] sm:$0xff]  ;;  %v2724_v28 = vshrl.u32 %v4620_v48, 4  ;;  %v4682_v16 = vadd.s32 40, %v3987_v3 }
 0x13e   : > { %1427 = vst.msk [vmem:[#allocation3 + $0x48] sm:$0xff] %vm655_vm4, %v1415_v6  ;;  %v3680_v34 = vpop.f32.mrb[24].mxu1 }
 0x13f   : > { %v1624_v56 = vadd.f32 %v3680_v34, %v1612_v30  ;;  %v1575_v55 = vpop.f32.mrb[25].mxu1  ;;  %v4649_v34 = vmul.u32.u64.low 2863311531, %v4641_v61  ;;  %v4650_v30 = vmul.u32.u64.high 2863311531, %v4641_v61, %v4649_v34 }
 0x140   : > { %v1766_v50 = vld [vmem:[#allocation3 + $0x10] sm:$0xff]  ;;  %v1622_v31 = vadd.f32 %v1610_v32, %v1575_v55  ;;  %v3681_v5 = vpop.f32.mrb[26].mxu1  ;;  %v3696_v43 = vpop.f32.mrb[20].mxu0 }
 0x141   : > { %v1778_v15 = vadd.f32 %v3692_v27, %v1766_v50  ;;  %1636 = vst.msk [vmem:[#allocation3 + $0x30] sm:$0xff] %vm655_vm4, %v1624_v56  ;;  %v1764_v2 = vld [vmem:[#allocation3] sm:$0xff]  ;;  %v1625_v42 = vadd.f32 %v3681_v5, %v1613_v47  ;;  %v1578_v22 = vpop.f32.mrb[27].mxu1  ;;  %v1733_v41 = vpop.f32.mrb[21].mxu0  ;;  %v2757_v56 = vshrl.u32 %v4632_v58, 4 }
 0x142   : > { %v1776_v60 = vadd.f32 %v1764_v2, %v1717_v62  ;;  %1634 = vst.msk [vmem:[#allocation3 + $0x20] sm:$0xff] %vm655_vm4, %v1622_v31  ;;  %v1767_v40 = vld [vmem:[#allocation3 + $0x18] sm:$0xff]  ;;  %v1623_v44 = vadd.f32 %v1611_v7, %v1578_v22  ;;  %v3697_v20 = vpop.f32.mrb[22].mxu0  ;;  %v1616_v37 = vld [vmem:[#allocation3 + $0x50] sm:$0xff]  ;;  %v2725_v31 = vmul.u32 24, %v2724_v28 }
 0x143   : > { %1790 = vst.msk [vmem:[#allocation3 + $0x10] sm:$0xff] %vm655_vm4, %v1778_v15  ;;  %v1779_v13 = vadd.f32 %v3693_v24, %v1767_v40  ;;  %1637 = vst.msk [vmem:[#allocation3 + $0x38] sm:$0xff] %vm655_vm4, %v1625_v42  ;;  %v1765_v49 = vld [vmem:[#allocation3 + $0x8] sm:$0xff]  ;;  %v1736_v36 = vpop.f32.mrb[23].mxu0  ;;  %v1614_v10 = vld [vmem:[#allocation3 + $0x40] sm:$0xff]  ;;  %v2747_v24 = vmul.u32 24, %v2746_v26 }
 0x144   : > { %1788 = vst.msk [vmem:[#allocation3] sm:$0xff] %vm655_vm4, %v1776_v60  ;;  %v1777_v19 = vadd.f32 %v1765_v49, %v1720_v35  ;;  %1635 = vst.msk [vmem:[#allocation3 + $0x28] sm:$0xff] %vm655_vm4, %v1623_v44  ;;  %v1617_v21 = vld [vmem:[#allocation3 + $0x58] sm:$0xff]  ;;  %v2735_v15 = vshrl.u32 %v4638_v17, 4  ;;  %v4665_v60 = vmul.u32.u64.low 2863311531, %v4655_v46  ;;  %v4666_v40 = vmul.u32.u64.high 2863311531, %v4655_v46, %v4665_v60 }
 0x145   : > { %1791 = vst.msk [vmem:[#allocation3 + $0x18] sm:$0xff] %vm655_vm4, %v1779_v13  ;;  %v1615_v29 = vld [vmem:[#allocation3 + $0x48] sm:$0xff]  ;;  %v4661_v50 = vsub.s32 %v3993_v4, %v2747_v24  ;;  %v2758_v49 = vmul.u32 24, %v2757_v56 }
 0x146   : > { %1789 = vst.msk [vmem:[#allocation3 + $0x8] sm:$0xff] %vm655_vm4, %v1777_v19  ;;  %v3684_v0 = vpop.f32.mrb[28].mxu1  ;;  %v2768_v34 = vshrl.u32 %v4666_v40, 4  ;;  %v4742_v40 = vadd.s32 64, %v3987_v3 }
 0x147   : > { %v1628_v1 = vadd.f32 %v3684_v0, %v1616_v37  ;;  %v1591_v14 = vpop.f32.mrb[29].mxu1  ;;  %vm2852_vm10 = vcmp.ne.s32.totalorder %v4661_v50, 0  ;;  %v4675_v37 = vsub.s32 %v3987_v3, %v2725_v31  ;;  %vm2864_vm11 = vcmp.lt.s32.totalorder %v4661_v50, 0 }
 0x148   : > { %v1770_v54 = vld [vmem:[#allocation3 + $0x30] sm:$0xff]  ;;  %v1626_v18 = vadd.f32 %v1614_v10, %v1591_v14  ;;  %v3685_v11 = vpop.f32.mrb[30].mxu1  ;;  %v3700_v59 = vpop.f32.mrb[24].mxu0  ;;  %v2790_v10 = vshrl.u32 %v4650_v30, 4  ;;  %vm4695_vm12 = vmand %vm2864_vm11, %vm2852_vm10  ;;  %v4711_v30 = vadd.s32 80, %v3987_v3 }
 0x149   : > { %v1782_v27 = vadd.f32 %v3696_v43, %v1770_v54  ;;  %1640 = vst.msk [vmem:[#allocation3 + $0x50] sm:$0xff] %vm655_vm4, %v1628_v1  ;;  %v1768_v39 = vld [vmem:[#allocation3 + $0x20] sm:$0xff]  ;;  %v1629_v33 = vadd.f32 %v3685_v11, %v1617_v21  ;;  %v1594_v12 = vpop.f32.mrb[31].mxu1  ;;  %v1749_v38 = vpop.f32.mrb[25].mxu0  ;;  %v2888_v54 = vadd.s32 24, %v4661_v50  ;;  %vm2850_vm13 = vcmp.ne.s32.totalorder %v4675_v37, 0 }
 0x14a   : > { %v1780_v62 = vadd.f32 %v1768_v39, %v1733_v41  ;;  %1638 = vst.msk [vmem:[#allocation3 + $0x40] sm:$0xff] %vm655_vm4, %v1626_v18  ;;  %v1771_v52 = vld [vmem:[#allocation3 + $0x38] sm:$0xff]  ;;  %v1627_v57 = vadd.f32 %v1615_v29, %v1594_v12  ;;  %v3701_v45 = vpop.f32.mrb[26].mxu0  ;;  %v1978_v32 = vld [vmem:[#allocation3 + $0x10] sm:$0xff]  ;;  %v2736_v18 = vmul.u32 24, %v2735_v15  ;;  %vm2862_vm14 = vcmp.lt.s32.totalorder %v4675_v37, 0 }
 0x14b   : > { %1794 = vst.msk [vmem:[#allocation3 + $0x30] sm:$0xff] %vm655_vm4, %v1782_v27  ;;  %v1783_v53 = vadd.f32 %v3697_v20, %v1771_v52  ;;  %1641 = vst.msk [vmem:[#allocation3 + $0x58] sm:$0xff] %vm655_vm4, %v1629_v33  ;;  %v1769_v35 = vld [vmem:[#allocation3 + $0x28] sm:$0xff]  ;;  %v1752_v6 = vpop.f32.mrb[27].mxu0  ;;  %v1976_v43 = vld [vmem:[#allocation3] sm:$0xff]  ;;  %v2886_v33 = vadd.s32 24, %v4675_v37  ;;  %v4703_v12 = vsub.s32 %v4615_v8, %v2758_v49 }
 0x14c   : > { %1792 = vst.msk [vmem:[#allocation3 + $0x20] sm:$0xff] %vm655_vm4, %v1780_v62  ;;  %v1781_v25 = vadd.f32 %v1769_v35, %v1736_v36  ;;  %1639 = vst.msk [vmem:[#allocation3 + $0x48] sm:$0xff] %vm655_vm4, %v1627_v57  ;;  %v1979_v7 = vld [vmem:[#allocation3 + $0x18] sm:$0xff]  ;;  %v4670_v36 = vadd.s32 56, %v3987_v3  ;;  %v2791_v52 = vmul.u32 24, %v2790_v10 }
 0x14d   : > { %1795 = vst.msk [vmem:[#allocation3 + $0x38] sm:$0xff] %vm655_vm4, %v1783_v53  ;;  %v1977_v48 = vld [vmem:[#allocation3 + $0x8] sm:$0xff]  ;;  %vm4727_vm15 = vmand %vm2862_vm14, %vm2850_vm13  ;;  %vm2853_vm1 = vcmp.ne.s32.totalorder %v4703_v12, 0  ;;  %vm2865_vm2 = vcmp.lt.s32.totalorder %v4703_v12, 0 }
 0x14e   : > { %1793 = vst.msk [vmem:[#allocation3 + $0x28] sm:$0xff] %vm655_vm4, %v1781_v25  ;;  %v3708_v55 = vpop.f32.mrb[32].mxu1  ;;  %v4689_v11 = vmul.u32.u64.low 2863311531, %v4670_v36  ;;  %v4690_v21 = vmul.u32.u64.high 2863311531, %v4670_v36, %v4689_v11  ;;  %v4739_v60 = vsub.s32 %v4641_v61, %v2791_v52  ;;  %v4756_v61 = vsel %vm4727_vm15, %v2886_v33, %v4675_v37  ;;  %vm4789_vm9 = vmand %vm2865_vm2, %vm2853_vm1 }
 0x14f   : > { %v1990_v5 = vadd.f32 %v3708_v55, %v1978_v32  ;;  %v1929_v47 = vpop.f32.mrb[33].mxu1  ;;  %vm2910_vm13 = vcmp.ge.s32.totalorder %v4756_v61, 1  ;;  %vm2922_vm15 = vcmp.le.s32.totalorder %v4756_v61, 16 }
 0x150   : > { %v1774_v2 = vld [vmem:[#allocation3 + $0x50] sm:$0xff]  ;;  %v1988_v42 = vadd.f32 %v1976_v43, %v1929_v47  ;;  %v3709_v22 = vpop.f32.mrb[34].mxu1  ;;  %v3724_v41 = vpop.f32.mrb[28].mxu0  ;;  %v4720_v47 = vsub.s32 %v4625_v51, %v2736_v18  ;;  %vm2856_vm8 = vcmp.ne.s32.totalorder %v4739_v60, 0  ;;  %vm2868_vm10 = vcmp.lt.s32.totalorder %v4739_v60, 0 }
 0x151   : > { %v1786_v44 = vadd.f32 %v3700_v59, %v1774_v2  ;;  %v1772_v20 = vld [vmem:[#allocation3 + $0x40] sm:$0xff]  ;;  %2002 = vst.msk [vmem:[#allocation3 + $0x10] sm:$0xff] %vm655_vm4, %v1990_v5  ;;  %v1991_v4 = vadd.f32 %v3709_v22, %v1979_v7  ;;  %v1932_v23 = vpop.f32.mrb[35].mxu1  ;;  %v2150_v13 = vpop.f32.mrb[29].mxu0  ;;  %v4717_v5 = vsel %vm4695_vm12, %v2888_v54, %v4661_v50  ;;  %vm4841_vm14 = vmand %vm2868_vm10, %vm2856_vm8 }
 0x152   : > { %v1784_v19 = vadd.f32 %v1772_v20, %v1749_v38  ;;  %v1775_v63 = vld [vmem:[#allocation3 + $0x58] sm:$0xff]  ;;  %2000 = vst.msk [vmem:[#allocation3] sm:$0xff] %vm655_vm4, %v1988_v42  ;;  %v1989_v58 = vadd.f32 %v1977_v48, %v1932_v23  ;;  %v3725_v0 = vpop.f32.mrb[30].mxu0  ;;  %v1982_v27 = vld [vmem:[#allocation3 + $0x30] sm:$0xff]  ;;  %v2769_v20 = vmul.u32 24, %v2768_v34  ;;  %vm2912_vm3 = vcmp.ge.s32.totalorder %v4717_v5, 1 }
 0x153   : > { %1798 = vst.msk [vmem:[#allocation3 + $0x50] sm:$0xff] %vm655_vm4, %v1786_v44  ;;  %v1787_v26 = vadd.f32 %v3701_v45, %v1775_v63  ;;  %v1773_v1 = vld [vmem:[#allocation3 + $0x48] sm:$0xff]  ;;  %2003 = vst.msk [vmem:[#allocation3 + $0x18] sm:$0xff] %vm655_vm4, %v1991_v4  ;;  %v2153_v14 = vpop.f32.mrb[31].mxu0  ;;  %v1980_v62 = vld [vmem:[#allocation3 + $0x20] sm:$0xff]  ;;  %vm2924_vm5 = vcmp.le.s32.totalorder %v4717_v5, 16 }
 0x154   : > { %1796 = vst.msk [vmem:[#allocation3 + $0x40] sm:$0xff] %vm655_vm4, %v1784_v19  ;;  %v1785_v17 = vadd.f32 %v1773_v1, %v1752_v6  ;;  %2001 = vst.msk [vmem:[#allocation3 + $0x8] sm:$0xff] %vm655_vm4, %v1989_v58  ;;  %v4706_v57 = vmul.u32.u64.low 2863311531, %v4682_v16  ;;  %v4707_v45 = vmul.u32.u64.high 2863311531, %v4682_v16, %v4706_v57  ;;  %v1983_v35 = vld [vmem:[#allocation3 + $0x38] sm:$0xff]  ;;  %v2801_v48 = vshrl.u32 %v4690_v21, 4 }
 0x155   : > { %1799 = vst.msk [vmem:[#allocation3 + $0x58] sm:$0xff] %vm655_vm4, %v1787_v26  ;;  %v1981_v32 = vld [vmem:[#allocation3 + $0x28] sm:$0xff]  ;;  %v4747_v4 = vmul.u32.u64.low 2863311531, %v4711_v30  ;;  %v4748_v23 = vmul.u32.u64.high 2863311531, %v4711_v30, %v4747_v4  ;;  %vm2851_vm6 = vcmp.ne.s32.totalorder %v4720_v47, 0  ;;  %vm2863_vm7 = vcmp.lt.s32.totalorder %v4720_v47, 0  ;;  %vm4809_vm11 = vmand %vm2912_vm3, %vm2924_vm5 }
 0x156   : > { %1797 = vst.msk [vmem:[#allocation3 + $0x48] sm:$0xff] %vm655_vm4, %v1785_v17  ;;  %v3712_v59 = vpop.f32.mrb[36].mxu1  ;;  %v4763_v19 = vadd.s32 24, %v4720_v47  ;;  %v4766_v63 = vadd.s32 88, %v3987_v3  ;;  %v2779_v26 = vshrl.u32 %v4707_v45, 4  ;;  %v4771_v1 = vadd.s32 72, %v3987_v3  ;;  %vm4829_vm12 = vmand %vm2863_vm7, %vm2851_vm6 }
 0x157   : > { %v1994_v29 = vadd.f32 %v3712_v59, %v1982_v27  ;;  %v1945_v38 = vpop.f32.mrb[37].mxu1  ;;  %v4776_v11 = vsub.s32 %v4655_v46, %v2769_v20  ;;  %v4779_v21 = vmul.u32.u64.low 2863311531, %v4742_v40  ;;  %v4780_v59 = vmul.u32.u64.high 2863311531, %v4742_v40, %v4779_v21 }
 0x158   : > { %v2199_v24 = vld [vmem:[#allocation3 + $0x10] sm:$0xff]  ;;  %v1992_v28 = vadd.f32 %v1980_v62, %v1945_v38  ;;  %v3713_v53 = vpop.f32.mrb[38].mxu1  ;;  %v3728_v6 = vpop.f32.mrb[32].mxu0  ;;  %v2802_v62 = vmul.u32 24, %v2801_v48 }
 0x159   : > { %v2211_v8 = vadd.f32 %v3724_v41, %v2199_v24  ;;  %2006 = vst.msk [vmem:[#allocation3 + $0x30] sm:$0xff] %vm655_vm4, %v1994_v29  ;;  %v2197_v25 = vld [vmem:[#allocation3] sm:$0xff]  ;;  %v1995_v56 = vadd.f32 %v3713_v53, %v1983_v35  ;;  %v1948_v55 = vpop.f32.mrb[39].mxu1  ;;  %v2166_v31 = vpop.f32.mrb[33].mxu0  ;;  %v4736_v41 = vadd.s32 24, %v4703_v12  ;;  %vm2854_vm1 = vcmp.ne.s32.totalorder %v4776_v11, 0 }
 0x15a   : > { %v2209_v43 = vadd.f32 %v2197_v25, %v2150_v13  ;;  %2004 = vst.msk [vmem:[#allocation3 + $0x20] sm:$0xff] %vm655_vm4, %v1992_v28  ;;  %v2200_v15 = vld [vmem:[#allocation3 + $0x18] sm:$0xff]  ;;  %v1993_v2 = vadd.f32 %v1981_v32, %v1948_v55  ;;  %v3729_v42 = vpop.f32.mrb[34].mxu0  ;;  %v1986_v49 = vld [vmem:[#allocation3 + $0x50] sm:$0xff]  ;;  %v4798_v28 = vmul.u32.u64.low 2863311531, %v4766_v63  ;;  %v4799_v53 = vmul.u32.u64.high 2863311531, %v4766_v63, %v4798_v28 }
 0x15b   : > { %2223 = vst.msk [vmem:[#allocation3 + $0x10] sm:$0xff] %vm655_vm4, %v2211_v8  ;;  %v2212_v51 = vadd.f32 %v3725_v0, %v2200_v15  ;;  %2007 = vst.msk [vmem:[#allocation3 + $0x38] sm:$0xff] %vm655_vm4, %v1995_v56  ;;  %v2198_v50 = vld [vmem:[#allocation3 + $0x8] sm:$0xff]  ;;  %v2169_v7 = vpop.f32.mrb[35].mxu0  ;;  %v1984_v37 = vld [vmem:[#allocation3 + $0x40] sm:$0xff]  ;;  %v2780_v25 = vmul.u32 24, %v2779_v26 }
 0x15c   : > { %2221 = vst.msk [vmem:[#allocation3] sm:$0xff] %vm655_vm4, %v2209_v43  ;;  %v2210_v44 = vadd.f32 %v2198_v50, %v2153_v14  ;;  %2005 = vst.msk [vmem:[#allocation3 + $0x28] sm:$0xff] %vm655_vm4, %v1993_v2  ;;  %v1987_v54 = vld [vmem:[#allocation3 + $0x58] sm:$0xff]  ;;  %v4814_v56 = vmul.u32.u64.low 2863311531, %v4771_v1  ;;  %v4815_v55 = vmul.u32.u64.high 2863311531, %v4771_v1, %v4814_v56  ;;  %v2892_v43 = vadd.s32 24, %v4739_v60 }
 0x15d   : > { %2224 = vst.msk [vmem:[#allocation3 + $0x18] sm:$0xff] %vm655_vm4, %v2212_v51  ;;  %v1985_v29 = vld [vmem:[#allocation3 + $0x48] sm:$0xff]  ;;  %v2834_v15 = vshrl.u32 %v4748_v23, 4  ;;  %v4846_v2 = vsub.s32 %v4670_v36, %v2802_v62  ;;  %v4852_v51 = vsel %vm4809_vm11, 1.0, %v3899_v9  ;;  %vm2866_vm2 = vcmp.lt.s32.totalorder %v4776_v11, 0 }
 0x15e   : > { %2222 = vst.msk [vmem:[#allocation3 + $0x8] sm:$0xff] %vm655_vm4, %v2210_v44  ;;  %v3716_v13 = vpop.f32.mrb[40].mxu1  ;;  %v4862_v36 = vsel %vm4829_vm12, %v4763_v19, %v4720_v47  ;;  %v4865_v44 = vsub.s32 %v4682_v16, %v2780_v25  ;;  %vm4883_vm5 = vmand %vm2866_vm2, %vm2854_vm1 }
 0x15f   : > { %v1998_v58 = vadd.f32 %v3716_v13, %v1986_v49  ;;  %v1961_v0 = vpop.f32.mrb[41].mxu1  ;;  %v4872_v49 = vsel %vm4841_vm14, %v2892_v43, %v4739_v60  ;;  %vm2857_vm6 = vcmp.ne.s32.totalorder %v4846_v2, 0  ;;  %vm2869_vm7 = vcmp.lt.s32.totalorder %v4846_v2, 0 }
 0x160   : > { %v2203_v14 = vld [vmem:[#allocation3 + $0x30] sm:$0xff]  ;;  %v1996_v10 = vadd.f32 %v1984_v37, %v1961_v0  ;;  %v3717_v17 = vpop.f32.mrb[42].mxu1  ;;  %v4773_v18 = vpop.f32.mrb[36].mxu0  ;;  %v2835_v0 = vmul.u32 24, %v2834_v15  ;;  %vm2855_vm8 = vcmp.ne.s32.totalorder %v4865_v44, 0  ;;  %v2893_v46 = vadd.s32 24, %v4846_v2  ;;  %vm4922_vm12 = vmand %vm2869_vm7, %vm2857_vm6 }
 0x161   : > { %v2215_v27 = vadd.f32 %v3728_v6, %v2203_v14  ;;  %2010 = vst.msk [vmem:[#allocation3 + $0x50] sm:$0xff] %vm655_vm4, %v1998_v58  ;;  %v2201_v39 = vld [vmem:[#allocation3 + $0x20] sm:$0xff]  ;;  %v1999_v33 = vadd.f32 %v3717_v17, %v1987_v54  ;;  %v1964_v3 = vpop.f32.mrb[43].mxu1  ;;  %v4783_v38 = vpop.f32.mrb[37].mxu0  ;;  %v2890_v58 = vadd.s32 24, %v4776_v11  ;;  %vm2911_vm11 = vcmp.ge.s32.totalorder %v4862_v36, 1  ;;  %vm4943_vm6 = vmand %vm2910_vm13, %vm2922_vm15 }
 0x162   : > { %v2213_v52 = vadd.f32 %v2201_v39, %v2166_v31  ;;  %2008 = vst.msk [vmem:[#allocation3 + $0x40] sm:$0xff] %vm655_vm4, %v1996_v10  ;;  %v2204_v57 = vld [vmem:[#allocation3 + $0x38] sm:$0xff]  ;;  %v1997_v45 = vadd.f32 %v1985_v29, %v1964_v3  ;;  %v4795_v24 = vpop.f32.mrb[38].mxu0  ;;  %v4823_v31 = vsel %vm4789_vm9, %v4736_v41, %v4703_v12  ;;  %v2378_v22 = vld [vmem:[#allocation3 + $0x10] sm:$0xff]  ;;  %v2812_v10 = vshrl.u32 %v4780_v59, 4 }
 0x163   : > { %2227 = vst.msk [vmem:[#allocation3 + $0x30] sm:$0xff] %vm655_vm4, %v2215_v27  ;;  %v2216_v35 = vadd.f32 %v3729_v42, %v2204_v57  ;;  %2011 = vst.msk [vmem:[#allocation3 + $0x58] sm:$0xff] %vm655_vm4, %v1999_v33  ;;  %v2202_v6 = vld [vmem:[#allocation3 + $0x28] sm:$0xff]  ;;  %v4803_v34 = vpop.f32.mrb[39].mxu0  ;;  %v2376_v41 = vld [vmem:[#allocation3] sm:$0xff]  ;;  %vm2913_vm3 = vcmp.ge.s32.totalorder %v4823_v31, 1  ;;  %v4913_v62 = vsub.s32 %v4711_v30, %v2835_v0  ;;  %v2905_v43 = vsel %vm4922_vm12, %v2893_v46, %v4846_v2 }
 0x164   : > { %2225 = vst.msk [vmem:[#allocation3 + $0x20] sm:$0xff] %vm655_vm4, %v2213_v52  ;;  %v2214_v32 = vadd.f32 %v2202_v6, %v2169_v7  ;;  %2009 = vst.msk [vmem:[#allocation3 + $0x48] sm:$0xff] %vm655_vm4, %v1997_v45  ;;  %v2379_v48 = vld [vmem:[#allocation3 + $0x18] sm:$0xff]  ;;  %v2845_v27 = vshrl.u32 %v4799_v53, 4  ;;  %vm2867_vm9 = vcmp.lt.s32.totalorder %v4865_v44, 0  ;;  %v2823_v3 = vshrl.u32 %v4815_v55, 4 }
 0x165   : > { %2228 = vst.msk [vmem:[#allocation3 + $0x38] sm:$0xff] %vm655_vm4, %v2216_v35  ;;  %v2377_v26 = vld [vmem:[#allocation3 + $0x8] sm:$0xff]  ;;  %vm2925_vm10 = vcmp.le.s32.totalorder %v4823_v31, 16  ;;  %v2813_v57 = vmul.u32 24, %v2812_v10  ;;  %vm2923_vm14 = vcmp.le.s32.totalorder %v4862_v36, 16  ;;  %vm2916_vm1 = vcmp.ge.s32.totalorder %v4872_v49, 1 }
 0x166   : > { %2226 = vst.msk [vmem:[#allocation3 + $0x28] sm:$0xff] %vm655_vm4, %v2214_v32  ;;  %v3740_v42 = vpop.f32.mrb[44].mxu1  ;;  %vm2928_vm2 = vcmp.le.s32.totalorder %v4872_v49, 16  ;;  %v2846_v28 = vmul.u32 24, %v2845_v27  ;;  %v2824_v8 = vmul.u32 24, %v2823_v3  ;;  %vm2860_vm13 = vcmp.ne.s32.totalorder %v4913_v62, 0 }
 0x167   : > { %v2390_v50 = vadd.f32 %v3740_v42, %v2378_v22  ;;  %v2329_v7 = vpop.f32.mrb[45].mxu1  ;;  %vm2872_vm15 = vcmp.lt.s32.totalorder %v4913_v62, 0 }
 0x168   : > { %v2207_v20 = vld [vmem:[#allocation3 + $0x50] sm:$0xff]  ;;  %v2388_v4 = vadd.f32 %v2376_v41, %v2329_v7  ;;  %v3741_v23 = vpop.f32.mrb[46].mxu1  ;;  %v4867_v13 = vpop.f32.mrb[40].mxu0  ;;  %v4980_v41 = vsub.s32 %v4742_v40, %v2813_v57  ;;  %v4996_v40 = vsub.s32 %v4766_v63, %v2846_v28  ;;  %vm5007_vm12 = vmand %vm2872_vm15, %vm2860_vm13  ;;  %v5012_v63 = vsub.s32 %v4771_v1, %v2824_v8 }
 0x169   : > { %v2219_v47 = vadd.f32 %v4773_v18, %v2207_v20  ;;  %v2205_v19 = vld [vmem:[#allocation3 + $0x40] sm:$0xff]  ;;  %2402 = vst.msk [vmem:[#allocation3 + $0x10] sm:$0xff] %vm655_vm4, %v2390_v50  ;;  %v2391_v16 = vadd.f32 %v3741_v23, %v2379_v48  ;;  %v2332_v37 = vpop.f32.mrb[47].mxu1  ;;  %v4877_v14 = vpop.f32.mrb[41].mxu0 }
 0x16a   : > { %v2217_v17 = vadd.f32 %v2205_v19, %v4783_v38  ;;  %v2208_v54 = vld [vmem:[#allocation3 + $0x58] sm:$0xff]  ;;  %2400 = vst.msk [vmem:[#allocation3] sm:$0xff] %vm655_vm4, %v2388_v4  ;;  %v2389_v18 = vadd.f32 %v2377_v26, %v2332_v37  ;;  %v4891_v21 = vpop.f32.mrb[42].mxu0  ;;  %v4909_v38 = vsel %vm4883_vm5, %v2890_v58, %v4776_v11  ;;  %v2891_v11 = vadd.s32 24, %v4865_v44  ;;  %v2382_v45 = vld [vmem:[#allocation3 + $0x30] sm:$0xff]  ;;  %vm4935_vm5 = vmand %vm2867_vm9, %vm2855_vm8 }
 0x16b   : > { %2231 = vst.msk [vmem:[#allocation3 + $0x50] sm:$0xff] %vm655_vm4, %v2219_v47  ;;  %v2220_v39 = vadd.f32 %v4795_v24, %v2208_v54  ;;  %v2206_v33 = vld [vmem:[#allocation3 + $0x48] sm:$0xff]  ;;  %2403 = vst.msk [vmem:[#allocation3 + $0x18] sm:$0xff] %vm655_vm4, %v2391_v16  ;;  %v4898_v59 = vpop.f32.mrb[43].mxu0  ;;  %vm2914_vm7 = vcmp.ge.s32.totalorder %v4909_v38, 1  ;;  %vm2926_vm0 = vcmp.le.s32.totalorder %v4909_v38, 16 }
 0x16c   : > { %2229 = vst.msk [vmem:[#allocation3 + $0x40] sm:$0xff] %vm655_vm4, %v2217_v17  ;;  %v2218_v29 = vadd.f32 %v2206_v33, %v4803_v34  ;;  %2401 = vst.msk [vmem:[#allocation3 + $0x8] sm:$0xff] %vm655_vm4, %v2389_v18  ;;  %v2380_v34 = vld [vmem:[#allocation3 + $0x20] sm:$0xff]  ;;  %v2383_v32 = vld [vmem:[#allocation3 + $0x38] sm:$0xff]  ;;  %v2903_v7 = vsel %vm4935_vm5, %v2891_v11, %v4865_v44  ;;  %v2896_v44 = vadd.s32 24, %v4913_v62  ;;  %v5018_v47 = vsel %vm4943_vm6, 1.0, %v3899_v9 }
 0x16d   : > { %2232 = vst.msk [vmem:[#allocation3 + $0x58] sm:$0xff] %vm655_vm4, %v2220_v39  ;;  %vm4953_vm8 = vmand %vm2913_vm3, %vm2925_vm10  ;;  %v2381_v2 = vld [vmem:[#allocation3 + $0x28] sm:$0xff]  ;;  %vm2917_vm10 = vcmp.ge.s32.totalorder %v2905_v43, 1  ;;  %vm2858_vm5 = vcmp.ne.s32.totalorder %v4980_v41, 0  ;;  %vm2870_vm6 = vcmp.lt.s32.totalorder %v4980_v41, 0  ;;  %v2894_v39 = vadd.s32 24, %v4980_v41 }
 0x16e   : > { %2230 = vst.msk [vmem:[#allocation3 + $0x48] sm:$0xff] %vm655_vm4, %v2218_v29  ;;  %v3744_v30 = vpop.f32.mrb[48].mxu1  ;;  %vm4970_vm3 = vmand %vm2911_vm11, %vm2923_vm14  ;;  %vm2929_vm11 = vcmp.le.s32.totalorder %v2905_v43, 16  ;;  %vm2915_vm14 = vcmp.ge.s32.totalorder %v2903_v7, 1  ;;  %v5026_v1 = vsel %vm4953_vm8, 1.0, %v3899_v9  ;;  %v5058_v17 = vsel %vm5007_vm12, %v2896_v44, %v4913_v62 }
 0x16f   : > { %v2394_v53 = vadd.f32 %v3744_v30, %v2382_v45  ;;  %v2345_v6 = vpop.f32.mrb[49].mxu1  ;;  %vm4988_vm9 = vmand %vm2916_vm1, %vm2928_vm2  ;;  %vm2927_vm1 = vcmp.le.s32.totalorder %v2903_v7, 16  ;;  %v5031_v16 = vsel %vm4970_vm3, 1.0, %v3899_v9  ;;  %vm2859_vm15 = vcmp.ne.s32.totalorder %v5012_v63, 0 }
 0x170   : > { %v2599_v25 = vld [vmem:[#allocation3 + $0x10] sm:$0xff]  ;;  %v2392_v56 = vadd.f32 %v2380_v34, %v2345_v6  ;;  %v3745_v61 = vpop.f32.mrb[50].mxu1  ;;  %v4957_v5 = vpop.f32.mrb[44].mxu0  ;;  %vm5037_vm2 = vmand %vm2914_vm7, %vm2926_vm0  ;;  %v5047_v26 = vsel %vm4988_vm9, 1.0, %v3899_v9  ;;  %vm2861_vm0 = vcmp.ne.s32.totalorder %v4996_v40, 0  ;;  %vm2873_vm7 = vcmp.lt.s32.totalorder %v4996_v40, 0 }
 0x171   : > { %v2611_v15 = vadd.f32 %v4867_v13, %v2599_v25  ;;  %2406 = vst.msk [vmem:[#allocation3 + $0x30] sm:$0xff] %vm655_vm4, %v2394_v53  ;;  %v2597_v31 = vld [vmem:[#allocation3] sm:$0xff]  ;;  %v2395_v12 = vadd.f32 %v3745_v61, %v2383_v32  ;;  %v2348_v22 = vpop.f32.mrb[51].mxu1  ;;  %v4974_v50 = vpop.f32.mrb[45].mxu0  ;;  %vm5051_vm8 = vmand %vm2917_vm10, %vm2929_vm11  ;;  %vm2871_vm3 = vcmp.lt.s32.totalorder %v5012_v63, 0  ;;  %v2897_v52 = vadd.s32 24, %v4996_v40 }
 0x172   : > { %v2609_v20 = vadd.f32 %v2597_v31, %v4877_v14  ;;  %2404 = vst.msk [vmem:[#allocation3 + $0x20] sm:$0xff] %vm655_vm4, %v2392_v56  ;;  %v2600_v36 = vld [vmem:[#allocation3 + $0x18] sm:$0xff]  ;;  %v2393_v4 = vadd.f32 %v2381_v2, %v2348_v22  ;;  %v4992_v48 = vpop.f32.mrb[46].mxu0  ;;  %v2386_v60 = vld [vmem:[#allocation3 + $0x50] sm:$0xff]  ;;  %vm5064_vm13 = vmand %vm2915_vm14, %vm2927_vm1  ;;  %v5092_v30 = vsel %vm5051_vm8, 1.0, %v3899_v9  ;;  %v2895_v6 = vadd.s32 24, %v5012_v63 }
 0x173   : > { %2623 = vst.msk [vmem:[#allocation3 + $0x10] sm:$0xff] %vm655_vm4, %v2611_v15  ;;  %v2612_v13 = vadd.f32 %v4891_v21, %v2600_v36  ;;  %2407 = vst.msk [vmem:[#allocation3 + $0x38] sm:$0xff] %vm655_vm4, %v2395_v12  ;;  %v2598_v58 = vld [vmem:[#allocation3 + $0x8] sm:$0xff]  ;;  %v5001_v49 = vpop.f32.mrb[47].mxu0  ;;  %v2384_v21 = vld [vmem:[#allocation3 + $0x40] sm:$0xff]  ;;  %v5115_v56 = vsel %vm5064_vm13, 1.0, %v3899_v9 }
 0x174   : > { %2621 = vst.msk [vmem:[#allocation3] sm:$0xff] %vm655_vm4, %v2609_v20  ;;  %v2610_v19 = vadd.f32 %v2598_v58, %v4898_v59  ;;  %2405 = vst.msk [vmem:[#allocation3 + $0x28] sm:$0xff] %vm655_vm4, %v2393_v4  ;;  %v5074_v59 = vsel %vm5037_vm2, 1.0, %v3899_v9  ;;  %v2387_v38 = vld [vmem:[#allocation3 + $0x58] sm:$0xff]  ;;  %vm2920_vm11 = vcmp.ge.s32.totalorder %v5058_v17, 1  ;;  %vm5320_vm14 = vcmask 257024  }
 0x175   : > { %2624 = vst.msk [vmem:[#allocation3 + $0x18] sm:$0xff] %vm655_vm4, %v2612_v13  ;;  %vm5082_vm9 = vmand %vm2870_vm6, %vm2858_vm5  ;;  %v2385_v28 = vld [vmem:[#allocation3 + $0x48] sm:$0xff]  ;;  %vm2932_vm1 = vcmp.le.s32.totalorder %v5058_v17, 16 }
 0x176   : > { %2622 = vst.msk [vmem:[#allocation3 + $0x8] sm:$0xff] %vm655_vm4, %v2610_v19  ;;  %v3748_v14 = vpop.f32.mrb[52].mxu1  ;;  %vm5098_vm10 = vmand %vm2873_vm7, %vm2861_vm0  ;;  %v5135_v42 = vsel %vm5082_vm9, %v2894_v39, %v4980_v41 }
 0x177   : > { %v2398_v54 = vadd.f32 %v3748_v14, %v2386_v60  ;;  %v2361_v18 = vpop.f32.mrb[53].mxu1  ;;  %vm5124_vm12 = vmand %vm2871_vm3, %vm2859_vm15  ;;  %v5144_v20 = vsel %vm5098_vm10, %v2897_v52, %v4996_v40  ;;  %vm2918_vm6 = vcmp.ge.s32.totalorder %v5135_v42, 1  ;;  %vm2930_vm8 = vcmp.le.s32.totalorder %v5135_v42, 16 }
 0x178   : > { %v2603_v33 = vld [vmem:[#allocation3 + $0x30] sm:$0xff]  ;;  %v2396_v3 = vadd.f32 %v2384_v21, %v2361_v18  ;;  %v3749_v29 = vpop.f32.mrb[54].mxu1  ;;  %v5076_v46 = vpop.f32.mrb[48].mxu0  ;;  %v5153_v23 = vsel %vm5124_vm12, %v2895_v6, %v5012_v63  ;;  %vm5321_vm2 = vmmov %vm5320_vm14  ;;  %vm2921_vm0 = vcmp.ge.s32.totalorder %v5144_v20, 1  ;;  %vm2933_vm7 = vcmp.le.s32.totalorder %v5144_v20, 16 }
 0x179   : > { %v2615_v11 = vadd.f32 %v4957_v5, %v2603_v33  ;;  %2410 = vst.msk [vmem:[#allocation3 + $0x50] sm:$0xff] %vm655_vm4, %v2398_v54  ;;  %v2601_v57 = vld [vmem:[#allocation3 + $0x20] sm:$0xff]  ;;  %v2399_v45 = vadd.f32 %v3749_v29, %v2387_v38  ;;  %v2364_v24 = vpop.f32.mrb[55].mxu1  ;;  %v2582_v53 = vpop.f32.mrb[49].mxu0  ;;  %vm5322_vm5 = vmmov %vm5321_vm2  ;;  %vm2919_vm15 = vcmp.ge.s32.totalorder %v5153_v23, 1  ;;  %vm2931_vm10 = vcmp.le.s32.totalorder %v5153_v23, 16 }
 0x17a   : > { %v2635_v34 = vld [vmem:[#allocation3 + $0x10] sm:$0xff]  ;;  %v2613_v8 = vadd.f32 %v2601_v57, %v4974_v50  ;;  %2408 = vst.msk [vmem:[#allocation3 + $0x40] sm:$0xff] %vm655_vm4, %v2396_v3  ;;  %v2604_v25 = vld [vmem:[#allocation3 + $0x38] sm:$0xff]  ;;  %v2397_v55 = vadd.f32 %v2385_v28, %v2364_v24  ;;  %v5118_v61 = vpop.f32.mrb[50].mxu0  ;;  %vm5323_vm13 = vmmov %vm5321_vm2 }
 0x17b   : > { %v3503_v5 = vpack.c.bf16 %v2635_v34, %v2635_v34  ;;  %v2972_v43 = vmul.f32 %v4852_v51, %v2635_v34  ;;  %v2633_v15 = vld [vmem:[#allocation3] sm:$0xff]  ;;  %2627 = vst.msk [vmem:[#allocation3 + $0x30] sm:$0xff] %vm655_vm4, %v2615_v11  ;;  %v2616_v31 = vadd.f32 %v4992_v48, %v2604_v25  ;;  %2411 = vst.msk [vmem:[#allocation3 + $0x58] sm:$0xff] %vm655_vm4, %v2399_v45  ;;  %v2602_v12 = vld [vmem:[#allocation3 + $0x28] sm:$0xff]  ;;  %v2585_v22 = vpop.f32.mrb[51].mxu0 }
 0x17c   : > { %v3501_v2 = vpack.c.bf16 %v2633_v15, %v2633_v15  ;;  %v2970_v50 = vmul.f32 %v5018_v47, %v2633_v15  ;;  %v2636_v7 = vld [vmem:[#allocation3 + $0x18] sm:$0xff]  ;;  %2625 = vst.msk [vmem:[#allocation3 + $0x20] sm:$0xff] %vm655_vm4, %v2613_v8  ;;  %v2614_v51 = vadd.f32 %v2602_v12, %v5001_v49  ;;  %2409 = vst.msk [vmem:[#allocation3 + $0x48] sm:$0xff] %vm655_vm4, %v2397_v55 }
 0x17d   : > { %2699 = vst.msk [vmem:[%s5108_s24 + $0x8] sm:$0xf] %vm5320_vm14, %v3503_v5  ;;  %v3015_v41 = vmul.f32 %v2972_v43, %v2635_v34  ;;  %v3504_v36 = vpack.c.bf16 %v2636_v7, %v2636_v7  ;;  %v2634_v4 = vld [vmem:[#allocation3 + $0x8] sm:$0xff]  ;;  %v2973_v44 = vmul.f32 %v5026_v1, %v2636_v7  ;;  %v2985_v47 = vsel %vm655_vm4, %v2972_v43, 0.0  ;;  %vm5324_vm3 = vmmov %vm5321_vm2 }
 0x17e   : > { %2628 = vst.msk [vmem:[#allocation3 + $0x38] sm:$0xff] %vm655_vm4, %v2616_v31  ;;  %v3013_v48 = vmul.f32 %v2970_v50, %v2633_v15  ;;  %v3502_v40 = vpack.c.bf16 %v2634_v4, %v2634_v4  ;;  %v2971_v13 = vmul.f32 %v5031_v16, %v2634_v4  ;;  %2626 = vst.msk [vmem:[#allocation3 + $0x28] sm:$0xff] %vm655_vm4, %v2614_v51  ;;  %v2982_v58 = vsel %vm655_vm4, %v2970_v50, 0.0 }
 0x17f   : > { %2697 = vst.msk [vmem:[%s5108_s24] sm:$0xf] %vm5321_vm2, %v3501_v2  ;;  %v3028_v19 = vsel %vm655_vm4, %v3015_v41, 0.0  ;;  %v3016_v60 = vmul.f32 %v2973_v44, %v2636_v7  ;;  %v2987_v27 = vsel %vm655_vm4, %v2973_v44, 0.0  ;;  %vm5188_vm9 = vmand %vm2920_vm11, %vm2932_vm1 }
 0x180   : > { %2700 = vst.msk [vmem:[%s5108_s24 + $0xc] sm:$0xf] %vm5322_vm5, %v3504_v36  ;;  %v2983_v49 = vsel %vm655_vm4, %v2971_v13, 0.0  ;;  %v3014_v0 = vmul.f32 %v2971_v13, %v2634_v4  ;;  %v2607_v63 = vld [vmem:[#allocation3 + $0x50] sm:$0xff]  ;;  %v3025_v14 = vsel %vm655_vm4, %v3013_v48, 0.0  ;;  %vm5327_vm12 = vmmov %vm5321_vm2 }
 0x181   : > { %2698 = vst.msk [vmem:[%s5108_s24 + $0x4] sm:$0xf] %vm5323_vm13, %v3502_v40  ;;  %v2984_v1 = vadd.f32 %v2983_v49, %v2982_v58  ;;  %v2619_v16 = vadd.f32 %v5076_v46, %v2607_v63  ;;  %v2605_v37 = vld [vmem:[#allocation3 + $0x40] sm:$0xff]  ;;  %v3030_v35 = vsel %vm655_vm4, %v3016_v60, 0.0  ;;  %vm2942_vm14 = vmand %vm2918_vm6, %vm2930_vm8  ;;  %vm3011_vm13 = vcmask 253952  }
 0x182   : > { %v3026_v10 = vsel %vm655_vm4, %v3014_v0, 0.0  ;;  %v2639_v54 = vld [vmem:[#allocation3 + $0x30] sm:$0xff]  ;;  %v2617_v18 = vadd.f32 %v2605_v37, %v2582_v53  ;;  %v2608_v21 = vld [vmem:[#allocation3 + $0x58] sm:$0xff]  ;;  %vm2945_vm11 = vmand %vm2921_vm0, %vm2933_vm7  ;;  %v3491_v15 = vsel %vm2942_vm14, 1.0, %v3899_v9 }
 0x183   : > { %v2986_v39 = vadd.f32 %v2985_v47, %v2984_v1  ;;  %v3027_v33 = vadd.f32 %v3026_v10, %v3025_v14  ;;  %v3507_v3 = vpack.c.bf16 %v2639_v54, %v2639_v54  ;;  %v2637_v29 = vld [vmem:[#allocation3 + $0x20] sm:$0xff]  ;;  %2631 = vst.msk [vmem:[#allocation3 + $0x50] sm:$0xff] %vm655_vm4, %v2619_v16  ;;  %v2606_v38 = vld [vmem:[#allocation3 + $0x48] sm:$0xff]  ;;  %v2620_v11 = vadd.f32 %v5118_v61, %v2608_v21  ;;  %vm5328_vm1 = vmmov %vm5321_vm2 }
 0x184   : > { %v3505_v46 = vpack.c.bf16 %v2637_v29, %v2637_v29  ;;  %v2974_v62 = vmul.f32 %v5074_v59, %v2637_v29  ;;  %2629 = vst.msk [vmem:[#allocation3 + $0x40] sm:$0xff] %vm655_vm4, %v2617_v18  ;;  %v2618_v57 = vadd.f32 %v2606_v38, %v2585_v22  ;;  %v2976_v24 = vmul.f32 %v5047_v26, %v2639_v54  ;;  %vm2943_vm2 = vmand %vm2919_vm15, %vm2931_vm10 }
 0x185   : > { %v2640_v52 = vld [vmem:[#allocation3 + $0x38] sm:$0xff]  ;;  %v3029_v45 = vadd.f32 %v3028_v19, %v3027_v33  ;;  %2703 = vst.msk [vmem:[%s5108_s24 + $0x18] sm:$0xf] %vm5324_vm3, %v3507_v3  ;;  %v2988_v28 = vadd.f32 %v2987_v27, %v2986_v39  ;;  %v2638_v53 = vld [vmem:[#allocation3 + $0x28] sm:$0xff]  ;;  %vm5329_vm5 = vmmov %vm5328_vm1  ;;  %v3492_v51 = vsel %vm2943_vm2, 1.0, %v3899_v9 }
 0x186   : > { %2701 = vst.msk [vmem:[%s5108_s24 + $0x10] sm:$0xf] %vm5327_vm12, %v3505_v46  ;;  %v2989_v6 = vsel %vm655_vm4, %v2974_v62, 0.0  ;;  %v3017_v26 = vmul.f32 %v2974_v62, %v2637_v29  ;;  %v3508_v34 = vpack.c.bf16 %v2640_v52, %v2640_v52  ;;  %v3506_v25 = vpack.c.bf16 %v2638_v53, %v2638_v53  ;;  %vm5330_vm6 = vmmov %vm5328_vm1 }
 0x187   : > { %2632 = vst.msk [vmem:[#allocation3 + $0x58] sm:$0xff] %vm655_vm4, %v2620_v11  ;;  %2630 = vst.msk [vmem:[#allocation3 + $0x48] sm:$0xff] %vm655_vm4, %v2618_v57  ;;  %v2990_v17 = vadd.f32 %v2989_v6, %v2988_v28  ;;  %v3031_v8 = vadd.f32 %v3030_v35, %v3029_v45  ;;  %v2977_v61 = vmul.f32 %v5092_v30, %v2640_v52  ;;  %v3493_v30 = vsel %vm5188_vm9, 1.0, %v3899_v9 }
 0x188   : > { %v3032_v55 = vsel %vm655_vm4, %v3017_v26, 0.0  ;;  %2704 = vst.msk [vmem:[%s5108_s24 + $0x1c] sm:$0xf] %vm5328_vm1, %v3508_v34  ;;  %v2975_v32 = vmul.f32 %v5115_v56, %v2638_v53  ;;  %v3019_v5 = vmul.f32 %v2976_v24, %v2639_v54  ;;  %v3494_v56 = vsel %vm2945_vm11, 1.0, %v3899_v9  ;;  %vm5331_vm8 = vmmov %vm5328_vm1 }
 0x189   : > { %v3033_v43 = vadd.f32 %v3032_v55, %v3031_v8  ;;  %2702 = vst.msk [vmem:[%s5108_s24 + $0x14] sm:$0xf] %vm5329_vm5, %v3506_v25  ;;  %v2993_v22 = vsel %vm655_vm4, %v2976_v24, 0.0  ;;  %v3020_v20 = vmul.f32 %v2977_v61, %v2640_v52  ;;  %v2995_v48 = vsel %vm655_vm4, %v2977_v61, 0.0  ;;  %vm5332_vm0 = vmmov %vm5328_vm1 }
 0x18a   : > { %v2991_v31 = vsel %vm655_vm4, %v2975_v32, 0.0  ;;  %v3018_v12 = vmul.f32 %v2975_v32, %v2638_v53  ;;  %v2643_v42 = vld [vmem:[#allocation3 + $0x50] sm:$0xff]  ;;  %v3036_v23 = vsel %vm655_vm4, %v3019_v5, 0.0  ;;  %vm5333_vm7 = vmmov %vm5332_vm0 }
 0x18b   : > { %v2992_v2 = vadd.f32 %v2991_v31, %v2990_v17  ;;  %v3511_v50 = vpack.c.bf16 %v2643_v42, %v2643_v42  ;;  %v2641_v7 = vld [vmem:[#allocation3 + $0x40] sm:$0xff]  ;;  %v2980_v49 = vmul.f32 %v3493_v30, %v2643_v42  ;;  %v3038_v16 = vsel %vm655_vm4, %v3020_v20, 0.0 }
 0x18c   : > { %v3034_v41 = vsel %vm655_vm4, %v3018_v12, 0.0  ;;  %v3509_v36 = vpack.c.bf16 %v2641_v7, %v2641_v7  ;;  %v2978_v4 = vmul.f32 %v3491_v15, %v2641_v7 }
 0x18d   : > { %v2994_v44 = vadd.f32 %v2993_v22, %v2992_v2  ;;  %v3035_v40 = vadd.f32 %v3034_v41, %v3033_v43  ;;  %2707 = vst.msk [vmem:[%s5108_s24 + $0x28] sm:$0xf] %vm5330_vm6, %v3511_v50  ;;  %v3023_v18 = vmul.f32 %v2980_v49, %v2643_v42  ;;  %v3001_v3 = vsel %vm655_vm4, %v2980_v49, 0.0 }
 0x18e   : > { %v2644_v13 = vld [vmem:[#allocation3 + $0x58] sm:$0xff]  ;;  %v2642_v58 = vld [vmem:[#allocation3 + $0x48] sm:$0xff]  ;;  %2705 = vst.msk [vmem:[%s5108_s24 + $0x20] sm:$0xf] %vm5331_vm8, %v3509_v36  ;;  %v2997_v9 = vsel %vm655_vm4, %v2978_v4, 0.0  ;;  %v3021_v0 = vmul.f32 %v2978_v4, %v2641_v7 }
 0x18f   : > { %v3512_v63 = vpack.c.bf16 %v2644_v13, %v2644_v13  ;;  %v3037_v47 = vadd.f32 %v3036_v23, %v3035_v40  ;;  %v2996_v19 = vadd.f32 %v2995_v48, %v2994_v44  ;;  %v3510_v1 = vpack.c.bf16 %v2642_v58, %v2642_v58 }
 0x190   : > { %v3040_v37 = vsel %vm655_vm4, %v3021_v0, 0.0  ;;  %v2981_v14 = vmul.f32 %v3494_v56, %v2644_v13  ;;  %v2979_v60 = vmul.f32 %v3492_v51, %v2642_v58  ;;  %v3044_v52 = vsel %vm655_vm4, %v3023_v18, 0.0 }
 0x191   : > { %2708 = vst.msk [vmem:[%s5108_s24 + $0x2c] sm:$0xf] %vm5332_vm0, %v3512_v63  ;;  %v2998_v10 = vadd.f32 %v2997_v9, %v2996_v19  ;;  %v3039_v54 = vadd.f32 %v3038_v16, %v3037_v47 }
 0x192   : > { %2706 = vst.msk [vmem:[%s5108_s24 + $0x24] sm:$0xf] %vm5333_vm7, %v3510_v1  ;;  %v2999_v21 = vsel %vm655_vm4, %v2979_v60, 0.0  ;;  %v3022_v27 = vmul.f32 %v2979_v60, %v2642_v58  ;;  %v3024_v29 = vmul.f32 %v2981_v14, %v2644_v13  ;;  %v3003_v11 = vsel %vm655_vm4, %v2981_v14, 0.0 }
 0x193   : > { %v3041_v39 = vadd.f32 %v3040_v37, %v3039_v54  ;;  %v3000_v33 = vadd.f32 %v2999_v21, %v2998_v10 }
 0x194   : > { %v3042_v38 = vsel %vm655_vm4, %v3022_v27, 0.0  ;;  %v3046_v24 = vsel %vm655_vm4, %v3024_v29, 0.0 }
 0x195   : > { %v3002_v46 = vadd.f32 %v3001_v3, %v3000_v33  ;;  %v3043_v62 = vadd.f32 %v3042_v38, %v3041_v39 }
 0x197   : > { %v3004_v57 = vadd.f32 %v3003_v11, %v3002_v46  ;;  %v3045_v45 = vadd.f32 %v3044_v52, %v3043_v62 }
 0x199   : > { %v3005_v28 = vrot.slane %v3004_v57, 4  ;;  %v3047_v53 = vadd.f32 %v3046_v24, %v3045_v45 }
 0x19b   : > { %v3006_v59 = vadd.f32 %v3005_v28, %v3004_v57  ;;  %v3048_v35 = vrot.slane %v3047_v53, 4 }
 0x19d   : > { %v3007_v6 = vrot.slane %v3006_v59, 2  ;;  %v3049_v26 = vadd.f32 %v3048_v35, %v3047_v53 }
 0x19f   : > { %v3008_v34 = vadd.f32 %v3007_v6, %v3006_v59  ;;  %v3050_v17 = vrot.slane %v3049_v26, 2 }
 0x1a1   : > { %v3009_v8 = vrot.slane %v3008_v34, 1  ;;  %v3051_v25 = vadd.f32 %v3050_v17, %v3049_v26 }
 0x1a3   : > { %v3010_v55 = vadd.f32 %v3009_v8, %v3008_v34  ;;  %v3052_v61 = vrot.slane %v3051_v25, 1 }
 0x1a5   : > { %3012 = vst.msk [vmem:[%s548_s12] sm:$0x1] %vm3011_vm13, %v3010_v55  ;;  %v3053_v32 = vadd.f32 %v3052_v61, %v3051_v25 }
 0x1a7   : > { %3054 = vst.msk [vmem:[%s558_s13] sm:$0x1] %vm3011_vm13, %v3053_v32 }
 0x1a8 PF: > { %s19_s9 = sadd.s32 1, %s3896_s9   ;;  %s5334_s27 = smov %s3888_s29 }
 0x1a9   : > { %p16_p0 = scmp.ge.s32.totalorder %s19_s9, 10   ;;  %s5335_s28 = smov %s3892_s30 }
 0x1aa   : > { %s5336_s29 = smov %s5339_s10  ;;  %s5337_s30 = smov %s5343_s11 }
 0x1ab   :  { %18 = sbr.rel (!%p16_p0) target bundleno = 3 (0x3), region = 115 }

</bundles_post_ra>
